<compile_context>
chip_gen: v7x
topology: tpu7x:2x2x1
jax: 0.10.0
libtpu: 0.0.40
codegen_flags: <defaults>
</compile_context>

<pallas_src>
import functools

import jax
import jax.numpy as jnp
from jax import lax
from jax.experimental import pallas as pl
from jax.experimental.pallas import tpu as pltpu

EPS = 1e-5  # PyTorch BatchNorm2d default


def _round_up(x, m):
    return (x + m - 1) // m * m


# ---------------------------------------------------------------------------
# Pass 1: in-kernel im2col conv (9 shifted-row matmuls) + per-image BN partials.
# ---------------------------------------------------------------------------
def _conv_stats_kernel(x_ref, w_ref, m_ref, y_ref, s1_ref, s2_ref, *, offsets, rows):
    # x_ref : (R_ext, Cin_p)    flattened zero-padded image (compute dtype)
    # w_ref : (9, Cin_p, C_pad) per-tap reshaped conv weights (compute dtype)
    # m_ref : (rows, 1)         validity mask for the statistics (f32)
    # y_ref : (rows, C_pad)     conv output for this image (y_dtype, written)
    # s1_ref: (1, 1, C_pad)     masked sum   over valid pixels (f32, written)
    # s2_ref: (1, 1, C_pad)     masked sumsq over valid pixels (f32, written)
    acc = jnp.dot(x_ref[pl.ds(offsets[0], rows), :], w_ref[0],
                  preferred_element_type=jnp.float32)
    for t in range(1, 9):
        acc = acc + jnp.dot(x_ref[pl.ds(offsets[t], rows), :], w_ref[t],
                            preferred_element_type=jnp.float32)

    m = m_ref[...]                      # (rows, 1), broadcast over lanes
    ym = acc * m
    s1_ref[...] = jnp.sum(ym, axis=0, keepdims=True)[None]
    s2_ref[...] = jnp.sum(ym * acc, axis=0, keepdims=True)[None]
    y_ref[...] = acc.astype(y_ref.dtype)


# ---------------------------------------------------------------------------
# Pass 2: y -> relu(a*y + b), streaming with large lane-dense blocks.
# ---------------------------------------------------------------------------
def _bn_relu_kernel(y_ref, a_ref, b_ref, o_ref):
    y = y_ref[...].astype(jnp.float32)
    o_ref[...] = jnp.maximum(y * a_ref[...] + b_ref[...], 0.0).astype(o_ref.dtype)


def conv_bn_relu(x_nchw, conv_w, conv_b, bn_gamma, bn_beta, *,
                 compute_dtype=jnp.bfloat16, vmem_limit_mb=36):
    """Conv2d(3x3, pad=1) -> BatchNorm2d (training batch stats) -> ReLU.

    x_nchw: (N, Cin, H, W) f32; conv_w: (Cout, Cin, 3, 3). Returns (N, Cout, H, W) f32.
    conv_b is accepted for API parity but mathematically cancels under training-mode
    BatchNorm, so it is not used in the compute.
    """
    N, Cin, H, W = x_nchw.shape
    Cout = conv_w.shape[0]
    P = N * H * W                       # number of valid output pixels
    R = (H + 2) * (W + 2)               # flattened padded-grid rows per image

    is_bf16 = jnp.dtype(compute_dtype) == jnp.dtype(jnp.bfloat16)
    y_dtype = jnp.bfloat16 if is_bf16 else jnp.float32

    rows = _round_up(R, 16)             # output rows per image (sublane-pack friendly)
    Cin_p = _round_up(Cin, 16)          # contraction dim: sublane granule only (no 128 pad)
    C_pad = _round_up(Cout, 128)        # lane-dense output channels
    F = W + 3                           # front zero margin so all tap shifts are >= 0
    R_ext = _round_up(rows + 2 * W + 6, 16)

    # --- flattened, spatially padded input in NHWC (one pass in XLA, no 9x blowup) ---
    x_nhwc = jnp.transpose(x_nchw, (0, 2, 3, 1)).astype(jnp.float32)
    x_p = jnp.pad(x_nhwc, ((0, 0), (1, 1), (1, 1), (0, 0)))          # (N, H+2, W+2, Cin)
    x_flat = x_p.reshape(N, R, Cin)
    x_ext = jnp.pad(x_flat, ((0, 0), (F, R_ext - F - R), (0, Cin_p - Cin)))
    x_ext = x_ext.astype(compute_dtype)                              # (N, R_ext, Cin_p)

    # --- per-tap weights: (9, Cin_p, C_pad), tap index t = kh*3 + kw ---
    w9 = jnp.transpose(conv_w.astype(jnp.float32), (2, 3, 1, 0)).reshape(9, Cin, Cout)
    w9 = jnp.pad(w9, ((0, 0), (0, Cin_p - Cin), (0, C_pad - Cout))).astype(compute_dtype)

    # conv_b intentionally unused: BN(y + b) == BN(y) in training mode (batch stats).

    g2d = jnp.pad(bn_gamma.astype(jnp.float32).reshape(1, Cout),
                  ((0, 0), (0, C_pad - Cout)))
    beta2d = jnp.pad(bn_beta.astype(jnp.float32).reshape(1, Cout),
                     ((0, 0), (0, C_pad - Cout)))

    # --- validity mask over the padded-grid rows (border / tail rows excluded from stats) ---
    rr = jnp.arange(rows)
    hp = rr // (W + 2)
    wp = rr % (W + 2)
    valid = (hp >= 1) & (hp <= H) & (wp >= 1) & (wp <= W) & (rr < R)
    mask = valid.astype(jnp.float32).reshape(rows, 1)

    # Tap row offsets into the extended flat image (static Python ints).
    offsets = tuple(F + (kh - 1) * (W + 2) + (kw - 1)
                    for kh in range(3) for kw in range(3))

    cparams = pltpu.CompilerParams(
        dimension_semantics=("parallel",),          # disjoint per-image blocks -> megacore-safe
        vmem_limit_bytes=vmem_limit_mb * 1024 * 1024,
    )

    # --- pass 1: conv (in-kernel im2col) + per-image BN partials ---
    y, s1, s2 = pl.pallas_call(
        functools.partial(_conv_stats_kernel, offsets=offsets, rows=rows),
        out_shape=(
            jax.ShapeDtypeStruct((N * rows, C_pad), y_dtype),
            jax.ShapeDtypeStruct((N, 1, C_pad), jnp.float32),
            jax.ShapeDtypeStruct((N, 1, C_pad), jnp.float32),
        ),
        grid=(N,),
        in_specs=[
            pl.BlockSpec((None, R_ext, Cin_p), lambda n: (n, 0, 0)),   # one image per step
            pl.BlockSpec((9, Cin_p, C_pad), lambda n: (0, 0, 0)),      # grid-invariant weights
            pl.BlockSpec((rows, 1), lambda n: (0, 0)),                 # grid-invariant mask
        ],
        out_specs=(
            pl.BlockSpec((rows, C_pad), lambda n: (n, 0)),
            pl.BlockSpec((1, 1, C_pad), lambda n: (n, 0, 0)),
            pl.BlockSpec((1, 1, C_pad), lambda n: (n, 0, 0)),
        ),
        compiler_params=cparams,
    )(x_ext, w9, mask)

    # --- finalize (tiny): batch mean / biased variance -> fused affine ---
    inv_p = 1.0 / float(P)
    mean = jnp.sum(s1, axis=0) * inv_p                # (1, C_pad)
    ex2 = jnp.sum(s2, axis=0) * inv_p                 # (1, C_pad)
    var = jnp.maximum(ex2 - mean * mean, 0.0)         # biased (training-mode) variance
    a = g2d * lax.rsqrt(var + EPS)                    # fused scale
    b = beta2d - a * mean                             # fused shift

    # --- pass 2: normalize + affine + ReLU with large streaming blocks ---
    g = 1
    for cand in range(N, 0, -1):                      # biggest image-group whose f32 block <= 8 MiB
        if N % cand == 0 and cand * rows * C_pad * 4 <= 8 * 1024 * 1024:
            g = cand
            break
    T2 = g * rows
    n2 = N // g

    out_flat = pl.pallas_call(
        _bn_relu_kernel,
        out_shape=jax.ShapeDtypeStruct((N * rows, C_pad), jnp.float32),
        grid=(n2,),
        in_specs=[
            pl.BlockSpec((T2, C_pad), lambda i: (i, 0)),
            pl.BlockSpec((1, C_pad), lambda i: (0, 0)),
            pl.BlockSpec((1, C_pad), lambda i: (0, 0)),
        ],
        out_specs=pl.BlockSpec((T2, C_pad), lambda i: (i, 0)),
        # reuse y's buffer in place when dtypes match (f32 path)
        input_output_aliases={0: 0} if y_dtype == jnp.float32 else {},
        compiler_params=cparams,
    )(y, a, b)

    # strip border/tail rows + channel padding, back to NCHW (single fused XLA pass).
    out = out_flat.reshape(N, rows, C_pad)[:, :R, :Cout]
    out = out.reshape(N, H + 2, W + 2, Cout)[:, 1:H + 1, 1:W + 1, :]
    return jnp.transpose(out, (0, 3, 1, 2))


def _reference(x_nchw, conv_w, conv_b, bn_gamma, bn_beta):
    """Pure-JAX reference matching the PyTorch forward (BN in training mode)."""
    y = lax.conv_general_dilated(
        x_nchw, conv_w, window_strides=(1, 1), padding=((1, 1), (1, 1)),
        dimension_numbers=("NCHW", "OIHW", "NCHW"))
    y = y + conv_b.reshape(1, -1, 1, 1)
    mean = jnp.mean(y, axis=(0, 2, 3), keepdims=True)
    var = jnp.mean((y - mean) ** 2, axis=(0, 2, 3), keepdims=True)
    y = bn_gamma.reshape(1, -1, 1, 1) * (y - mean) / jnp.sqrt(var + EPS) \
        + bn_beta.reshape(1, -1, 1, 1)
    return jnp.maximum(y, 0.0)


if __name__ == "__main__":
    key = jax.random.PRNGKey(0)
    k_x, k_w, k_b, k_g, k_beta = jax.random.split(key, 5)

    N, Cin, H, W = 2, 4, 16, 16
    Cout = 8

    x = jax.random.normal(k_x, (N, Cin, H, W), dtype=jnp.float32)
    conv_w = jax.random.normal(k_w, (Cout, Cin, 3, 3), dtype=jnp.float32) * 0.1
    conv_b = jax.random.normal(k_b, (Cout,), dtype=jnp.float32) * 0.1
    bn_gamma = 1.0 + 0.1 * jax.random.normal(k_g, (Cout,), dtype=jnp.float32)
    bn_beta = 0.1 * jax.random.normal(k_beta, (Cout,), dtype=jnp.float32)

    fn_bf16 = jax.jit(functools.partial(conv_bn_relu, compute_dtype=jnp.bfloat16))
    fn_f32 = jax.jit(functools.partial(conv_bn_relu, compute_dtype=jnp.float32))

    out_bf16 = jax.block_until_ready(fn_bf16(x, conv_w, conv_b, bn_gamma, bn_beta))
    out_f32 = jax.block_until_ready(fn_f32(x, conv_w, conv_b, bn_gamma, bn_beta))

    ref = jax.block_until_ready(_reference(x, conv_w, conv_b, bn_gamma, bn_beta))
    # reference with inputs rounded to bf16 (isolates kernel logic from input rounding)
    ref_bf16 = jax.block_until_ready(_reference(
        x.astype(jnp.bfloat16).astype(jnp.float32),
        conv_w.astype(jnp.bfloat16).astype(jnp.float32),
        conv_b, bn_gamma, bn_beta))

    assert out_f32.shape == (N, Cout, H, W)
    assert out_bf16.shape == (N, Cout, H, W)
    assert jnp.allclose(out_f32, ref, atol=5e-4, rtol=5e-4), \
        "f32 kernel mismatch vs reference"
    # bf16 path additionally stores the conv output in bf16 between the passes
    assert jnp.allclose(out_bf16, ref_bf16, atol=3e-2, rtol=3e-2), \
        "bf16 kernel mismatch vs bf16-input reference"
    assert jnp.allclose(out_bf16, ref, atol=8e-2, rtol=8e-2), \
        "bf16 kernel far from f32 reference"

    print("KERNEL_OK")
</pallas_src>

<mosaic_0001>
module attributes {stable_mosaic.version = 11 : i64} {
  func.func @_conv_stats_kernel(%arg0: i32, %arg1: memref<1x384x16xbf16, #tpu.memory_space<vmem>>, %arg2: memref<9x16x128xbf16, #tpu.memory_space<vmem>>, %arg3: memref<336x1xf32, #tpu.memory_space<vmem>>, %arg4: memref<336x128xbf16, #tpu.memory_space<vmem>>, %arg5: memref<1x1x128xf32, #tpu.memory_space<vmem>>, %arg6: memref<1x1x128xf32, #tpu.memory_space<vmem>>) attributes {dimension_semantics = [#tpu.dimension_semantics<parallel>], iteration_bounds = array<i64: 2>, scalar_prefetch = 0 : i64, scratch_operands = 0 : i64, tpu.core_type = #tpu.core_type<tc>, window_params = [{transform_indices = @transform_0, window_bounds = array<i64: 1, 384, 16>}, {pipeline_mode = #tpu.pipeline_mode<synchronous>, transform_indices = @transform_1, window_bounds = array<i64: 9, 16, 128>}, {pipeline_mode = #tpu.pipeline_mode<synchronous>, transform_indices = @transform_2, window_bounds = array<i64: 336, 1>}, {transform_indices = @transform_3, window_bounds = array<i64: 336, 128>}, {transform_indices = @transform_4, window_bounds = array<i64: 1, 1, 128>}, {transform_indices = @transform_5, window_bounds = array<i64: 1, 1, 128>}]} {
    %c0 = arith.constant 0 : index
    %c0_0 = arith.constant 0 : index
    %c0_1 = arith.constant 0 : index
    %0 = vector.load %arg1[%c0, %c0_0, %c0_1] : memref<1x384x16xbf16, #tpu.memory_space<vmem>>, vector<1x336x16xbf16>
    %1 = vector.shape_cast %0 : vector<1x336x16xbf16> to vector<336x16xbf16>
    %c0_2 = arith.constant 0 : index
    %c0_3 = arith.constant 0 : index
    %c0_4 = arith.constant 0 : index
    %2 = vector.load %arg2[%c0_2, %c0_3, %c0_4] : memref<9x16x128xbf16, #tpu.memory_space<vmem>>, vector<1x16x128xbf16>
    %3 = vector.shape_cast %2 : vector<1x16x128xbf16> to vector<16x128xbf16>
    %cst = arith.constant dense<0.000000e+00> : vector<336x128xf32>
    %4 = tpu.matmul %1, %3, %cst {dimension_numbers = #tpu.dot_dimension_numbers<[1], [0], [0], [1], [0, 0, 1, 1], [], []>} : vector<336x16xbf16>, vector<16x128xbf16>, vector<336x128xf32> -> vector<336x128xf32>
    %c0_5 = arith.constant 0 : index
    %c1 = arith.constant 1 : index
    %c0_6 = arith.constant 0 : index
    %5 = vector.load %arg1[%c0_5, %c1, %c0_6] : memref<1x384x16xbf16, #tpu.memory_space<vmem>>, vector<1x336x16xbf16>
    %6 = vector.shape_cast %5 : vector<1x336x16xbf16> to vector<336x16xbf16>
    %c1_7 = arith.constant 1 : index
    %c0_8 = arith.constant 0 : index
    %c0_9 = arith.constant 0 : index
    %7 = vector.load %arg2[%c1_7, %c0_8, %c0_9] : memref<9x16x128xbf16, #tpu.memory_space<vmem>>, vector<1x16x128xbf16>
    %8 = vector.shape_cast %7 : vector<1x16x128xbf16> to vector<16x128xbf16>
    %cst_10 = arith.constant dense<0.000000e+00> : vector<336x128xf32>
    %9 = tpu.matmul %6, %8, %cst_10 {dimension_numbers = #tpu.dot_dimension_numbers<[1], [0], [0], [1], [0, 0, 1, 1], [], []>} : vector<336x16xbf16>, vector<16x128xbf16>, vector<336x128xf32> -> vector<336x128xf32>
    %10 = arith.addf %4, %9 : vector<336x128xf32>
    %c0_11 = arith.constant 0 : index
    %c2 = arith.constant 2 : index
    %c0_12 = arith.constant 0 : index
    %11 = vector.load %arg1[%c0_11, %c2, %c0_12] : memref<1x384x16xbf16, #tpu.memory_space<vmem>>, vector<1x336x16xbf16>
    %12 = vector.shape_cast %11 : vector<1x336x16xbf16> to vector<336x16xbf16>
    %c2_13 = arith.constant 2 : index
    %c0_14 = arith.constant 0 : index
    %c0_15 = arith.constant 0 : index
    %13 = vector.load %arg2[%c2_13, %c0_14, %c0_15] : memref<9x16x128xbf16, #tpu.memory_space<vmem>>, vector<1x16x128xbf16>
    %14 = vector.shape_cast %13 : vector<1x16x128xbf16> to vector<16x128xbf16>
    %cst_16 = arith.constant dense<0.000000e+00> : vector<336x128xf32>
    %15 = tpu.matmul %12, %14, %cst_16 {dimension_numbers = #tpu.dot_dimension_numbers<[1], [0], [0], [1], [0, 0, 1, 1], [], []>} : vector<336x16xbf16>, vector<16x128xbf16>, vector<336x128xf32> -> vector<336x128xf32>
    %16 = arith.addf %10, %15 : vector<336x128xf32>
    %c0_17 = arith.constant 0 : index
    %c18 = arith.constant 18 : index
    %c0_18 = arith.constant 0 : index
    %17 = vector.load %arg1[%c0_17, %c18, %c0_18] : memref<1x384x16xbf16, #tpu.memory_space<vmem>>, vector<1x336x16xbf16>
    %18 = vector.shape_cast %17 : vector<1x336x16xbf16> to vector<336x16xbf16>
    %c3 = arith.constant 3 : index
    %c0_19 = arith.constant 0 : index
    %c0_20 = arith.constant 0 : index
    %19 = vector.load %arg2[%c3, %c0_19, %c0_20] : memref<9x16x128xbf16, #tpu.memory_space<vmem>>, vector<1x16x128xbf16>
    %20 = vector.shape_cast %19 : vector<1x16x128xbf16> to vector<16x128xbf16>
    %cst_21 = arith.constant dense<0.000000e+00> : vector<336x128xf32>
    %21 = tpu.matmul %18, %20, %cst_21 {dimension_numbers = #tpu.dot_dimension_numbers<[1], [0], [0], [1], [0, 0, 1, 1], [], []>} : vector<336x16xbf16>, vector<16x128xbf16>, vector<336x128xf32> -> vector<336x128xf32>
    %22 = arith.addf %16, %21 : vector<336x128xf32>
    %c0_22 = arith.constant 0 : index
    %c19 = arith.constant 19 : index
    %c0_23 = arith.constant 0 : index
    %23 = vector.load %arg1[%c0_22, %c19, %c0_23] : memref<1x384x16xbf16, #tpu.memory_space<vmem>>, vector<1x336x16xbf16>
    %24 = vector.shape_cast %23 : vector<1x336x16xbf16> to vector<336x16xbf16>
    %c4 = arith.constant 4 : index
    %c0_24 = arith.constant 0 : index
    %c0_25 = arith.constant 0 : index
    %25 = vector.load %arg2[%c4, %c0_24, %c0_25] : memref<9x16x128xbf16, #tpu.memory_space<vmem>>, vector<1x16x128xbf16>
    %26 = vector.shape_cast %25 : vector<1x16x128xbf16> to vector<16x128xbf16>
    %cst_26 = arith.constant dense<0.000000e+00> : vector<336x128xf32>
    %27 = tpu.matmul %24, %26, %cst_26 {dimension_numbers = #tpu.dot_dimension_numbers<[1], [0], [0], [1], [0, 0, 1, 1], [], []>} : vector<336x16xbf16>, vector<16x128xbf16>, vector<336x128xf32> -> vector<336x128xf32>
    %28 = arith.addf %22, %27 : vector<336x128xf32>
    %c0_27 = arith.constant 0 : index
    %c20 = arith.constant 20 : index
    %c0_28 = arith.constant 0 : index
    %29 = vector.load %arg1[%c0_27, %c20, %c0_28] : memref<1x384x16xbf16, #tpu.memory_space<vmem>>, vector<1x336x16xbf16>
    %30 = vector.shape_cast %29 : vector<1x336x16xbf16> to vector<336x16xbf16>
    %c5 = arith.constant 5 : index
    %c0_29 = arith.constant 0 : index
    %c0_30 = arith.constant 0 : index
    %31 = vector.load %arg2[%c5, %c0_29, %c0_30] : memref<9x16x128xbf16, #tpu.memory_space<vmem>>, vector<1x16x128xbf16>
    %32 = vector.shape_cast %31 : vector<1x16x128xbf16> to vector<16x128xbf16>
    %cst_31 = arith.constant dense<0.000000e+00> : vector<336x128xf32>
    %33 = tpu.matmul %30, %32, %cst_31 {dimension_numbers = #tpu.dot_dimension_numbers<[1], [0], [0], [1], [0, 0, 1, 1], [], []>} : vector<336x16xbf16>, vector<16x128xbf16>, vector<336x128xf32> -> vector<336x128xf32>
    %34 = arith.addf %28, %33 : vector<336x128xf32>
    %c0_32 = arith.constant 0 : index
    %c36 = arith.constant 36 : index
    %c0_33 = arith.constant 0 : index
    %35 = vector.load %arg1[%c0_32, %c36, %c0_33] : memref<1x384x16xbf16, #tpu.memory_space<vmem>>, vector<1x336x16xbf16>
    %36 = vector.shape_cast %35 : vector<1x336x16xbf16> to vector<336x16xbf16>
    %c6 = arith.constant 6 : index
    %c0_34 = arith.constant 0 : index
    %c0_35 = arith.constant 0 : index
    %37 = vector.load %arg2[%c6, %c0_34, %c0_35] : memref<9x16x128xbf16, #tpu.memory_space<vmem>>, vector<1x16x128xbf16>
    %38 = vector.shape_cast %37 : vector<1x16x128xbf16> to vector<16x128xbf16>
    %cst_36 = arith.constant dense<0.000000e+00> : vector<336x128xf32>
    %39 = tpu.matmul %36, %38, %cst_36 {dimension_numbers = #tpu.dot_dimension_numbers<[1], [0], [0], [1], [0, 0, 1, 1], [], []>} : vector<336x16xbf16>, vector<16x128xbf16>, vector<336x128xf32> -> vector<336x128xf32>
    %40 = arith.addf %34, %39 : vector<336x128xf32>
    %c0_37 = arith.constant 0 : index
    %c37 = arith.constant 37 : index
    %c0_38 = arith.constant 0 : index
    %41 = vector.load %arg1[%c0_37, %c37, %c0_38] : memref<1x384x16xbf16, #tpu.memory_space<vmem>>, vector<1x336x16xbf16>
    %42 = vector.shape_cast %41 : vector<1x336x16xbf16> to vector<336x16xbf16>
    %c7 = arith.constant 7 : index
    %c0_39 = arith.constant 0 : index
    %c0_40 = arith.constant 0 : index
    %43 = vector.load %arg2[%c7, %c0_39, %c0_40] : memref<9x16x128xbf16, #tpu.memory_space<vmem>>, vector<1x16x128xbf16>
    %44 = vector.shape_cast %43 : vector<1x16x128xbf16> to vector<16x128xbf16>
    %cst_41 = arith.constant dense<0.000000e+00> : vector<336x128xf32>
    %45 = tpu.matmul %42, %44, %cst_41 {dimension_numbers = #tpu.dot_dimension_numbers<[1], [0], [0], [1], [0, 0, 1, 1], [], []>} : vector<336x16xbf16>, vector<16x128xbf16>, vector<336x128xf32> -> vector<336x128xf32>
    %46 = arith.addf %40, %45 : vector<336x128xf32>
    %c0_42 = arith.constant 0 : index
    %c38 = arith.constant 38 : index
    %c0_43 = arith.constant 0 : index
    %47 = vector.load %arg1[%c0_42, %c38, %c0_43] : memref<1x384x16xbf16, #tpu.memory_space<vmem>>, vector<1x336x16xbf16>
    %48 = vector.shape_cast %47 : vector<1x336x16xbf16> to vector<336x16xbf16>
    %c8 = arith.constant 8 : index
    %c0_44 = arith.constant 0 : index
    %c0_45 = arith.constant 0 : index
    %49 = vector.load %arg2[%c8, %c0_44, %c0_45] : memref<9x16x128xbf16, #tpu.memory_space<vmem>>, vector<1x16x128xbf16>
    %50 = vector.shape_cast %49 : vector<1x16x128xbf16> to vector<16x128xbf16>
    %cst_46 = arith.constant dense<0.000000e+00> : vector<336x128xf32>
    %51 = tpu.matmul %48, %50, %cst_46 {dimension_numbers = #tpu.dot_dimension_numbers<[1], [0], [0], [1], [0, 0, 1, 1], [], []>} : vector<336x16xbf16>, vector<16x128xbf16>, vector<336x128xf32> -> vector<336x128xf32>
    %52 = arith.addf %46, %51 : vector<336x128xf32>
    %c0_47 = arith.constant 0 : index
    %c0_48 = arith.constant 0 : index
    %53 = vector.load %arg3[%c0_47, %c0_48] : memref<336x1xf32, #tpu.memory_space<vmem>>, vector<336x1xf32>
    %54 = vector.broadcast %53 : vector<336x1xf32> to vector<336x128xf32>
    %55 = arith.mulf %52, %54 : vector<336x128xf32>
    %cst_49 = arith.constant dense<0.000000e+00> : vector<128xf32>
    %56 = vector.multi_reduction <add>, %55, %cst_49 [0] : vector<336x128xf32> to vector<128xf32>
    %57 = vector.shape_cast %56 : vector<128xf32> to vector<1x128xf32>
    %58 = vector.shape_cast %57 : vector<1x128xf32> to vector<1x1x128xf32>
    %c0_50 = arith.constant 0 : index
    %c0_51 = arith.constant 0 : index
    %c0_52 = arith.constant 0 : index
    %59 = vector.load %arg5[%c0_50, %c0_51, %c0_52] : memref<1x1x128xf32, #tpu.memory_space<vmem>>, vector<1x1x128xf32>
    tpu.vector_store %arg5[%c0_50, %c0_51, %c0_52], %58 {strides = array<i32>} : memref<1x1x128xf32, #tpu.memory_space<vmem>>, vector<1x1x128xf32>,
    %60 = arith.mulf %55, %52 : vector<336x128xf32>
    %cst_53 = arith.constant dense<0.000000e+00> : vector<128xf32>
    %61 = vector.multi_reduction <add>, %60, %cst_53 [0] : vector<336x128xf32> to vector<128xf32>
    %62 = vector.shape_cast %61 : vector<128xf32> to vector<1x128xf32>
    %63 = vector.shape_cast %62 : vector<1x128xf32> to vector<1x1x128xf32>
    %c0_54 = arith.constant 0 : index
    %c0_55 = arith.constant 0 : index
    %c0_56 = arith.constant 0 : index
    %64 = vector.load %arg6[%c0_54, %c0_55, %c0_56] : memref<1x1x128xf32, #tpu.memory_space<vmem>>, vector<1x1x128xf32>
    tpu.vector_store %arg6[%c0_54, %c0_55, %c0_56], %63 {strides = array<i32>} : memref<1x1x128xf32, #tpu.memory_space<vmem>>, vector<1x1x128xf32>,
    %65 = arith.truncf %52 : vector<336x128xf32> to vector<336x128xbf16>
    %c0_57 = arith.constant 0 : index
    %c0_58 = arith.constant 0 : index
    %66 = vector.load %arg4[%c0_57, %c0_58] : memref<336x128xbf16, #tpu.memory_space<vmem>>, vector<336x128xbf16>
    tpu.vector_store %arg4[%c0_57, %c0_58], %65 {strides = array<i32>} : memref<336x128xbf16, #tpu.memory_space<vmem>>, vector<336x128xbf16>,
    return
  }
  func.func @transform_0(%arg0: i32) -> (i32, i32, i32) {
    %c0_i32 = arith.constant 0 : i32
    %c0_i32_0 = arith.constant 0 : i32
    %c0_i32_1 = arith.constant 0 : i32
    return %arg0, %c0_i32, %c0_i32_0 : i32, i32, i32
  }
  func.func @transform_1(%arg0: i32) -> (i32, i32, i32) {
    %c0_i32 = arith.constant 0 : i32
    %c0_i32_0 = arith.constant 0 : i32
    %c0_i32_1 = arith.constant 0 : i32
    %c0_i32_2 = arith.constant 0 : i32
    return %c0_i32, %c0_i32_0, %c0_i32_1 : i32, i32, i32
  }
  func.func @transform_2(%arg0: i32) -> (i32, i32) {
    %c0_i32 = arith.constant 0 : i32
    %c0_i32_0 = arith.constant 0 : i32
    %c0_i32_1 = arith.constant 0 : i32
    return %c0_i32, %c0_i32_0 : i32, i32
  }
  func.func @transform_3(%arg0: i32) -> (i32, i32) {
    %c0_i32 = arith.constant 0 : i32
    %c0_i32_0 = arith.constant 0 : i32
    return %arg0, %c0_i32 : i32, i32
  }
  func.func @transform_4(%arg0: i32) -> (i32, i32, i32) {
    %c0_i32 = arith.constant 0 : i32
    %c0_i32_0 = arith.constant 0 : i32
    %c0_i32_1 = arith.constant 0 : i32
    return %arg0, %c0_i32, %c0_i32_0 : i32, i32, i32
  }
  func.func @transform_5(%arg0: i32) -> (i32, i32, i32) {
    %c0_i32 = arith.constant 0 : i32
    %c0_i32_0 = arith.constant 0 : i32
    %c0_i32_1 = arith.constant 0 : i32
    return %arg0, %c0_i32, %c0_i32_0 : i32, i32, i32
  }
}

module attributes {stable_mosaic.version = 11 : i64} {
  func.func @_bn_relu_kernel(%arg0: i32, %arg1: memref<672x128xbf16, #tpu.memory_space<vmem>>, %arg2: memref<1x128xf32, #tpu.memory_space<vmem>>, %arg3: memref<1x128xf32, #tpu.memory_space<vmem>>, %arg4: memref<672x128xf32, #tpu.memory_space<vmem>>) attributes {dimension_semantics = [#tpu.dimension_semantics<parallel>], iteration_bounds = array<i64: 1>, scalar_prefetch = 0 : i64, scratch_operands = 0 : i64, tpu.core_type = #tpu.core_type<tc>, window_params = [{transform_indices = @transform_0, window_bounds = array<i64: 672, 128>}, {pipeline_mode = #tpu.pipeline_mode<synchronous>, transform_indices = @transform_1, window_bounds = array<i64: 1, 128>}, {pipeline_mode = #tpu.pipeline_mode<synchronous>, transform_indices = @transform_2, window_bounds = array<i64: 1, 128>}, {transform_indices = @transform_3, window_bounds = array<i64: 672, 128>}]} {
    %c0 = arith.constant 0 : index
    %c0_0 = arith.constant 0 : index
    %0 = vector.load %arg1[%c0, %c0_0] : memref<672x128xbf16, #tpu.memory_space<vmem>>, vector<672x128xbf16>
    %1 = arith.extf %0 : vector<672x128xbf16> to vector<672x128xf32>
    %c0_1 = arith.constant 0 : index
    %c0_2 = arith.constant 0 : index
    %2 = vector.load %arg2[%c0_1, %c0_2] : memref<1x128xf32, #tpu.memory_space<vmem>>, vector<1x128xf32>
    %3 = vector.broadcast %2 : vector<1x128xf32> to vector<672x128xf32>
    %4 = arith.mulf %1, %3 : vector<672x128xf32>
    %c0_3 = arith.constant 0 : index
    %c0_4 = arith.constant 0 : index
    %5 = vector.load %arg3[%c0_3, %c0_4] : memref<1x128xf32, #tpu.memory_space<vmem>>, vector<1x128xf32>
    %6 = vector.broadcast %5 : vector<1x128xf32> to vector<672x128xf32>
    %7 = arith.addf %4, %6 : vector<672x128xf32>
    %cst = arith.constant 0.000000e+00 : f32
    %8 = vector.broadcast %cst : f32 to vector<672x128xf32>
    %9 = arith.maximumf %7, %8 : vector<672x128xf32>
    %c0_5 = arith.constant 0 : index
    %c0_6 = arith.constant 0 : index
    %10 = vector.load %arg4[%c0_5, %c0_6] : memref<672x128xf32, #tpu.memory_space<vmem>>, vector<672x128xf32>
    tpu.vector_store %arg4[%c0_5, %c0_6], %9 {strides = array<i32>} : memref<672x128xf32, #tpu.memory_space<vmem>>, vector<672x128xf32>,
    return
  }
  func.func @transform_0(%arg0: i32) -> (i32, i32) {
    %c0_i32 = arith.constant 0 : i32
    %c0_i32_0 = arith.constant 0 : i32
    return %arg0, %c0_i32 : i32, i32
  }
  func.func @transform_1(%arg0: i32) -> (i32, i32) {
    %c0_i32 = arith.constant 0 : i32
    %c0_i32_0 = arith.constant 0 : i32
    %c0_i32_1 = arith.constant 0 : i32
    return %c0_i32, %c0_i32_0 : i32, i32
  }
  func.func @transform_2(%arg0: i32) -> (i32, i32) {
    %c0_i32 = arith.constant 0 : i32
    %c0_i32_0 = arith.constant 0 : i32
    %c0_i32_1 = arith.constant 0 : i32
    return %c0_i32, %c0_i32_0 : i32, i32
  }
  func.func @transform_3(%arg0: i32) -> (i32, i32) {
    %c0_i32 = arith.constant 0 : i32
    %c0_i32_0 = arith.constant 0 : i32
    return %arg0, %c0_i32 : i32, i32
  }
}

</mosaic_0001>

<bundles_post_ra>
// kernel: conv_bn_relu.3
= control target key start
LH: loop header
LB: loop body
LE: loop exit
PB: predicated region body
PF: predicated region fallthrough
CT: control target
= control target key end

     0   :  { %s1323_s0 = inlined_call_operand.vmem [shape: bf16[672,128], index: 0, kind: input, shape index: {}]   ;;  %s1324_s1 = inlined_call_operand.vmem [shape: f32[1,128], index: 1, kind: input, shape index: {}]   ;;  %s1325_s2 = inlined_call_operand.vmem [shape: f32[1,128], index: 2, kind: input, shape index: {}]   ;;  %s1326_s3 = inlined_call_operand.vmem [shape: f32[672,128], index: 3, kind: output, shape index: {}]  }
   0x1   :  { %v539_v0 = vld [vmem:[%s1323_s0] sm:$0xff]   ;;  %v706_v4 = vld [vmem:[%s1323_s0 + $0x8] sm:$0xff]   ;;  %v707_v5 = vld [vmem:[%s1323_s0 + $0x10] sm:$0xff]  }
   0x2   :  { %v773_v1 = vld [vmem:[%s1324_s1] ss:$0 sm:$0xff]  ;;  %v540_v2 = vunpack.c.l.bf16 %v539_v0  ;;  %v541_v3 = vunpack.c.h.bf16 %v539_v0  ;;  %v708_v6 = vld [vmem:[%s1323_s0 + $0x18] sm:$0xff]   ;;  %v544_v8 = vunpack.c.l.bf16 %v706_v4  ;;  %v545_v9 = vunpack.c.h.bf16 %v706_v4  ;;  %v710_v33 = vld [vmem:[%s1323_s0 + $0x28] sm:$0xff]  }
   0x3   :  { %v787_v7 = vld [vmem:[%s1325_s2] ss:$0 sm:$0xff]  ;;  %v548_v10 = vunpack.c.l.bf16 %v707_v5  ;;  %v549_v11 = vunpack.c.h.bf16 %v707_v5  ;;  %v552_v14 = vunpack.c.l.bf16 %v708_v6  ;;  %v553_v15 = vunpack.c.h.bf16 %v708_v6  ;;  %v711_v34 = vld [vmem:[%s1323_s0 + $0x30] sm:$0xff]   ;;  %v712_v39 = vld [vmem:[%s1323_s0 + $0x38] sm:$0xff]  }
   0x4   :  { %v189_v12 = vmul.f32 %v540_v2, %v773_v1  ;;  %v190_v13 = vmul.f32 %v541_v3, %v773_v1  ;;  %v191_v16 = vmul.f32 %v544_v8, %v773_v1  ;;  %v192_v17 = vmul.f32 %v545_v9, %v773_v1  ;;  %v709_v28 = vld [vmem:[%s1323_s0 + $0x20] sm:$0xff]   ;;  %v714_v6 = vld [vmem:[%s1323_s0 + $0x48] sm:$0xff]   ;;  %v715_v8 = vld [vmem:[%s1323_s0 + $0x50] sm:$0xff]  }
   0x5   :  { %v193_v18 = vmul.f32 %v548_v10, %v773_v1  ;;  %v194_v19 = vmul.f32 %v549_v11, %v773_v1  ;;  %v195_v22 = vmul.f32 %v552_v14, %v773_v1  ;;  %v196_v23 = vmul.f32 %v553_v15, %v773_v1  ;;  %v713_v0 = vld [vmem:[%s1323_s0 + $0x40] sm:$0xff]  }
   0x6   :  { %v280_v20 = vadd.f32 %v787_v7, %v189_v12  ;;  %v281_v21 = vadd.f32 %v787_v7, %v190_v13  ;;  %v282_v24 = vadd.f32 %v787_v7, %v191_v16  ;;  %v283_v25 = vadd.f32 %v787_v7, %v192_v17  ;;  %v716_v13 = vld [vmem:[%s1323_s0 + $0x58] sm:$0xff]  }
   0x7   :  { %v284_v26 = vadd.f32 %v787_v7, %v193_v18  ;;  %v285_v27 = vadd.f32 %v787_v7, %v194_v19  ;;  %v286_v31 = vadd.f32 %v787_v7, %v195_v22  ;;  %v287_v32 = vadd.f32 %v787_v7, %v196_v23 }
   0x8   :  { %v364_v29 = vmax.f32 %v280_v20, 0.0  ;;  %v365_v30 = vmax.f32 %v281_v21, 0.0  ;;  %v366_v35 = vmax.f32 %v282_v24, 0.0  ;;  %v367_v36 = vmax.f32 %v283_v25, 0.0 }
   0x9   :  { %v368_v37 = vmax.f32 %v284_v26, 0.0  ;;  %v369_v38 = vmax.f32 %v285_v27, 0.0  ;;  %v370_v40 = vmax.f32 %v286_v31, 0.0  ;;  %v371_v41 = vmax.f32 %v287_v32, 0.0 }
   0xa   :  { %448 = vst [vmem:[%s1326_s3] sm:$0xff] %v364_v29  ;;  %449 = vst [vmem:[%s1326_s3 + $0x8] sm:$0xff] %v365_v30  ;;  %v556_v42 = vunpack.c.l.bf16 %v709_v28  ;;  %v557_v43 = vunpack.c.h.bf16 %v709_v28  ;;  %v560_v44 = vunpack.c.l.bf16 %v710_v33  ;;  %v561_v45 = vunpack.c.h.bf16 %v710_v33 }
   0xb   :  { %450 = vst [vmem:[%s1326_s3 + $0x10] sm:$0xff] %v366_v35  ;;  %451 = vst [vmem:[%s1326_s3 + $0x18] sm:$0xff] %v367_v36  ;;  %v564_v46 = vunpack.c.l.bf16 %v711_v34  ;;  %v565_v47 = vunpack.c.h.bf16 %v711_v34  ;;  %v568_v50 = vunpack.c.l.bf16 %v712_v39  ;;  %v569_v51 = vunpack.c.h.bf16 %v712_v39 }
   0xc   :  { %452 = vst [vmem:[%s1326_s3 + $0x20] sm:$0xff] %v368_v37  ;;  %453 = vst [vmem:[%s1326_s3 + $0x28] sm:$0xff] %v369_v38  ;;  %v197_v48 = vmul.f32 %v556_v42, %v773_v1  ;;  %v198_v49 = vmul.f32 %v557_v43, %v773_v1  ;;  %v199_v52 = vmul.f32 %v560_v44, %v773_v1  ;;  %v572_v16 = vunpack.c.l.bf16 %v713_v0  ;;  %v717_v38 = vld [vmem:[%s1323_s0 + $0x60] sm:$0xff]   ;;  %v718_v43 = vld [vmem:[%s1323_s0 + $0x68] sm:$0xff]  }
   0xd   :  { %454 = vst [vmem:[%s1326_s3 + $0x30] sm:$0xff] %v370_v40  ;;  %455 = vst [vmem:[%s1326_s3 + $0x38] sm:$0xff] %v371_v41  ;;  %v200_v53 = vmul.f32 %v561_v45, %v773_v1  ;;  %v201_v54 = vmul.f32 %v564_v46, %v773_v1  ;;  %v202_v55 = vmul.f32 %v565_v47, %v773_v1  ;;  %v573_v17 = vunpack.c.h.bf16 %v713_v0  ;;  %v719_v44 = vld [vmem:[%s1323_s0 + $0x70] sm:$0xff]  }
   0xe   :  { %v288_v56 = vadd.f32 %v787_v7, %v197_v48  ;;  %v289_v57 = vadd.f32 %v787_v7, %v198_v49  ;;  %v203_v58 = vmul.f32 %v568_v50, %v773_v1  ;;  %v204_v59 = vmul.f32 %v569_v51, %v773_v1  ;;  %v720_v49 = vld [vmem:[%s1323_s0 + $0x78] sm:$0xff]  }
   0xf   :  { %v290_v60 = vadd.f32 %v787_v7, %v199_v52  ;;  %v291_v61 = vadd.f32 %v787_v7, %v200_v53  ;;  %v292_v62 = vadd.f32 %v787_v7, %v201_v54  ;;  %v293_v63 = vadd.f32 %v787_v7, %v202_v55 }
  0x10   :  { %v372_v2 = vmax.f32 %v288_v56, 0.0  ;;  %v373_v3 = vmax.f32 %v289_v57, 0.0  ;;  %v294_v4 = vadd.f32 %v787_v7, %v203_v58  ;;  %v295_v5 = vadd.f32 %v787_v7, %v204_v59 }
  0x11   :  { %v374_v9 = vmax.f32 %v290_v60, 0.0  ;;  %v375_v10 = vmax.f32 %v291_v61, 0.0  ;;  %v376_v11 = vmax.f32 %v292_v62, 0.0  ;;  %v377_v12 = vmax.f32 %v293_v63, 0.0 }
  0x12   :  { %456 = vst [vmem:[%s1326_s3 + $0x40] sm:$0xff] %v372_v2  ;;  %457 = vst [vmem:[%s1326_s3 + $0x48] sm:$0xff] %v373_v3  ;;  %v378_v14 = vmax.f32 %v294_v4, 0.0  ;;  %v379_v15 = vmax.f32 %v295_v5, 0.0  ;;  %v576_v18 = vunpack.c.l.bf16 %v714_v6  ;;  %v577_v19 = vunpack.c.h.bf16 %v714_v6 }
  0x13   :  { %458 = vst [vmem:[%s1326_s3 + $0x50] sm:$0xff] %v374_v9  ;;  %459 = vst [vmem:[%s1326_s3 + $0x58] sm:$0xff] %v375_v10  ;;  %v580_v20 = vunpack.c.l.bf16 %v715_v8  ;;  %v581_v21 = vunpack.c.h.bf16 %v715_v8  ;;  %v205_v22 = vmul.f32 %v572_v16, %v773_v1  ;;  %v206_v23 = vmul.f32 %v573_v17, %v773_v1  ;;  %v722_v17 = vld [vmem:[%s1323_s0 + $0x88] sm:$0xff]  }
  0x14   :  { %460 = vst [vmem:[%s1326_s3 + $0x60] sm:$0xff] %v376_v11  ;;  %461 = vst [vmem:[%s1326_s3 + $0x68] sm:$0xff] %v377_v12  ;;  %v584_v24 = vunpack.c.l.bf16 %v716_v13  ;;  %v585_v25 = vunpack.c.h.bf16 %v716_v13  ;;  %v207_v26 = vmul.f32 %v576_v18, %v773_v1  ;;  %v208_v27 = vmul.f32 %v577_v19, %v773_v1  ;;  %v721_v12 = vld [vmem:[%s1323_s0 + $0x80] sm:$0xff]   ;;  %v723_v18 = vld [vmem:[%s1323_s0 + $0x90] sm:$0xff]  }
  0x15   :  { %462 = vst [vmem:[%s1326_s3 + $0x70] sm:$0xff] %v378_v14  ;;  %463 = vst [vmem:[%s1326_s3 + $0x78] sm:$0xff] %v379_v15  ;;  %v209_v28 = vmul.f32 %v580_v20, %v773_v1  ;;  %v210_v29 = vmul.f32 %v581_v21, %v773_v1  ;;  %v296_v30 = vadd.f32 %v787_v7, %v205_v22  ;;  %v588_v52 = vunpack.c.l.bf16 %v717_v38 }
  0x16   :  { %v297_v31 = vadd.f32 %v787_v7, %v206_v23  ;;  %v211_v32 = vmul.f32 %v584_v24, %v773_v1  ;;  %v212_v33 = vmul.f32 %v585_v25, %v773_v1  ;;  %v298_v34 = vadd.f32 %v787_v7, %v207_v26  ;;  %v724_v23 = vld [vmem:[%s1323_s0 + $0x98] sm:$0xff]  }
  0x17   :  { %v299_v35 = vadd.f32 %v787_v7, %v208_v27  ;;  %v300_v36 = vadd.f32 %v787_v7, %v209_v28  ;;  %v301_v37 = vadd.f32 %v787_v7, %v210_v29  ;;  %v380_v39 = vmax.f32 %v296_v30, 0.0 }
  0x18   :  { %v381_v40 = vmax.f32 %v297_v31, 0.0  ;;  %v302_v41 = vadd.f32 %v787_v7, %v211_v32  ;;  %v303_v42 = vadd.f32 %v787_v7, %v212_v33  ;;  %v382_v45 = vmax.f32 %v298_v34, 0.0 }
  0x19   :  { %v383_v46 = vmax.f32 %v299_v35, 0.0  ;;  %v384_v47 = vmax.f32 %v300_v36, 0.0  ;;  %v385_v48 = vmax.f32 %v301_v37, 0.0  ;;  %464 = vst [vmem:[%s1326_s3 + $0x80] sm:$0xff] %v380_v39  ;;  %v589_v53 = vunpack.c.h.bf16 %v717_v38 }
  0x1a   :  { %465 = vst [vmem:[%s1326_s3 + $0x88] sm:$0xff] %v381_v40  ;;  %v386_v50 = vmax.f32 %v302_v41, 0.0  ;;  %v387_v51 = vmax.f32 %v303_v42, 0.0  ;;  %466 = vst [vmem:[%s1326_s3 + $0x90] sm:$0xff] %v382_v45  ;;  %v592_v54 = vunpack.c.l.bf16 %v718_v43  ;;  %v593_v55 = vunpack.c.h.bf16 %v718_v43 }
  0x1b   :  { %467 = vst [vmem:[%s1326_s3 + $0x98] sm:$0xff] %v383_v46  ;;  %468 = vst [vmem:[%s1326_s3 + $0xa0] sm:$0xff] %v384_v47  ;;  %v596_v56 = vunpack.c.l.bf16 %v719_v44  ;;  %v597_v57 = vunpack.c.h.bf16 %v719_v44  ;;  %v213_v58 = vmul.f32 %v588_v52, %v773_v1  ;;  %v214_v59 = vmul.f32 %v589_v53, %v773_v1  ;;  %v726_v53 = vld [vmem:[%s1323_s0 + $0xa8] sm:$0xff]  }
  0x1c   :  { %469 = vst [vmem:[%s1326_s3 + $0xa8] sm:$0xff] %v385_v48  ;;  %470 = vst [vmem:[%s1326_s3 + $0xb0] sm:$0xff] %v386_v50  ;;  %v600_v60 = vunpack.c.l.bf16 %v720_v49  ;;  %v601_v61 = vunpack.c.h.bf16 %v720_v49  ;;  %v215_v62 = vmul.f32 %v592_v54, %v773_v1  ;;  %v216_v63 = vmul.f32 %v593_v55, %v773_v1  ;;  %v725_v48 = vld [vmem:[%s1323_s0 + $0xa0] sm:$0xff]   ;;  %v727_v54 = vld [vmem:[%s1323_s0 + $0xb0] sm:$0xff]  }
  0x1d   :  { %471 = vst [vmem:[%s1326_s3 + $0xb8] sm:$0xff] %v387_v51  ;;  %v217_v0 = vmul.f32 %v596_v56, %v773_v1  ;;  %v218_v2 = vmul.f32 %v597_v57, %v773_v1  ;;  %v304_v3 = vadd.f32 %v787_v7, %v213_v58  ;;  %v305_v4 = vadd.f32 %v787_v7, %v214_v59  ;;  %v728_v59 = vld [vmem:[%s1323_s0 + $0xb8] sm:$0xff]  }
  0x1e   :  { %v219_v5 = vmul.f32 %v600_v60, %v773_v1  ;;  %v220_v6 = vmul.f32 %v601_v61, %v773_v1  ;;  %v306_v8 = vadd.f32 %v787_v7, %v215_v62  ;;  %v307_v9 = vadd.f32 %v787_v7, %v216_v63 }
  0x1f   :  { %v308_v10 = vadd.f32 %v787_v7, %v217_v0  ;;  %v309_v11 = vadd.f32 %v787_v7, %v218_v2  ;;  %v388_v13 = vmax.f32 %v304_v3, 0.0  ;;  %v389_v14 = vmax.f32 %v305_v4, 0.0 }
  0x20   :  { %v310_v15 = vadd.f32 %v787_v7, %v219_v5  ;;  %v311_v16 = vadd.f32 %v787_v7, %v220_v6  ;;  %v390_v19 = vmax.f32 %v306_v8, 0.0  ;;  %v391_v20 = vmax.f32 %v307_v9, 0.0 }
  0x21   :  { %v392_v21 = vmax.f32 %v308_v10, 0.0  ;;  %v393_v22 = vmax.f32 %v309_v11, 0.0  ;;  %472 = vst [vmem:[%s1326_s3 + $0xc0] sm:$0xff] %v388_v13  ;;  %473 = vst [vmem:[%s1326_s3 + $0xc8] sm:$0xff] %v389_v14  ;;  %v604_v26 = vunpack.c.l.bf16 %v721_v12  ;;  %v605_v27 = vunpack.c.h.bf16 %v721_v12 }
  0x22   :  { %v394_v24 = vmax.f32 %v310_v15, 0.0  ;;  %v395_v25 = vmax.f32 %v311_v16, 0.0  ;;  %474 = vst [vmem:[%s1326_s3 + $0xd0] sm:$0xff] %v390_v19  ;;  %475 = vst [vmem:[%s1326_s3 + $0xd8] sm:$0xff] %v391_v20  ;;  %v608_v28 = vunpack.c.l.bf16 %v722_v17  ;;  %v609_v29 = vunpack.c.h.bf16 %v722_v17 }
  0x23   :  { %476 = vst [vmem:[%s1326_s3 + $0xe0] sm:$0xff] %v392_v21  ;;  %477 = vst [vmem:[%s1326_s3 + $0xe8] sm:$0xff] %v393_v22  ;;  %v612_v30 = vunpack.c.l.bf16 %v723_v18  ;;  %v613_v31 = vunpack.c.h.bf16 %v723_v18  ;;  %v221_v32 = vmul.f32 %v604_v26, %v773_v1  ;;  %v222_v33 = vmul.f32 %v605_v27, %v773_v1  ;;  %v729_v22 = vld [vmem:[%s1323_s0 + $0xc0] sm:$0xff]   ;;  %v730_v27 = vld [vmem:[%s1323_s0 + $0xc8] sm:$0xff]  }
  0x24   :  { %478 = vst [vmem:[%s1326_s3 + $0xf0] sm:$0xff] %v394_v24  ;;  %479 = vst [vmem:[%s1326_s3 + $0xf8] sm:$0xff] %v395_v25  ;;  %v616_v34 = vunpack.c.l.bf16 %v724_v23  ;;  %v617_v35 = vunpack.c.h.bf16 %v724_v23  ;;  %v223_v36 = vmul.f32 %v608_v28, %v773_v1  ;;  %v224_v37 = vmul.f32 %v609_v29, %v773_v1  ;;  %v731_v28 = vld [vmem:[%s1323_s0 + $0xd0] sm:$0xff]  }
  0x25   :  { %v225_v38 = vmul.f32 %v612_v30, %v773_v1  ;;  %v226_v39 = vmul.f32 %v613_v31, %v773_v1  ;;  %v312_v40 = vadd.f32 %v787_v7, %v221_v32  ;;  %v313_v41 = vadd.f32 %v787_v7, %v222_v33  ;;  %v732_v33 = vld [vmem:[%s1323_s0 + $0xd8] sm:$0xff]  }
  0x26   :  { %v227_v42 = vmul.f32 %v616_v34, %v773_v1  ;;  %v228_v43 = vmul.f32 %v617_v35, %v773_v1  ;;  %v314_v44 = vadd.f32 %v787_v7, %v223_v36  ;;  %v315_v45 = vadd.f32 %v787_v7, %v224_v37 }
  0x27   :  { %v316_v46 = vadd.f32 %v787_v7, %v225_v38  ;;  %v317_v47 = vadd.f32 %v787_v7, %v226_v39  ;;  %v396_v49 = vmax.f32 %v312_v40, 0.0  ;;  %v397_v50 = vmax.f32 %v313_v41, 0.0 }
  0x28   :  { %v318_v51 = vadd.f32 %v787_v7, %v227_v42  ;;  %v319_v52 = vadd.f32 %v787_v7, %v228_v43  ;;  %v398_v55 = vmax.f32 %v314_v44, 0.0  ;;  %v399_v56 = vmax.f32 %v315_v45, 0.0 }
  0x29   :  { %v400_v57 = vmax.f32 %v316_v46, 0.0  ;;  %v401_v58 = vmax.f32 %v317_v47, 0.0  ;;  %480 = vst [vmem:[%s1326_s3 + $0x100] sm:$0xff] %v396_v49  ;;  %481 = vst [vmem:[%s1326_s3 + $0x108] sm:$0xff] %v397_v50  ;;  %v620_v62 = vunpack.c.l.bf16 %v725_v48  ;;  %v621_v63 = vunpack.c.h.bf16 %v725_v48 }
  0x2a   :  { %v402_v60 = vmax.f32 %v318_v51, 0.0  ;;  %v403_v61 = vmax.f32 %v319_v52, 0.0  ;;  %482 = vst [vmem:[%s1326_s3 + $0x110] sm:$0xff] %v398_v55  ;;  %483 = vst [vmem:[%s1326_s3 + $0x118] sm:$0xff] %v399_v56  ;;  %v624_v0 = vunpack.c.l.bf16 %v726_v53  ;;  %v625_v2 = vunpack.c.h.bf16 %v726_v53 }
  0x2b   :  { %484 = vst [vmem:[%s1326_s3 + $0x120] sm:$0xff] %v400_v57  ;;  %485 = vst [vmem:[%s1326_s3 + $0x128] sm:$0xff] %v401_v58  ;;  %v628_v3 = vunpack.c.l.bf16 %v727_v54  ;;  %v629_v4 = vunpack.c.h.bf16 %v727_v54  ;;  %v229_v5 = vmul.f32 %v620_v62, %v773_v1  ;;  %v230_v6 = vmul.f32 %v621_v63, %v773_v1  ;;  %v733_v58 = vld [vmem:[%s1323_s0 + $0xe0] sm:$0xff]   ;;  %v734_v63 = vld [vmem:[%s1323_s0 + $0xe8] sm:$0xff]  }
  0x2c   :  { %486 = vst [vmem:[%s1326_s3 + $0x130] sm:$0xff] %v402_v60  ;;  %487 = vst [vmem:[%s1326_s3 + $0x138] sm:$0xff] %v403_v61  ;;  %v632_v8 = vunpack.c.l.bf16 %v728_v59  ;;  %v633_v9 = vunpack.c.h.bf16 %v728_v59  ;;  %v231_v10 = vmul.f32 %v624_v0, %v773_v1  ;;  %v232_v11 = vmul.f32 %v625_v2, %v773_v1  ;;  %v735_v0 = vld [vmem:[%s1323_s0 + $0xf0] sm:$0xff]  }
  0x2d   :  { %v233_v12 = vmul.f32 %v628_v3, %v773_v1  ;;  %v234_v13 = vmul.f32 %v629_v4, %v773_v1  ;;  %v320_v14 = vadd.f32 %v787_v7, %v229_v5  ;;  %v321_v15 = vadd.f32 %v787_v7, %v230_v6  ;;  %v736_v6 = vld [vmem:[%s1323_s0 + $0xf8] sm:$0xff]  }
  0x2e   :  { %v235_v16 = vmul.f32 %v632_v8, %v773_v1  ;;  %v236_v17 = vmul.f32 %v633_v9, %v773_v1  ;;  %v322_v18 = vadd.f32 %v787_v7, %v231_v10  ;;  %v323_v19 = vadd.f32 %v787_v7, %v232_v11 }
  0x2f   :  { %v324_v20 = vadd.f32 %v787_v7, %v233_v12  ;;  %v325_v21 = vadd.f32 %v787_v7, %v234_v13  ;;  %v404_v23 = vmax.f32 %v320_v14, 0.0  ;;  %v405_v24 = vmax.f32 %v321_v15, 0.0 }
  0x30   :  { %v326_v25 = vadd.f32 %v787_v7, %v235_v16  ;;  %v327_v26 = vadd.f32 %v787_v7, %v236_v17  ;;  %v406_v29 = vmax.f32 %v322_v18, 0.0  ;;  %v407_v30 = vmax.f32 %v323_v19, 0.0 }
  0x31   :  { %v408_v31 = vmax.f32 %v324_v20, 0.0  ;;  %v409_v32 = vmax.f32 %v325_v21, 0.0  ;;  %488 = vst [vmem:[%s1326_s3 + $0x140] sm:$0xff] %v404_v23  ;;  %489 = vst [vmem:[%s1326_s3 + $0x148] sm:$0xff] %v405_v24  ;;  %v636_v36 = vunpack.c.l.bf16 %v729_v22  ;;  %v637_v37 = vunpack.c.h.bf16 %v729_v22 }
  0x32   :  { %v410_v34 = vmax.f32 %v326_v25, 0.0  ;;  %v411_v35 = vmax.f32 %v327_v26, 0.0  ;;  %490 = vst [vmem:[%s1326_s3 + $0x150] sm:$0xff] %v406_v29  ;;  %491 = vst [vmem:[%s1326_s3 + $0x158] sm:$0xff] %v407_v30  ;;  %v640_v38 = vunpack.c.l.bf16 %v730_v27  ;;  %v641_v39 = vunpack.c.h.bf16 %v730_v27 }
  0x33   :  { %492 = vst [vmem:[%s1326_s3 + $0x160] sm:$0xff] %v408_v31  ;;  %493 = vst [vmem:[%s1326_s3 + $0x168] sm:$0xff] %v409_v32  ;;  %v644_v40 = vunpack.c.l.bf16 %v731_v28  ;;  %v645_v41 = vunpack.c.h.bf16 %v731_v28  ;;  %v237_v42 = vmul.f32 %v636_v36, %v773_v1  ;;  %v238_v43 = vmul.f32 %v637_v37, %v773_v1  ;;  %v737_v32 = vld [vmem:[%s1323_s0 + $0x100] sm:$0xff]   ;;  %v738_v37 = vld [vmem:[%s1323_s0 + $0x108] sm:$0xff]  }
  0x34   :  { %494 = vst [vmem:[%s1326_s3 + $0x170] sm:$0xff] %v410_v34  ;;  %495 = vst [vmem:[%s1326_s3 + $0x178] sm:$0xff] %v411_v35  ;;  %v648_v44 = vunpack.c.l.bf16 %v732_v33  ;;  %v649_v45 = vunpack.c.h.bf16 %v732_v33  ;;  %v239_v46 = vmul.f32 %v640_v38, %v773_v1  ;;  %v240_v47 = vmul.f32 %v641_v39, %v773_v1  ;;  %v739_v38 = vld [vmem:[%s1323_s0 + $0x110] sm:$0xff]  }
  0x35   :  { %v241_v48 = vmul.f32 %v644_v40, %v773_v1  ;;  %v242_v49 = vmul.f32 %v645_v41, %v773_v1  ;;  %v328_v50 = vadd.f32 %v787_v7, %v237_v42  ;;  %v329_v51 = vadd.f32 %v787_v7, %v238_v43  ;;  %v740_v43 = vld [vmem:[%s1323_s0 + $0x118] sm:$0xff]  }
  0x36   :  { %v243_v52 = vmul.f32 %v648_v44, %v773_v1  ;;  %v244_v53 = vmul.f32 %v649_v45, %v773_v1  ;;  %v330_v54 = vadd.f32 %v787_v7, %v239_v46  ;;  %v331_v55 = vadd.f32 %v787_v7, %v240_v47 }
  0x37   :  { %v332_v56 = vadd.f32 %v787_v7, %v241_v48  ;;  %v333_v57 = vadd.f32 %v787_v7, %v242_v49  ;;  %v412_v59 = vmax.f32 %v328_v50, 0.0  ;;  %v413_v60 = vmax.f32 %v329_v51, 0.0 }
  0x38   :  { %v334_v61 = vadd.f32 %v787_v7, %v243_v52  ;;  %v335_v62 = vadd.f32 %v787_v7, %v244_v53  ;;  %v414_v2 = vmax.f32 %v330_v54, 0.0  ;;  %v415_v3 = vmax.f32 %v331_v55, 0.0 }
  0x39   :  { %v416_v4 = vmax.f32 %v332_v56, 0.0  ;;  %v417_v5 = vmax.f32 %v333_v57, 0.0  ;;  %496 = vst [vmem:[%s1326_s3 + $0x180] sm:$0xff] %v412_v59  ;;  %497 = vst [vmem:[%s1326_s3 + $0x188] sm:$0xff] %v413_v60  ;;  %v652_v10 = vunpack.c.l.bf16 %v733_v58  ;;  %v653_v11 = vunpack.c.h.bf16 %v733_v58 }
  0x3a   :  { %v418_v8 = vmax.f32 %v334_v61, 0.0  ;;  %v419_v9 = vmax.f32 %v335_v62, 0.0  ;;  %498 = vst [vmem:[%s1326_s3 + $0x190] sm:$0xff] %v414_v2  ;;  %499 = vst [vmem:[%s1326_s3 + $0x198] sm:$0xff] %v415_v3  ;;  %v656_v12 = vunpack.c.l.bf16 %v734_v63  ;;  %v657_v13 = vunpack.c.h.bf16 %v734_v63 }
  0x3b   :  { %500 = vst [vmem:[%s1326_s3 + $0x1a0] sm:$0xff] %v416_v4  ;;  %501 = vst [vmem:[%s1326_s3 + $0x1a8] sm:$0xff] %v417_v5  ;;  %v660_v14 = vunpack.c.l.bf16 %v735_v0  ;;  %v661_v15 = vunpack.c.h.bf16 %v735_v0  ;;  %v245_v16 = vmul.f32 %v652_v10, %v773_v1  ;;  %v246_v17 = vmul.f32 %v653_v11, %v773_v1  ;;  %v741_v5 = vld [vmem:[%s1323_s0 + $0x120] sm:$0xff]   ;;  %v742_v11 = vld [vmem:[%s1323_s0 + $0x128] sm:$0xff]  }
  0x3c   :  { %502 = vst [vmem:[%s1326_s3 + $0x1b0] sm:$0xff] %v418_v8  ;;  %503 = vst [vmem:[%s1326_s3 + $0x1b8] sm:$0xff] %v419_v9  ;;  %v664_v18 = vunpack.c.l.bf16 %v736_v6  ;;  %v665_v19 = vunpack.c.h.bf16 %v736_v6  ;;  %v247_v20 = vmul.f32 %v656_v12, %v773_v1  ;;  %v248_v21 = vmul.f32 %v657_v13, %v773_v1  ;;  %v743_v12 = vld [vmem:[%s1323_s0 + $0x130] sm:$0xff]  }
  0x3d   :  { %v249_v22 = vmul.f32 %v660_v14, %v773_v1  ;;  %v250_v23 = vmul.f32 %v661_v15, %v773_v1  ;;  %v336_v24 = vadd.f32 %v787_v7, %v245_v16  ;;  %v337_v25 = vadd.f32 %v787_v7, %v246_v17  ;;  %v744_v17 = vld [vmem:[%s1323_s0 + $0x138] sm:$0xff]  }
  0x3e   :  { %v251_v26 = vmul.f32 %v664_v18, %v773_v1  ;;  %v252_v27 = vmul.f32 %v665_v19, %v773_v1  ;;  %v338_v28 = vadd.f32 %v787_v7, %v247_v20  ;;  %v339_v29 = vadd.f32 %v787_v7, %v248_v21 }
  0x3f   :  { %v340_v30 = vadd.f32 %v787_v7, %v249_v22  ;;  %v341_v31 = vadd.f32 %v787_v7, %v250_v23  ;;  %v420_v33 = vmax.f32 %v336_v24, 0.0  ;;  %v421_v34 = vmax.f32 %v337_v25, 0.0 }
  0x40   :  { %v342_v35 = vadd.f32 %v787_v7, %v251_v26  ;;  %v343_v36 = vadd.f32 %v787_v7, %v252_v27  ;;  %v422_v39 = vmax.f32 %v338_v28, 0.0  ;;  %v423_v40 = vmax.f32 %v339_v29, 0.0 }
  0x41   :  { %v424_v41 = vmax.f32 %v340_v30, 0.0  ;;  %v425_v42 = vmax.f32 %v341_v31, 0.0  ;;  %504 = vst [vmem:[%s1326_s3 + $0x1c0] sm:$0xff] %v420_v33  ;;  %505 = vst [vmem:[%s1326_s3 + $0x1c8] sm:$0xff] %v421_v34  ;;  %v668_v46 = vunpack.c.l.bf16 %v737_v32  ;;  %v669_v47 = vunpack.c.h.bf16 %v737_v32 }
  0x42   :  { %v426_v44 = vmax.f32 %v342_v35, 0.0  ;;  %v427_v45 = vmax.f32 %v343_v36, 0.0  ;;  %506 = vst [vmem:[%s1326_s3 + $0x1d0] sm:$0xff] %v422_v39  ;;  %507 = vst [vmem:[%s1326_s3 + $0x1d8] sm:$0xff] %v423_v40  ;;  %v672_v48 = vunpack.c.l.bf16 %v738_v37  ;;  %v673_v49 = vunpack.c.h.bf16 %v738_v37 }
  0x43   :  { %508 = vst [vmem:[%s1326_s3 + $0x1e0] sm:$0xff] %v424_v41  ;;  %509 = vst [vmem:[%s1326_s3 + $0x1e8] sm:$0xff] %v425_v42  ;;  %v676_v50 = vunpack.c.l.bf16 %v739_v38  ;;  %v677_v51 = vunpack.c.h.bf16 %v739_v38  ;;  %v253_v52 = vmul.f32 %v668_v46, %v773_v1  ;;  %v254_v53 = vmul.f32 %v669_v47, %v773_v1  ;;  %v745_v42 = vld [vmem:[%s1323_s0 + $0x140] sm:$0xff]   ;;  %v746_v47 = vld [vmem:[%s1323_s0 + $0x148] sm:$0xff]  }
  0x44   :  { %510 = vst [vmem:[%s1326_s3 + $0x1f0] sm:$0xff] %v426_v44  ;;  %511 = vst [vmem:[%s1326_s3 + $0x1f8] sm:$0xff] %v427_v45  ;;  %v680_v54 = vunpack.c.l.bf16 %v740_v43  ;;  %v681_v55 = vunpack.c.h.bf16 %v740_v43  ;;  %v255_v56 = vmul.f32 %v672_v48, %v773_v1  ;;  %v256_v57 = vmul.f32 %v673_v49, %v773_v1 }
  0x45   :  { %v257_v58 = vmul.f32 %v676_v50, %v773_v1  ;;  %v258_v59 = vmul.f32 %v677_v51, %v773_v1  ;;  %v344_v60 = vadd.f32 %v787_v7, %v253_v52  ;;  %v345_v61 = vadd.f32 %v787_v7, %v254_v53 }
  0x46   :  { %v259_v62 = vmul.f32 %v680_v54, %v773_v1  ;;  %v260_v63 = vmul.f32 %v681_v55, %v773_v1  ;;  %v346_v0 = vadd.f32 %v787_v7, %v255_v56  ;;  %v347_v2 = vadd.f32 %v787_v7, %v256_v57 }
  0x47   :  { %v348_v3 = vadd.f32 %v787_v7, %v257_v58  ;;  %v349_v4 = vadd.f32 %v787_v7, %v258_v59  ;;  %v428_v6 = vmax.f32 %v344_v60, 0.0  ;;  %v429_v8 = vmax.f32 %v345_v61, 0.0 }
  0x48   :  { %v350_v9 = vadd.f32 %v787_v7, %v259_v62  ;;  %v351_v10 = vadd.f32 %v787_v7, %v260_v63  ;;  %v430_v13 = vmax.f32 %v346_v0, 0.0  ;;  %v431_v14 = vmax.f32 %v347_v2, 0.0 }
  0x49   :  { %v432_v15 = vmax.f32 %v348_v3, 0.0  ;;  %v433_v16 = vmax.f32 %v349_v4, 0.0  ;;  %512 = vst [vmem:[%s1326_s3 + $0x200] sm:$0xff] %v428_v6  ;;  %513 = vst [vmem:[%s1326_s3 + $0x208] sm:$0xff] %v429_v8  ;;  %v684_v20 = vunpack.c.l.bf16 %v741_v5  ;;  %v685_v21 = vunpack.c.h.bf16 %v741_v5 }
  0x4a   :  { %v434_v18 = vmax.f32 %v350_v9, 0.0  ;;  %v435_v19 = vmax.f32 %v351_v10, 0.0  ;;  %514 = vst [vmem:[%s1326_s3 + $0x210] sm:$0xff] %v430_v13  ;;  %515 = vst [vmem:[%s1326_s3 + $0x218] sm:$0xff] %v431_v14  ;;  %v688_v22 = vunpack.c.l.bf16 %v742_v11  ;;  %v689_v23 = vunpack.c.h.bf16 %v742_v11 }
  0x4b   :  { %516 = vst [vmem:[%s1326_s3 + $0x220] sm:$0xff] %v432_v15  ;;  %517 = vst [vmem:[%s1326_s3 + $0x228] sm:$0xff] %v433_v16  ;;  %v692_v24 = vunpack.c.l.bf16 %v743_v12  ;;  %v693_v25 = vunpack.c.h.bf16 %v743_v12  ;;  %v261_v26 = vmul.f32 %v684_v20, %v773_v1  ;;  %v262_v27 = vmul.f32 %v685_v21, %v773_v1 }
  0x4c   :  { %518 = vst [vmem:[%s1326_s3 + $0x230] sm:$0xff] %v434_v18  ;;  %519 = vst [vmem:[%s1326_s3 + $0x238] sm:$0xff] %v435_v19  ;;  %v696_v28 = vunpack.c.l.bf16 %v744_v17  ;;  %v697_v29 = vunpack.c.h.bf16 %v744_v17  ;;  %v263_v30 = vmul.f32 %v688_v22, %v773_v1  ;;  %v264_v31 = vmul.f32 %v689_v23, %v773_v1 }
  0x4d   :  { %v265_v32 = vmul.f32 %v692_v24, %v773_v1  ;;  %v266_v33 = vmul.f32 %v693_v25, %v773_v1  ;;  %v352_v34 = vadd.f32 %v787_v7, %v261_v26  ;;  %v353_v35 = vadd.f32 %v787_v7, %v262_v27 }
  0x4e   :  { %v267_v36 = vmul.f32 %v696_v28, %v773_v1  ;;  %v268_v37 = vmul.f32 %v697_v29, %v773_v1  ;;  %v354_v38 = vadd.f32 %v787_v7, %v263_v30  ;;  %v355_v39 = vadd.f32 %v787_v7, %v264_v31 }
  0x4f   :  { %v356_v40 = vadd.f32 %v787_v7, %v265_v32  ;;  %v357_v41 = vadd.f32 %v787_v7, %v266_v33  ;;  %v436_v43 = vmax.f32 %v352_v34, 0.0  ;;  %v437_v44 = vmax.f32 %v353_v35, 0.0 }
  0x50   :  { %v358_v45 = vadd.f32 %v787_v7, %v267_v36  ;;  %v359_v46 = vadd.f32 %v787_v7, %v268_v37  ;;  %v438_v48 = vmax.f32 %v354_v38, 0.0  ;;  %v439_v49 = vmax.f32 %v355_v39, 0.0 }
  0x51   :  { %v440_v50 = vmax.f32 %v356_v40, 0.0  ;;  %v441_v51 = vmax.f32 %v357_v41, 0.0  ;;  %520 = vst [vmem:[%s1326_s3 + $0x240] sm:$0xff] %v436_v43  ;;  %521 = vst [vmem:[%s1326_s3 + $0x248] sm:$0xff] %v437_v44  ;;  %v700_v54 = vunpack.c.l.bf16 %v745_v42  ;;  %v701_v55 = vunpack.c.h.bf16 %v745_v42 }
  0x52   :  { %v442_v52 = vmax.f32 %v358_v45, 0.0  ;;  %v443_v53 = vmax.f32 %v359_v46, 0.0  ;;  %522 = vst [vmem:[%s1326_s3 + $0x250] sm:$0xff] %v438_v48  ;;  %523 = vst [vmem:[%s1326_s3 + $0x258] sm:$0xff] %v439_v49  ;;  %v704_v56 = vunpack.c.l.bf16 %v746_v47  ;;  %v705_v57 = vunpack.c.h.bf16 %v746_v47 }
  0x53   :  { %524 = vst [vmem:[%s1326_s3 + $0x260] sm:$0xff] %v440_v50  ;;  %525 = vst [vmem:[%s1326_s3 + $0x268] sm:$0xff] %v441_v51  ;;  %v269_v58 = vmul.f32 %v700_v54, %v773_v1  ;;  %v270_v59 = vmul.f32 %v701_v55, %v773_v1 }
  0x54   :  { %526 = vst [vmem:[%s1326_s3 + $0x270] sm:$0xff] %v442_v52  ;;  %527 = vst [vmem:[%s1326_s3 + $0x278] sm:$0xff] %v443_v53  ;;  %v271_v60 = vmul.f32 %v704_v56, %v773_v1  ;;  %v272_v61 = vmul.f32 %v705_v57, %v773_v1 }
  0x55   :  { %v360_v62 = vadd.f32 %v787_v7, %v269_v58  ;;  %v361_v63 = vadd.f32 %v787_v7, %v270_v59 }
  0x56   :  { %v362_v0 = vadd.f32 %v787_v7, %v271_v60  ;;  %v363_v2 = vadd.f32 %v787_v7, %v272_v61 }
  0x57   :  { %v444_v3 = vmax.f32 %v360_v62, 0.0  ;;  %v445_v4 = vmax.f32 %v361_v63, 0.0 }
  0x58   :  { %v446_v5 = vmax.f32 %v362_v0, 0.0  ;;  %v447_v6 = vmax.f32 %v363_v2, 0.0 }
  0x59   :  { %528 = vst [vmem:[%s1326_s3 + $0x280] sm:$0xff] %v444_v3  ;;  %529 = vst [vmem:[%s1326_s3 + $0x288] sm:$0xff] %v445_v4 }
  0x5a   :  { %530 = vst [vmem:[%s1326_s3 + $0x290] sm:$0xff] %v446_v5  ;;  %531 = vst [vmem:[%s1326_s3 + $0x298] sm:$0xff] %v447_v6 }

// kernel: conv_bn_relu.2
= control target key start
LH: loop header
LB: loop body
LE: loop exit
PB: predicated region body
PF: predicated region fallthrough
CT: control target
= control target key end

     0   :  { %s7271_s18 = smov 0   ;;  %s8768_s0 = inlined_call_operand.vmem [shape: bf16[2,384,16], index: 0, kind: input, shape index: {}]   ;;  %s8769_s1 = inlined_call_operand.vmem [shape: bf16[9,16,128], index: 1, kind: input, shape index: {}]   ;;  %s8770_s2 = inlined_call_operand.vmem [shape: f32[336,1], index: 2, kind: input, shape index: {}]   ;;  %s8771_s3 = inlined_call_operand.vmem [shape: bf16[672,128], index: 3, kind: output, shape index: {0}]   ;;  %s8772_s4 = inlined_call_operand.vmem [shape: f32[2,1,128], index: 4, kind: output, shape index: {1}]   ;;  %s8773_s5 = inlined_call_operand.vmem [shape: f32[2,1,128], index: 5, kind: output, shape index: {2}]  }
   0x1 LB: > { %s7277_s19 = sadd.s32 4294967295, %s7236_s18   ;;  %p4986_p0 = scmp.ge.s32.totalorder %s7236_s18, 1  ;;  %s7236_s18 = sphi %s7271_s18, %s16_s18  }
   0x2   : > { %p192_p1 = scmp.lt.s32.totalorder %s7236_s18, 3 }
   0x4   : > { %p193_p2 = pnand %p4986_p0, %p192_p1 }
   0x5   : > { %v7103_v0 = vld [vmem:[%s8769_s1 + $0x20] sm:$0xff] (!%p193_p2)   ;;  %v7238_v1 = vmov (!%p193_p2), 0.0   ;;  %v7104_v2 = vld [vmem:[%s8769_s1 + $0x8] sm:$0xff] (!%p193_p2)   ;;  %vm7239_vm0 = vmmov (!%p193_p2), 0   ;;  %p226_p3 = scmp.lt.s32.totalorder (!%p193_p2), %s7277_s19, 1  ;;  %vm579_vm3 = vcmask (!%p193_p2), 130048  }
   0x6   : > { %196 = sbr.rel (%p193_p2) target bundleno = 1017 (0x3f9), region = 32  ;;  %6027 = vmatprep.subr.bf16.mxu0 (!%p193_p2), %v7238_v1  ;;  %5683 = vmatprep.subr.bf16.mxu1 (!%p193_p2), %v7238_v1  ;;  %vm400_vm1 = vsmask.f32 (!%p193_p2), 7424  ;;  %vm1972_vm2 = vsmask.f32 (!%p193_p2), 6400  ;;  %v7111_v27 = vld [vmem:[%s8769_s1] sm:$0xff] (!%p193_p2)  }
   0x7   : > { %6028 = vmatpush3.bf16.msra.mxu0 (!%p193_p2), %v7103_v0  ;;  %5685 = vmatprep.mubr.msk.bf16.mxu1 (!%p193_p2), %vm7239_vm0, %v7238_v1  ;;  %v7109_v35 = vld [vmem:[%s8769_s1 + $0x28] sm:$0xff] (!%p193_p2)   ;;  %vm2489_vm4 = vcmask (!%p193_p2), 1045504   ;;  %vm1100_vm5 = vcmask (!%p193_p2), 1046528   ;;  %vm3361_vm6 = vsmask.f32 (!%p193_p2), 5376  ;;  %vm3878_vm7 = vcmask (!%p193_p2), 1044480  }
   0x8   : > { %5684 = vmatpush3.bf16.msra.mxu1 (!%p193_p2), %v7104_v2  ;;  %6029 = vmatprep.mubr.msk.bf16.mxu0 (!%p193_p2), %vm7239_vm0, %v7238_v1 }
   0x9   : > { %6113 = vmatprep.subr.bf16.mxu0 (!%p193_p2), %v7238_v1  ;;  %5769 = vmatprep.subr.bf16.mxu1 (!%p193_p2), %v7238_v1 }
   0xd   : > { %s7296_s24 = scalar_select %p226_p3, %s7277_s19, 1 }
   0xf   : > { %s7089_s25 = smul.u32 192, %s7296_s24  ;;  %s239_s29 = scalar_lea.vmem %s8772_s4, %s7296_s24 }
  0x10   : > { %s242_s7 = scalar_lea.vmem %s8773_s5, %s7296_s24 }
  0x11   : > { %s7303_s28 = scalar_lea.vmem %s8768_s0, %s7089_s25 }
  0x12   : > { %v244_v3 = vld [vmem:[%s7303_s28] sm:$0xf]  ;;  %v245_v4 = vld [vmem:[%s7303_s28 + $0x4] sm:$0xf]  ;;  %v7310_v6 = vld [vmem:[%s7303_s28 + $0x8] sm:$0xff]  }
  0x13   : > { %v7307_v5 = vcombine.low %v244_v3, %v245_v4  ;;  %v1456_v7 = vld [vmem:[%s7303_s28 + $0x8] sm:$0xe]  ;;  %v7314_v8 = vld [vmem:[%s7303_s28 + $0xc] sm:$0xf]  ;;  %v409_v11 = vshll.u32 %v7310_v6, 16  ;;  %v7323_v13 = vld [vmem:[%s7303_s28 + $0x10] sm:$0xff]  }
  0x14   : > { %v7320_v12 = vcombine.low %v1456_v7, %v7314_v8  ;;  %v7326_v14 = vld [vmem:[%s7303_s28 + $0x10] sm:$0xff]   ;;  %v1982_v19 = vshrl.u32 %v7323_v13, 16  ;;  %v1985_v20 = vshll.u32 %v7323_v13, 16  ;;  %v413_v21 = vshrl.u32 %v7310_v6, 16  ;;  %v7334_v22 = vld [vmem:[%s7303_s28 + $0x18] sm:$0xff]   ;;  %v7348_v37 = vld [vmem:[%s7303_s28 + $0x20] sm:$0xff]  }
  0x15   : > { %v402_v9 = vshrl.u32 %v7307_v5, 16  ;;  %v404_v10 = vshll.u32 %v7307_v5, 16  ;;  %v411_v16 = vrot.slane %v409_v11, 1  ;;  %v417_v26 = vshll.u32 %v7326_v14, 16  ;;  %v7353_v41 = vld [vmem:[%s7303_s28 + $0x18] sm:$0xff]   ;;  %v7369_v52 = vld [vmem:[%s7303_s28 + $0x28] sm:$0xff]  }
  0x16   : > { %v1974_v17 = vshrl.u32 %v7320_v12, 16  ;;  %v1977_v18 = vshll.u32 %v7320_v12, 16  ;;  %v1984_v28 = vrot.slane %v1982_v19, 1  ;;  %v1987_v29 = vrot.slane %v1985_v20, 2  ;;  %v7374_v55 = vld [vmem:[%s7303_s28 + $0x20] sm:$0xff]   ;;  %v7387_v2 = vld [vmem:[%s7303_s28 + $0x30] sm:$0xff]  }
  0x17   : > { %v406_v15 = vrot.slane %v404_v10, 1  ;;  %v1991_v30 = vshrl.u32 %v7334_v22, 16  ;;  %v1994_v33 = vshll.u32 %v7334_v22, 16  ;;  %v415_v38 = vor.u32 %v413_v21, %v411_v16  ;;  %v7392_v7 = vld [vmem:[%s7303_s28 + $0x28] sm:$0xff]   ;;  %v7405_v21 = vld [vmem:[%s7303_s28 + $0x38] sm:$0xff]  }
  0x18   : > { %v1976_v24 = vrot.slane %v1974_v17, 1  ;;  %v1979_v25 = vrot.slane %v1977_v18, 2  ;;  %v1988_v34 = vor.u32 %v1987_v29, %v1984_v28  ;;  %v419_v39 = vrot.slane %v417_v26, 1 }
  0x19   : > { %v407_v23 = vor.u32 %v406_v15, %v402_v9  ;;  %v1993_v36 = vrot.slane %v1991_v30, 1  ;;  %v1996_v40 = vrot.slane %v1994_v33, 2  ;;  %v2000_v44 = vshrl.u32 %v7348_v37, 16  ;;  %v7424_v33 = vld [vmem:[%s7303_s28 + $0x40] sm:$0xff]  }
  0x1a   : > { %v1980_v32 = vor.u32 %v1979_v25, %v1976_v24  ;;  %v2003_v45 = vshll.u32 %v7348_v37, 16  ;;  %v420_v46 = vsel %vm400_vm1, %v415_v38, %v419_v39  ;;  %v421_v47 = vshrl.u32 %v7326_v14, 16  ;;  %v7410_v25 = vld [vmem:[%s7303_s28 + $0x30] sm:$0xff]  }
  0x1b   : > { %v412_v31 = vsel %vm400_vm1, %v407_v23, %v411_v16  ;;  %v1997_v43 = vor.u32 %v1996_v40, %v1993_v36  ;;  %v425_v48 = vshll.u32 %v7353_v41, 16  ;;  %v2002_v50 = vrot.slane %v2000_v44, 1  ;;  %v7431_v40 = vld [vmem:[%s7303_s28 + $0x40] sm:$0xff]  }
  0x1c   : > { %5686 = vmatmul.mubr.msk.bf16.vlgmr.msra.gmra.mrb[0].mxu1 %vm579_vm3, %v412_v31  ;;  %v1989_v42 = vsel %vm1972_vm2, %v1980_v32, %v1988_v34  ;;  %v2005_v51 = vrot.slane %v2003_v45, 2  ;;  %v423_v53 = vor.u32 %v421_v47, %v419_v39  ;;  %v2009_v57 = vshrl.u32 %v7369_v52, 16  ;;  %v7421_v32 = vld [vmem:[%s7303_s28 + $0x38] sm:$0xff]  }
  0x1d   : > { %5689 = vmatprep.mubr.msk.bf16.mxu1 %vm7239_vm0, %v7238_v1  ;;  %5770 = vmatpush3.bf16.msra.mxu1 %v7111_v27  ;;  %v1998_v49 = vsel %vm1972_vm2, %v1988_v34, %v1997_v43  ;;  %v427_v54 = vrot.slane %v425_v48, 1  ;;  %v2012_v58 = vshll.u32 %v7369_v52, 16  ;;  %v429_v60 = vshrl.u32 %v7353_v41, 16 }
  0x1e   : > { %5855 = vmatprep.subr.bf16.mxu1 %v7238_v1  ;;  %6030 = vmatmul.mubr.msk.bf16.vlgmr.msra.gmra.mrb[0].mxu0 %vm579_vm3, %v1989_v42  ;;  %v2006_v56 = vor.u32 %v2005_v51, %v2002_v50  ;;  %v433_v61 = vshll.u32 %v7374_v55, 16  ;;  %v2011_v63 = vrot.slane %v2009_v57, 1  ;;  %v2018_v10 = vshrl.u32 %v7387_v2, 16  ;;  %v7434_v42 = vld [vmem:[%s7303_s28 + $0x48] sm:$0xff]  }
  0x1f   : > { %6114 = vmatpush3.bf16.msra.mxu0 %v7109_v35  ;;  %6033 = vmatprep.mubr.msk.bf16.mxu0 %vm7239_vm0, %v7238_v1  ;;  %v428_v59 = vsel %vm400_vm1, %v423_v53, %v427_v54  ;;  %v2014_v0 = vrot.slane %v2012_v58, 2  ;;  %v431_v3 = vor.u32 %v429_v60, %v427_v54  ;;  %v2021_v11 = vshll.u32 %v7387_v2, 16  ;;  %v7447_v51 = vld [vmem:[%s7303_s28 + $0x48] sm:$0xff]   ;;  %v7450_v54 = vld [vmem:[%s7303_s28 + $0x50] sm:$0xff]  }
  0x20   : > { %6199 = vmatprep.subr.bf16.mxu0 %v7238_v1  ;;  %v2007_v62 = vsel %vm1972_vm2, %v1997_v43, %v2006_v56  ;;  %v435_v4 = vrot.slane %v433_v61, 1  ;;  %v437_v16 = vshrl.u32 %v7374_v55, 16  ;;  %v441_v17 = vshll.u32 %v7392_v7, 16 }
  0x21   : > { %v2015_v9 = vor.u32 %v2014_v0, %v2011_v63  ;;  %v2020_v19 = vrot.slane %v2018_v10, 1  ;;  %v2023_v20 = vrot.slane %v2021_v11, 2  ;;  %v2027_v27 = vshrl.u32 %v7405_v21, 16 }
  0x22   : > { %v436_v15 = vsel %vm400_vm1, %v431_v3, %v435_v4  ;;  %v439_v23 = vor.u32 %v437_v16, %v435_v4  ;;  %v443_v24 = vrot.slane %v441_v17, 1  ;;  %v2030_v28 = vshll.u32 %v7405_v21, 16 }
  0x23   : > { %v2016_v18 = vsel %vm1972_vm2, %v2006_v56, %v2015_v9  ;;  %v2024_v26 = vor.u32 %v2023_v20, %v2020_v19  ;;  %v445_v30 = vshrl.u32 %v7392_v7, 16  ;;  %v449_v31 = vshll.u32 %v7410_v25, 16  ;;  %v7470_v20 = vld [vmem:[%s7303_s28 + $0x50] sm:$0xff]  }
  0x24   : > { %5690 = vmatmul.mubr.msk.bf16.gmra.mrb[4].mxu1 %vm579_vm3, %v420_v46  ;;  %v444_v29 = vsel %vm400_vm1, %v439_v23, %v443_v24  ;;  %v2029_v35 = vrot.slane %v2027_v27, 1  ;;  %v2032_v36 = vrot.slane %v2030_v28, 2  ;;  %v457_v43 = vshll.u32 %v7421_v32, 16 }
  0x25   : > { %5693 = vmatprep.mubr.msk.bf16.mxu1 %vm7239_vm0, %v7238_v1  ;;  %v2025_v34 = vsel %vm1972_vm2, %v2015_v9, %v2024_v26  ;;  %v447_v38 = vor.u32 %v445_v30, %v443_v24  ;;  %v451_v39 = vrot.slane %v449_v31, 1  ;;  %v453_v45 = vshrl.u32 %v7410_v25, 16  ;;  %v7475_v24 = vld [vmem:[%s7303_s28 + $0x58] sm:$0xff]  }
  0x26   : > { %6034 = vmatmul.mubr.msk.bf16.gmra.mrb[4].mxu0 %vm579_vm3, %v1998_v49  ;;  %v2033_v44 = vor.u32 %v2032_v36, %v2029_v35  ;;  %v2036_v46 = vshrl.u32 %v7424_v33, 16  ;;  %v2039_v47 = vshll.u32 %v7424_v33, 16  ;;  %v465_v49 = vshll.u32 %v7431_v40, 16 }
  0x27   : > { %6037 = vmatprep.mubr.msk.bf16.mxu0 %vm7239_vm0, %v7238_v1  ;;  %v452_v48 = vsel %vm400_vm1, %v447_v38, %v451_v39  ;;  %v2045_v50 = vshrl.u32 %v7434_v42, 16  ;;  %v459_v53 = vrot.slane %v457_v43, 1  ;;  %v455_v57 = vor.u32 %v453_v45, %v451_v39  ;;  %v7495_v45 = vld [vmem:[%s7303_s28 + $0x60] sm:$0xff]  }
  0x28   : > { %v2034_v56 = vsel %vm1972_vm2, %v2024_v26, %v2033_v44  ;;  %v2038_v58 = vrot.slane %v2036_v46, 1  ;;  %v461_v60 = vshrl.u32 %v7421_v32, 16  ;;  %v467_v61 = vrot.slane %v465_v49, 1 }
  0x29   : > { %v469_v63 = vshrl.u32 %v7431_v40, 16  ;;  %v2047_v0 = vrot.slane %v2045_v50, 1  ;;  %v473_v3 = vshll.u32 %v7447_v51, 16  ;;  %v2054_v4 = vshrl.u32 %v7450_v54, 16 }
  0x2a   : > { %v2057_v9 = vshll.u32 %v7450_v54, 16  ;;  %v460_v11 = vsel %vm400_vm1, %v455_v57, %v459_v53  ;;  %v477_v16 = vshrl.u32 %v7447_v51, 16  ;;  %v463_v23 = vor.u32 %v461_v60, %v459_v53 }
  0x2b   : > { %v2056_v19 = vrot.slane %v2054_v4, 1  ;;  %v2063_v31 = vshrl.u32 %v7475_v24, 16  ;;  %v471_v35 = vor.u32 %v469_v63, %v467_v61  ;;  %v2072_v50 = vshrl.u32 %v7495_v45, 16 }
  0x2c   : > { %5694 = vmatmul.mubr.msk.bf16.gmra.mrb[8].mxu1 %vm579_vm3, %v428_v59  ;;  %v2041_v59 = vrot.slane %v2039_v47, 2  ;;  %v468_v27 = vsel %vm400_vm1, %v463_v23, %v467_v61  ;;  %v2059_v28 = vrot.slane %v2057_v9, 2  ;;  %v2075_v53 = vshll.u32 %v7495_v45, 16 }
  0x2d   : > { %5697 = vmatprep.mubr.msk.bf16.mxu1 %vm7239_vm0, %v7238_v1  ;;  %v2065_v43 = vrot.slane %v2063_v31, 1  ;;  %v485_v57 = vshrl.u32 %v7470_v20, 16  ;;  %v2074_v60 = vrot.slane %v2072_v50, 1 }
  0x2e   : > { %6038 = vmatmul.mubr.msk.bf16.gmra.mrb[8].mxu0 %vm579_vm3, %v2007_v62  ;;  %v2048_v62 = vshll.u32 %v7434_v42, 16  ;;  %v2042_v10 = vor.u32 %v2041_v59, %v2038_v58  ;;  %v2060_v36 = vor.u32 %v2059_v28, %v2056_v19  ;;  %v2077_v61 = vrot.slane %v2075_v53, 2  ;;  %v7533_v19 = vld [vmem:[%s7303_s28 + $0x68] sm:$0xff]  }
  0x2f   : > { %6041 = vmatprep.mubr.msk.bf16.mxu0 %vm7239_vm0, %v7238_v1  ;;  %v505_v28 = vshll.u32 %v7533_v19, 16 }
  0x30   : > { %v2043_v17 = vsel %vm1972_vm2, %v2033_v44, %v2042_v10 }
  0x34   : > { %5698 = vmatmul.mubr.msk.bf16.gmra.mrb[12].mxu1 %vm579_vm3, %v436_v15  ;;  %v2050_v15 = vrot.slane %v2048_v62, 2 }
  0x35   : > { %5701 = vmatprep.mubr.msk.bf16.mxu1 %vm7239_vm0, %v7238_v1 }
  0x36   : > { %6042 = vmatmul.mubr.msk.bf16.gmra.mrb[12].mxu0 %vm579_vm3, %v2016_v18  ;;  %v475_v18 = vrot.slane %v473_v3, 1  ;;  %v2051_v26 = vor.u32 %v2050_v15, %v2047_v0  ;;  %v7515_v0 = vld [vmem:[%s7303_s28 + $0x60] sm:$0xff]   ;;  %v7520_v3 = vor.u32 %v2077_v61, %v2074_v60 }
  0x37   : > { %6045 = vmatprep.mubr.msk.bf16.mxu0 %vm7239_vm0, %v7238_v1 }
  0x38   : > { %v2052_v30 = vsel %vm1972_vm2, %v2042_v10, %v2051_v26  ;;  %v476_v38 = vsel %vm400_vm1, %v471_v35, %v475_v18  ;;  %v2061_v39 = vsel %vm1972_vm2, %v2051_v26, %v2060_v36  ;;  %v479_v46 = vor.u32 %v477_v16, %v475_v18 }
  0x39   : > { %v497_v10 = vshll.u32 %v7515_v0, 16  ;;  %v2491_v26 = vrot.slane %v7323_v13, 2  ;;  %v507_v13 = vrot.slane %v505_v28, 1  ;;  %v2493_v35 = vrot.slane %v7334_v22, 2 }
  0x3a   : > { %v2495_v22 = vrot.slane %v7348_v37, 2  ;;  %v2497_v37 = vrot.slane %v7369_v52, 2  ;;  %v2499_v52 = vrot.slane %v7387_v2, 2  ;;  %v2501_v2 = vrot.slane %v7405_v21, 2 }
  0x3b   : > { %v499_v18 = vrot.slane %v497_v10, 1  ;;  %v7593_v10 = vld [vmem:[%s7303_s28 + $0x88] sm:$0xff]   ;;  %v2503_v21 = vrot.slane %v7424_v33, 2  ;;  %v2505_v33 = vrot.slane %v7434_v42, 2  ;;  %v2507_v42 = vrot.slane %v7450_v54, 2 }
  0x3c   : > { %5702 = vmatmul.mubr.msk.bf16.gmra.mrb[16].mxu1 %vm579_vm3, %v444_v29  ;;  %v481_v29 = vshll.u32 %v7470_v20, 16  ;;  %v2509_v54 = vrot.slane %v7475_v24, 2 }
  0x3d   : > { %5705 = vmatprep.mubr.msk.bf16.mxu1 %vm7239_vm0, %v7238_v1 }
  0x3e   : > { %6046 = vmatmul.mubr.msk.bf16.gmra.mrb[16].mxu0 %vm579_vm3, %v2025_v34  ;;  %v2066_v34 = vshll.u32 %v7475_v24, 16  ;;  %v483_v47 = vrot.slane %v481_v29, 1  ;;  %v7143_v24 = vld [vmem:[%s8769_s1 + $0x10] sm:$0xff]  }
  0x3f   : > { %6049 = vmatprep.mubr.msk.bf16.mxu0 %vm7239_vm0, %v7238_v1 }
  0x40   : > { %v2068_v44 = vrot.slane %v2066_v34, 2  ;;  %v487_v62 = vor.u32 %v485_v57, %v483_v47  ;;  %v7550_v34 = vld [vmem:[%s7303_s28 + $0x70] sm:$0xff]  }
  0x41   : > { %v517_v50 = vshrl.u32 %v7550_v34, 16 }
  0x42   : > { %v2069_v49 = vor.u32 %v2068_v44, %v2065_v43  ;;  %v2494_v43 = vsel %vm2489_vm4, %v2491_v26, %v2493_v35 }
  0x44   : > { %5706 = vmatmul.mubr.msk.bf16.gmra.mrb[20].mxu1 %vm579_vm3, %v452_v48  ;;  %v7500_v48 = vld [vmem:[%s7303_s28 + $0x58] sm:$0xff]   ;;  %v2070_v59 = vsel %vm1972_vm2, %v2060_v36, %v2069_v49  ;;  %v2079_v15 = vsel %vm1972_vm2, %v2069_v49, %v7520_v3 }
  0x45   : > { %5709 = vmatprep.mubr.msk.bf16.mxu1 %vm7239_vm0, %v7238_v1  ;;  %v489_v58 = vshll.u32 %v7500_v48, 16  ;;  %v493_v9 = vshrl.u32 %v7500_v48, 16 }
  0x46   : > { %6050 = vmatmul.mubr.msk.bf16.gmra.mrb[20].mxu0 %vm579_vm3, %v2034_v56  ;;  %v484_v56 = vsel %vm400_vm1, %v479_v46, %v483_v47  ;;  %v7565_v47 = vld [vmem:[%s7303_s28 + $0x78] sm:$0xff]  }
  0x47   : > { %6053 = vmatprep.mubr.msk.bf16.mxu0 %vm7239_vm0, %v7238_v1  ;;  %v491_v63 = vrot.slane %v489_v58, 1  ;;  %v521_v53 = vshll.u32 %v7565_v47, 16  ;;  %v525_v61 = vshrl.u32 %v7565_v47, 16 }
  0x49   : > { %v492_v4 = vsel %vm400_vm1, %v487_v62, %v491_v63  ;;  %v523_v58 = vrot.slane %v521_v53, 1  ;;  %v2506_v53 = vsel %vm2489_vm4, %v2503_v21, %v2505_v33 }
  0x4c   : > { %5710 = vmatmul.mubr.msk.bf16.gmra.mrb[24].mxu1 %vm579_vm3, %v460_v11  ;;  %v2482_v11 = vld [vmem:[%s7303_s28 + $0x8] sm:$0xc] }
  0x4d   : > { %5713 = vmatprep.mubr.msk.bf16.mxu1 %vm7239_vm0, %v7238_v1  ;;  %v5155_v16 = vcombine.low %v2482_v11, %v7314_v8  ;;  %v501_v8 = vshrl.u32 %v7515_v0, 16 }
  0x4e   : > { %6054 = vmatmul.mubr.msk.bf16.gmra.mrb[24].mxu0 %vm579_vm3, %v2043_v17  ;;  %v495_v17 = vor.u32 %v493_v9, %v491_v63  ;;  %v2498_v63 = vsel %vm2489_vm4, %v2495_v22, %v2497_v37 }
  0x4f   : > { %6057 = vmatprep.mubr.msk.bf16.mxu0 %vm7239_vm0, %v7238_v1  ;;  %v2490_v23 = vrot.slane %v5155_v16, 2  ;;  %v503_v31 = vor.u32 %v501_v8, %v499_v18  ;;  %v537_v16 = vshll.u32 %v7593_v10, 16  ;;  %v541_v8 = vshrl.u32 %v7593_v10, 16 }
  0x51   : > { %v2492_v29 = vsel %vm2489_vm4, %v2490_v23, %v2491_v26  ;;  %v508_v36 = vsel %vm400_vm1, %v503_v31, %v507_v13  ;;  %v539_v23 = vrot.slane %v537_v16, 1  ;;  %v7607_v26 = vld [vmem:[%s7303_s28 + $0x90] sm:$0xff]   ;;  %v7144_v16 = vld [vmem:[%s7303_s28 + $0x68] sm:$0xff]  }
  0x52   : > { %v545_v28 = vshll.u32 %v7607_v26, 16 }
  0x54   : > { %5714 = vmatmul.mubr.msk.bf16.gmra.mrb[28].mxu1 %vm579_vm3, %v468_v27  ;;  %v500_v27 = vsel %vm400_vm1, %v495_v17, %v499_v18  ;;  %v2500_v17 = vsel %vm2489_vm4, %v2497_v37, %v2499_v52  ;;  %v547_v31 = vrot.slane %v545_v28, 1 }
  0x55   : > { %5717 = vmatprep.mubr.msk.bf16.mxu1 %vm7239_vm0, %v7238_v1 }
  0x56   : > { %6058 = vmatmul.mubr.msk.bf16.gmra.mrb[28].mxu0 %vm579_vm3, %v2052_v30  ;;  %v7133_v30 = vld [vmem:[%s8769_s1 + $0x30] sm:$0xff]  }
  0x57   : > { %6061 = vmatprep.mubr.msk.bf16.mxu0 %vm7239_vm0, %v7238_v1 }
  0x5c   : > { %5718 = vmatmul.mubr.msk.bf16.gmra.mrb[32].mxu1 %vm579_vm3, %v476_v38  ;;  %v509_v38 = vshrl.u32 %v7533_v19, 16 }
  0x5d   : > { %5721 = vmatprep.mubr.msk.bf16.mxu1 %vm7239_vm0, %v7238_v1 }
  0x5e   : > { %6062 = vmatmul.mubr.msk.bf16.gmra.mrb[32].mxu0 %vm579_vm3, %v2061_v39  ;;  %v513_v39 = vshll.u32 %v7550_v34, 16  ;;  %v511_v44 = vor.u32 %v509_v38, %v507_v13  ;;  %v7621_v13 = vld [vmem:[%s7303_s28 + $0x98] sm:$0xff]  }
  0x5f   : > { %6065 = vmatprep.mubr.msk.bf16.mxu0 %vm7239_vm0, %v7238_v1  ;;  %v553_v38 = vshll.u32 %v7621_v13, 16 }
  0x60   : > { %v515_v46 = vrot.slane %v513_v39, 1  ;;  %v2504_v39 = vsel %vm2489_vm4, %v2501_v2, %v2503_v21 }
  0x62   : > { %v516_v49 = vsel %vm400_vm1, %v511_v44, %v515_v46  ;;  %v519_v57 = vor.u32 %v517_v50, %v515_v46  ;;  %v555_v44 = vrot.slane %v553_v38, 1  ;;  %v7635_v46 = vld [vmem:[%s7303_s28 + $0xa0] sm:$0xff]  }
  0x63   : > { %v561_v50 = vshll.u32 %v7635_v46, 16 }
  0x64   : > { %5722 = vmatmul.mubr.msk.bf16.gmra.mrb[36].mxu1 %vm579_vm3, %v484_v56  ;;  %v2496_v56 = vsel %vm2489_vm4, %v2493_v35, %v2495_v22  ;;  %v524_v60 = vsel %vm400_vm1, %v519_v57, %v523_v58 }
  0x65   : > { %5725 = vmatprep.mubr.msk.bf16.mxu1 %vm7239_vm0, %v7238_v1  ;;  %v563_v57 = vrot.slane %v561_v50, 1  ;;  %v7771_v50 = vld [vmem:[%s7303_s28 + $0x14] sm:$0xf] }
  0x66   : > { %6066 = vmatmul.mubr.msk.bf16.gmra.mrb[36].mxu0 %vm579_vm3, %v2070_v59  ;;  %v7579_v59 = vld [vmem:[%s7303_s28 + $0x80] sm:$0xff]  }
  0x67   : > { %6069 = vmatprep.mubr.msk.bf16.mxu0 %vm7239_vm0, %v7238_v1  ;;  %v529_v62 = vshll.u32 %v7579_v59, 16 }
  0x69   : > { %v531_v9 = vrot.slane %v529_v62, 1  ;;  %v2508_v62 = vsel %vm2489_vm4, %v2505_v33, %v2507_v42  ;;  %v7153_v33 = vld [vmem:[%s7303_s28 + $0xb0] ss:$0 sps:$4 sm:$0x33]  }
  0x6c   : > { %5726 = vmatmul.mubr.msk.bf16.gmra.mrb[40].mxu1 %vm579_vm3, %v492_v4  ;;  %v527_v4 = vor.u32 %v525_v61, %v523_v58  ;;  %v7649_v58 = vld [vmem:[%s7303_s28 + $0xa8] ss:$0 sps:$4 sm:$0x11]  }
  0x6d   : > { %5729 = vmatprep.mubr.msk.bf16.mxu1 %vm7239_vm0, %v7238_v1  ;;  %v569_v61 = vshll.u32 %v7649_v58, 16 }
  0x6e   : > { %6070 = vmatmul.mubr.msk.bf16.gmra.mrb[40].mxu0 %vm579_vm3, %v2079_v15  ;;  %v532_v11 = vsel %vm400_vm1, %v527_v4, %v531_v9  ;;  %v533_v15 = vshrl.u32 %v7579_v59, 16 }
  0x6f   : > { %6115 = vmatprep.mubr.msk.bf16.mxu0 %vm7239_vm0, %v7238_v1  ;;  %v571_v4 = vrot.slane %v569_v61, 1  ;;  %v7156_v61 = vld [vmem:[%s8769_s1 + $0x38] sm:$0xff]  }
  0x70   : > { %v535_v18 = vor.u32 %v533_v15, %v531_v9 }
  0x74   : > { %5730 = vmatmul.mubr.msk.bf16.gmra.mrb[44].mxu1 %vm579_vm3, %v500_v27  ;;  %v540_v27 = vsel %vm400_vm1, %v535_v18, %v539_v23 }
  0x75   : > { %5733 = vmatprep.mubr.msk.bf16.mxu1 %vm7239_vm0, %v7238_v1 }
  0x76   : > { %6116 = vmatmul.mubr.msk.bf16.vlgmr.msra.gmra.mrb[0].mxu0 %vm579_vm3, %v2492_v29  ;;  %v2502_v29 = vsel %vm2489_vm4, %v2499_v52, %v2501_v2  ;;  %v2510_v52 = vsel %vm2489_vm4, %v2507_v42, %v2509_v54 }
  0x77   : > { %6200 = vmatpush3.bf16.msra.mxu0 %v7133_v30  ;;  %6119 = vmatprep.mubr.msk.bf16.mxu0 %vm7239_vm0, %v7238_v1  ;;  %v543_v30 = vor.u32 %v541_v8, %v539_v23 }
  0x78   : > { %6285 = vmatprep.subr.bf16.mxu0 %v7238_v1 }
  0x79   : > { %v548_v35 = vsel %vm400_vm1, %v543_v30, %v547_v31 }
  0x7c   : > { %5734 = vmatmul.mubr.msk.bf16.gmra.mrb[48].mxu1 %vm579_vm3, %v508_v36  ;;  %v549_v36 = vshrl.u32 %v7607_v26, 16 }
  0x7d   : > { %5737 = vmatprep.mubr.msk.bf16.mxu1 %vm7239_vm0, %v7238_v1 }
  0x7e   : > { %6120 = vmatmul.mubr.msk.bf16.gmra.mrb[4].mxu0 %vm579_vm3, %v2494_v43  ;;  %v551_v43 = vor.u32 %v549_v36, %v547_v31 }
  0x7f   : > { %6123 = vmatprep.mubr.msk.bf16.mxu0 %vm7239_vm0, %v7238_v1 }
  0x80   : > { %v556_v22 = vsel %vm400_vm1, %v551_v43, %v555_v44 }
  0x84   : > { %5738 = vmatmul.mubr.msk.bf16.gmra.mrb[52].mxu1 %vm579_vm3, %v516_v49  ;;  %v557_v49 = vshrl.u32 %v7621_v13, 16 }
  0x85   : > { %5741 = vmatprep.mubr.msk.bf16.mxu1 %vm7239_vm0, %v7238_v1 }
  0x86   : > { %6124 = vmatmul.mubr.msk.bf16.gmra.mrb[8].mxu0 %vm579_vm3, %v2496_v56  ;;  %v559_v56 = vor.u32 %v557_v49, %v555_v44  ;;  %v2845_v49 = vld [vmem:[%s7303_s28 + $0x10] sm:$0xc] }
  0x87   : > { %6127 = vmatprep.mubr.msk.bf16.mxu0 %vm7239_vm0, %v7238_v1 }
  0x88   : > { %v564_v37 = vsel %vm400_vm1, %v559_v56, %v563_v57  ;;  %v7777_v56 = vcombine.low %v2845_v49, %v7771_v50  ;;  %v7923_v49 = vld [vmem:[%s7303_s28 + $0x70] sm:$0xff]  }
  0x8a   : > { %v2999_v42 = vrot.slane %v7777_v56, 2 }
  0x8c   : > { %5742 = vmatmul.mubr.msk.bf16.gmra.mrb[56].mxu1 %vm579_vm3, %v524_v60  ;;  %v565_v60 = vshrl.u32 %v7635_v46, 16 }
  0x8d   : > { %5745 = vmatprep.mubr.msk.bf16.mxu1 %vm7239_vm0, %v7238_v1 }
  0x8e   : > { %6128 = vmatmul.mubr.msk.bf16.gmra.mrb[12].mxu0 %vm579_vm3, %v2498_v63  ;;  %v567_v63 = vor.u32 %v565_v60, %v563_v57  ;;  %v7780_v57 = vld [vmem:[%s7303_s28 + $0x18] sm:$0xff]  }
  0x8f   : > { %6131 = vmatprep.mubr.msk.bf16.mxu0 %vm7239_vm0, %v7238_v1 }
  0x90   : > { %v572_v9 = vsel %vm400_vm1, %v567_v63, %v571_v4 }
  0x94   : > { %5746 = vmatmul.mubr.msk.bf16.gmra.mrb[60].mxu1 %vm579_vm3, %v532_v11  ;;  %v2511_v11 = vrot.slane %v7495_v45, 2  ;;  %v2513_v45 = vrot.slane %v7144_v16, 2  ;;  %v7833_v16 = vld [vmem:[%s7303_s28 + $0x38] sm:$0xff]  }
  0x95   : > { %5749 = vmatprep.mubr.msk.bf16.mxu1 %vm7239_vm0, %v7238_v1 }
  0x96   : > { %6132 = vmatmul.mubr.msk.bf16.gmra.mrb[16].mxu0 %vm579_vm3, %v2500_v17  ;;  %v2512_v15 = vsel %vm2489_vm4, %v2509_v54, %v2511_v11  ;;  %v7145_v17 = vld [vmem:[%s7303_s28 + $0x70] sm:$0xff]   ;;  %v7809_v54 = vld [vmem:[%s7303_s28 + $0x28] sm:$0xff]  }
  0x97   : > { %6135 = vmatprep.mubr.msk.bf16.mxu0 %vm7239_vm0, %v7238_v1  ;;  %v2515_v18 = vrot.slane %v7145_v17, 2  ;;  %v7845_v17 = vld [vmem:[%s7303_s28 + $0x40] sm:$0xff]  }
  0x99   : > { %v2516_v23 = vsel %vm2489_vm4, %v2513_v45, %v2515_v18 }
  0x9c   : > { %5750 = vmatmul.mubr.msk.bf16.gmra.mrb[64].mxu1 %vm579_vm3, %v540_v27 }
  0x9d   : > { %5753 = vmatprep.mubr.msk.bf16.mxu1 %vm7239_vm0, %v7238_v1 }
  0x9e   : > { %6136 = vmatmul.mubr.msk.bf16.gmra.mrb[20].mxu0 %vm579_vm3, %v2502_v29 }
  0x9f   : > { %6139 = vmatprep.mubr.msk.bf16.mxu0 %vm7239_vm0, %v7238_v1 }
  0xa4   : > { %5754 = vmatmul.mubr.msk.bf16.gmra.mrb[68].mxu1 %vm579_vm3, %v548_v35 }
  0xa5   : > { %5757 = vmatprep.mubr.msk.bf16.mxu1 %vm7239_vm0, %v7238_v1 }
  0xa6   : > { %6140 = vmatmul.mubr.msk.bf16.gmra.mrb[24].mxu0 %vm579_vm3, %v2504_v39  ;;  %v7152_v39 = vld [vmem:[%s7303_s28 + $0xa8] sm:$0xff]  }
  0xa7   : > { %6143 = vmatprep.mubr.msk.bf16.mxu0 %vm7239_vm0, %v7238_v1  ;;  %v2529_v43 = vrot.slane %v7152_v39, 2 }
  0xac   : > { %5758 = vmatmul.mubr.msk.bf16.gmra.mrb[72].mxu1 %vm579_vm3, %v556_v22  ;;  %v2531_v22 = vrot.slane %v7153_v33, 2  ;;  %v7168_v33 = vld [vmem:[%s8769_s1 + $0x18] sm:$0xff]  }
  0xad   : > { %5761 = vmatprep.mubr.msk.bf16.mxu1 %vm7239_vm0, %v7238_v1 }
  0xae   : > { %6144 = vmatmul.mubr.msk.bf16.gmra.mrb[28].mxu0 %vm579_vm3, %v2506_v53  ;;  %v2532_v53 = vsel %vm2489_vm4, %v2529_v43, %v2531_v22 }
  0xaf   : > { %6147 = vmatprep.mubr.msk.bf16.mxu0 %vm7239_vm0, %v7238_v1 }
  0xb4   : > { %5762 = vmatmul.mubr.msk.bf16.gmra.mrb[76].mxu1 %vm579_vm3, %v564_v37  ;;  %v3000_v37 = vrot.slane %v7780_v57, 2 }
  0xb5   : > { %5765 = vmatprep.mubr.msk.bf16.mxu1 %vm7239_vm0, %v7238_v1 }
  0xb6   : > { %6148 = vmatmul.mubr.msk.bf16.gmra.mrb[32].mxu0 %vm579_vm3, %v2508_v62  ;;  %v3001_v60 = vsel %vm2489_vm4, %v2999_v42, %v3000_v37  ;;  %v7796_v62 = vld [vmem:[%s7303_s28 + $0x20] sm:$0xff]  }
  0xb7   : > { %6151 = vmatprep.mubr.msk.bf16.mxu0 %vm7239_vm0, %v7238_v1  ;;  %v3002_v63 = vrot.slane %v7796_v62, 2 }
  0xb9   : > { %v3003_v4 = vsel %vm2489_vm4, %v3000_v37, %v3002_v63  ;;  %v3022_v37 = vrot.slane %v7923_v49, 2 }
  0xbc   : > { %5766 = vmatmul.mubr.msk.bf16.gmra.mrb[80].mxu1 %vm579_vm3, %v572_v9  ;;  %v3004_v9 = vrot.slane %v7809_v54, 2 }
  0xbd   : > { %5771 = vmatprep.mubr.msk.bf16.mxu1 %vm7239_vm0, %v7238_v1 }
  0xbe   : > { %6152 = vmatmul.mubr.msk.bf16.gmra.mrb[36].mxu0 %vm579_vm3, %v2510_v52  ;;  %v3005_v52 = vsel %vm2489_vm4, %v3002_v63, %v3004_v9  ;;  %v7937_v63 = vld [vmem:[%s7303_s28 + $0x78] sm:$0xff]  }
  0xbf   : > { %6155 = vmatprep.mubr.msk.bf16.mxu0 %vm7239_vm0, %v7238_v1 }
  0xc4   : > { %5772 = vmatmul.mubr.msk.bf16.vlgmr.msra.gmra.mrb[0].mxu1 %vm579_vm3, %v7307_v5  ;;  %v2514_v5 = vsel %vm2489_vm4, %v2511_v11, %v2513_v45  ;;  %v7821_v11 = vld [vmem:[%s7303_s28 + $0x30] sm:$0xff]   ;;  %v3008_v45 = vrot.slane %v7833_v16, 2 }
  0xc5   : > { %5775 = vmatprep.mubr.msk.bf16.mxu1 %vm7239_vm0, %v7238_v1  ;;  %5856 = vmatpush3.bf16.msra.mxu1 %v7143_v24  ;;  %v3006_v24 = vrot.slane %v7821_v11, 2 }
  0xc6   : > { %5941 = vmatprep.subr.bf16.mxu1 %v7238_v1  ;;  %6156 = vmatmul.mubr.msk.bf16.gmra.mrb[40].mxu0 %vm579_vm3, %v2512_v15 }
  0xc7   : > { %6159 = vmatprep.mubr.msk.bf16.mxu0 %vm7239_vm0, %v7238_v1  ;;  %v3007_v15 = vsel %vm2489_vm4, %v3004_v9, %v3006_v24 }
  0xcc   : > { %5776 = vmatmul.mubr.msk.bf16.gmra.mrb[4].mxu1 %vm579_vm3, %v7310_v6  ;;  %v7146_v6 = vld [vmem:[%s7303_s28 + $0x78] sm:$0xff]  }
  0xcd   : > { %5779 = vmatprep.mubr.msk.bf16.mxu1 %vm7239_vm0, %v7238_v1  ;;  %v2517_v2 = vrot.slane %v7146_v6, 2  ;;  %v7857_v6 = vld [vmem:[%s7303_s28 + $0x48] sm:$0xff]  }
  0xce   : > { %6160 = vmatmul.mubr.msk.bf16.gmra.mrb[44].mxu0 %vm579_vm3, %v2514_v5  ;;  %v3009_v5 = vsel %vm2489_vm4, %v3006_v24, %v3008_v45 }
  0xcf   : > { %6163 = vmatprep.mubr.msk.bf16.mxu0 %vm7239_vm0, %v7238_v1  ;;  %v2518_v27 = vsel %vm2489_vm4, %v2515_v18, %v2517_v2  ;;  %v3010_v18 = vrot.slane %v7845_v17, 2 }
  0xd4   : > { %5780 = vmatmul.mubr.msk.bf16.gmra.mrb[8].mxu1 %vm579_vm3, %v7326_v14  ;;  %v7147_v14 = vld [vmem:[%s7303_s28 + $0x80] sm:$0xff]  }
  0xd5   : > { %5783 = vmatprep.mubr.msk.bf16.mxu1 %vm7239_vm0, %v7238_v1  ;;  %v2519_v8 = vrot.slane %v7147_v14, 2  ;;  %v7869_v14 = vld [vmem:[%s7303_s28 + $0x50] sm:$0xff]  }
  0xd6   : > { %6164 = vmatmul.mubr.msk.bf16.gmra.mrb[48].mxu0 %vm579_vm3, %v2516_v23  ;;  %v3011_v23 = vsel %vm2489_vm4, %v3008_v45, %v3010_v18  ;;  %v7950_v45 = vld [vmem:[%s7303_s28 + $0x80] sm:$0xff]  }
  0xd7   : > { %6167 = vmatprep.mubr.msk.bf16.mxu0 %vm7239_vm0, %v7238_v1  ;;  %v2520_v28 = vsel %vm2489_vm4, %v2517_v2, %v2519_v8  ;;  %v3012_v2 = vrot.slane %v7857_v6, 2 }
  0xdc   : > { %5784 = vmatmul.mubr.msk.bf16.gmra.mrb[12].mxu1 %vm579_vm3, %v7353_v41  ;;  %v7148_v41 = vld [vmem:[%s7303_s28 + $0x88] sm:$0xff]  }
  0xdd   : > { %5787 = vmatprep.mubr.msk.bf16.mxu1 %vm7239_vm0, %v7238_v1  ;;  %v2521_v29 = vrot.slane %v7148_v41, 2  ;;  %v7881_v41 = vld [vmem:[%s7303_s28 + $0x58] sm:$0xff]  }
  0xde   : > { %6168 = vmatmul.mubr.msk.bf16.gmra.mrb[52].mxu0 %vm579_vm3, %v2518_v27  ;;  %v3013_v27 = vsel %vm2489_vm4, %v3010_v18, %v3012_v2 }
  0xdf   : > { %6171 = vmatprep.mubr.msk.bf16.mxu0 %vm7239_vm0, %v7238_v1  ;;  %v2522_v30 = vsel %vm2489_vm4, %v2519_v8, %v2521_v29  ;;  %v3014_v8 = vrot.slane %v7869_v14, 2 }
  0xe4   : > { %5788 = vmatmul.mubr.msk.bf16.gmra.mrb[16].mxu1 %vm579_vm3, %v7374_v55  ;;  %v7149_v55 = vld [vmem:[%s7303_s28 + $0x90] sm:$0xff]  }
  0xe5   : > { %5791 = vmatprep.mubr.msk.bf16.mxu1 %vm7239_vm0, %v7238_v1  ;;  %v2523_v31 = vrot.slane %v7149_v55, 2  ;;  %v7893_v55 = vld [vmem:[%s7303_s28 + $0x60] sm:$0xff]  }
  0xe6   : > { %6172 = vmatmul.mubr.msk.bf16.gmra.mrb[56].mxu0 %vm579_vm3, %v2520_v28  ;;  %v3015_v28 = vsel %vm2489_vm4, %v3012_v2, %v3014_v8 }
  0xe7   : > { %6175 = vmatprep.mubr.msk.bf16.mxu0 %vm7239_vm0, %v7238_v1  ;;  %v2524_v21 = vsel %vm2489_vm4, %v2521_v29, %v2523_v31  ;;  %v3016_v29 = vrot.slane %v7881_v41, 2 }
  0xec   : > { %5792 = vmatmul.mubr.msk.bf16.gmra.mrb[20].mxu1 %vm579_vm3, %v7392_v7  ;;  %v7150_v7 = vld [vmem:[%s7303_s28 + $0x98] sm:$0xff]  }
  0xed   : > { %5795 = vmatprep.mubr.msk.bf16.mxu1 %vm7239_vm0, %v7238_v1  ;;  %v2525_v35 = vrot.slane %v7150_v7, 2  ;;  %v7183_v7 = vld [vmem:[%s7303_s28 + $0x4] sm:$0xf] }
  0xee   : > { %6176 = vmatmul.mubr.msk.bf16.gmra.mrb[60].mxu0 %vm579_vm3, %v2522_v30  ;;  %v3017_v30 = vsel %vm2489_vm4, %v3014_v8, %v3016_v29  ;;  %v7963_v8 = vld [vmem:[%s7303_s28 + $0x88] sm:$0xff]  }
  0xef   : > { %6179 = vmatprep.mubr.msk.bf16.mxu0 %vm7239_vm0, %v7238_v1  ;;  %v2526_v36 = vsel %vm2489_vm4, %v2523_v31, %v2525_v35  ;;  %v1093_v31 = vld [vmem:[%s7303_s28] sm:$0xe] }
  0xf4   : > { %5796 = vmatmul.mubr.msk.bf16.gmra.mrb[24].mxu1 %vm579_vm3, %v7410_v25  ;;  %v7151_v25 = vld [vmem:[%s7303_s28 + $0xa0] sm:$0xff]  }
  0xf5   : > { %5799 = vmatprep.mubr.msk.bf16.mxu1 %vm7239_vm0, %v7238_v1  ;;  %v2527_v38 = vrot.slane %v7151_v25, 2  ;;  %v7907_v25 = vld [vmem:[%s7303_s28 + $0x68] sm:$0xff]  }
  0xf6   : > { %6180 = vmatmul.mubr.msk.bf16.gmra.mrb[64].mxu0 %vm579_vm3, %v2524_v21  ;;  %v3018_v21 = vrot.slane %v7893_v55, 2 }
  0xf7   : > { %6183 = vmatprep.mubr.msk.bf16.mxu0 %vm7239_vm0, %v7238_v1  ;;  %v2530_v44 = vsel %vm2489_vm4, %v2527_v38, %v2529_v43  ;;  %v3020_v43 = vrot.slane %v7907_v25, 2 }
  0xf9   : > { %v3021_v22 = vsel %vm2489_vm4, %v3018_v21, %v3020_v43 }
  0xfc   : > { %5800 = vmatmul.mubr.msk.bf16.gmra.mrb[28].mxu1 %vm579_vm3, %v7421_v32  ;;  %v2528_v32 = vsel %vm2489_vm4, %v2525_v35, %v2527_v38  ;;  %v5059_v35 = vcombine.low %v1093_v31, %v7183_v7  ;;  %v7976_v7 = vld [vmem:[%s7303_s28 + $0x90] sm:$0xff]  }
  0xfd   : > { %5803 = vmatprep.mubr.msk.bf16.mxu1 %vm7239_vm0, %v7238_v1 }
  0xfe   : > { %6184 = vmatmul.mubr.msk.bf16.gmra.mrb[68].mxu0 %vm579_vm3, %v2526_v36  ;;  %v3019_v36 = vsel %vm2489_vm4, %v3016_v29, %v3018_v21  ;;  %v1101_v38 = vrot.slane %v5059_v35, 1  ;;  %v7189_v35 = vld [vmem:[%s7303_s28 + $0x30] sm:$0xff]  }
  0xff   : > { %6187 = vmatprep.mubr.msk.bf16.mxu0 %vm7239_vm0, %v7238_v1 }
 0x104   : > { %5804 = vmatmul.mubr.msk.bf16.gmra.mrb[32].mxu1 %vm579_vm3, %v7431_v40 }
 0x105   : > { %5807 = vmatprep.mubr.msk.bf16.mxu1 %vm7239_vm0, %v7238_v1 }
 0x106   : > { %6188 = vmatmul.mubr.msk.bf16.gmra.mrb[72].mxu0 %vm579_vm3, %v2528_v32  ;;  %v7184_v32 = vld [vmem:[%s7303_s28 + $0x8] sm:$0xff]  }
 0x107   : > { %6191 = vmatprep.mubr.msk.bf16.mxu0 %vm7239_vm0, %v7238_v1  ;;  %v1102_v39 = vrot.slane %v7184_v32, 1 }
 0x10c   : > { %5808 = vmatmul.mubr.msk.bf16.gmra.mrb[36].mxu1 %vm579_vm3, %v7447_v51 }
 0x10d   : > { %5811 = vmatprep.mubr.msk.bf16.mxu1 %vm7239_vm0, %v7238_v1 }
 0x10e   : > { %6192 = vmatmul.mubr.msk.bf16.gmra.mrb[76].mxu0 %vm579_vm3, %v2530_v44  ;;  %v1103_v44 = vsel %vm1100_vm5, %v1101_v38, %v1102_v39  ;;  %v3030_v38 = vrot.slane %v7976_v7, 2 }
 0x10f   : > { %6195 = vmatprep.mubr.msk.bf16.mxu0 %vm7239_vm0, %v7238_v1 }
 0x114   : > { %5812 = vmatmul.mubr.msk.bf16.gmra.mrb[40].mxu1 %vm579_vm3, %v7470_v20 }
 0x115   : > { %5815 = vmatprep.mubr.msk.bf16.mxu1 %vm7239_vm0, %v7238_v1 }
 0x116   : > { %6196 = vmatmul.mubr.msk.bf16.gmra.mrb[80].mxu0 %vm579_vm3, %v2532_v53  ;;  %v7185_v53 = vld [vmem:[%s7303_s28 + $0x10] sm:$0xff]  }
 0x117   : > { %6201 = vmatprep.mubr.msk.bf16.mxu0 %vm7239_vm0, %v7238_v1  ;;  %v1104_v42 = vrot.slane %v7185_v53, 1 }
 0x11c   : > { %5816 = vmatmul.mubr.msk.bf16.gmra.mrb[44].mxu1 %vm579_vm3, %v7500_v48 }
 0x11d   : > { %5819 = vmatprep.mubr.msk.bf16.mxu1 %vm7239_vm0, %v7238_v1 }
 0x11e   : > { %6202 = vmatmul.mubr.msk.bf16.vlgmr.msra.gmra.mrb[0].mxu0 %vm579_vm3, %v3001_v60  ;;  %v1105_v60 = vsel %vm1100_vm5, %v1102_v39, %v1104_v42 }
 0x11f   : > { %6286 = vmatpush3.bf16.msra.mxu0 %v7156_v61  ;;  %6205 = vmatprep.mubr.msk.bf16.mxu0 %vm7239_vm0, %v7238_v1  ;;  %v3023_v61 = vsel %vm2489_vm4, %v3020_v43, %v3022_v37  ;;  %v7989_v43 = vld [vmem:[%s7303_s28 + $0x98] sm:$0xff]  }
 0x120   : > { %6371 = vmatprep.subr.bf16.mxu0 %v7238_v1 }
 0x124   : > { %5820 = vmatmul.mubr.msk.bf16.gmra.mrb[48].mxu1 %vm579_vm3, %v7515_v0 }
 0x125   : > { %5823 = vmatprep.mubr.msk.bf16.mxu1 %vm7239_vm0, %v7238_v1 }
 0x126   : > { %6206 = vmatmul.mubr.msk.bf16.gmra.mrb[4].mxu0 %vm579_vm3, %v3003_v4  ;;  %v7186_v4 = vld [vmem:[%s7303_s28 + $0x18] sm:$0xff]  }
 0x127   : > { %6209 = vmatprep.mubr.msk.bf16.mxu0 %vm7239_vm0, %v7238_v1  ;;  %v1106_v9 = vrot.slane %v7186_v4, 1 }
 0x129   : > { %v1107_v24 = vsel %vm1100_vm5, %v1104_v42, %v1106_v9 }
 0x12c   : > { %5824 = vmatmul.mubr.msk.bf16.gmra.mrb[52].mxu1 %vm579_vm3, %v7533_v19 }
 0x12d   : > { %5827 = vmatprep.mubr.msk.bf16.mxu1 %vm7239_vm0, %v7238_v1 }
 0x12e   : > { %6210 = vmatmul.mubr.msk.bf16.gmra.mrb[8].mxu0 %vm579_vm3, %v3005_v52  ;;  %v3024_v52 = vrot.slane %v7937_v63, 2 }
 0x12f   : > { %6213 = vmatprep.mubr.msk.bf16.mxu0 %vm7239_vm0, %v7238_v1 }
 0x134   : > { %5828 = vmatmul.mubr.msk.bf16.gmra.mrb[56].mxu1 %vm579_vm3, %v7550_v34 }
 0x135   : > { %5831 = vmatprep.mubr.msk.bf16.mxu1 %vm7239_vm0, %v7238_v1 }
 0x136   : > { %6214 = vmatmul.mubr.msk.bf16.gmra.mrb[12].mxu0 %vm579_vm3, %v3007_v15  ;;  %v3025_v15 = vsel %vm2489_vm4, %v3022_v37, %v3024_v52  ;;  %v8002_v37 = vld [vmem:[%s7303_s28 + $0xa0] sm:$0xff]  }
 0x137   : > { %6217 = vmatprep.mubr.msk.bf16.mxu0 %vm7239_vm0, %v7238_v1 }
 0x13c   : > { %5832 = vmatmul.mubr.msk.bf16.gmra.mrb[60].mxu1 %vm579_vm3, %v7565_v47 }
 0x13d   : > { %5835 = vmatprep.mubr.msk.bf16.mxu1 %vm7239_vm0, %v7238_v1 }
 0x13e   : > { %6218 = vmatmul.mubr.msk.bf16.gmra.mrb[16].mxu0 %vm579_vm3, %v3009_v5  ;;  %v7187_v5 = vld [vmem:[%s7303_s28 + $0x20] sm:$0xff]  }
 0x13f   : > { %6221 = vmatprep.mubr.msk.bf16.mxu0 %vm7239_vm0, %v7238_v1  ;;  %v1108_v18 = vrot.slane %v7187_v5, 1 }
 0x141   : > { %v1109_v2 = vsel %vm1100_vm5, %v1106_v9, %v1108_v18 }
 0x144   : > { %5836 = vmatmul.mubr.msk.bf16.gmra.mrb[64].mxu1 %vm579_vm3, %v7579_v59 }
 0x145   : > { %5839 = vmatprep.mubr.msk.bf16.mxu1 %vm7239_vm0, %v7238_v1 }
 0x146   : > { %6222 = vmatmul.mubr.msk.bf16.gmra.mrb[20].mxu0 %vm579_vm3, %v3011_v23  ;;  %v3026_v23 = vrot.slane %v7950_v45, 2 }
 0x147   : > { %6225 = vmatprep.mubr.msk.bf16.mxu0 %vm7239_vm0, %v7238_v1 }
 0x14c   : > { %5840 = vmatmul.mubr.msk.bf16.gmra.mrb[68].mxu1 %vm579_vm3, %v7593_v10 }
 0x14d   : > { %5843 = vmatprep.mubr.msk.bf16.mxu1 %vm7239_vm0, %v7238_v1 }
 0x14e   : > { %6226 = vmatmul.mubr.msk.bf16.gmra.mrb[24].mxu0 %vm579_vm3, %v3013_v27  ;;  %v3027_v27 = vsel %vm2489_vm4, %v3024_v52, %v3026_v23  ;;  %v8015_v52 = vld [vmem:[%s7303_s28 + $0xa8] sm:$0xff]  }
 0x14f   : > { %6229 = vmatprep.mubr.msk.bf16.mxu0 %vm7239_vm0, %v7238_v1 }
 0x154   : > { %5844 = vmatmul.mubr.msk.bf16.gmra.mrb[72].mxu1 %vm579_vm3, %v7607_v26 }
 0x155   : > { %5847 = vmatprep.mubr.msk.bf16.mxu1 %vm7239_vm0, %v7238_v1 }
 0x156   : > { %6230 = vmatmul.mubr.msk.bf16.gmra.mrb[28].mxu0 %vm579_vm3, %v3015_v28  ;;  %v7188_v28 = vld [vmem:[%s7303_s28 + $0x28] sm:$0xff]  }
 0x157   : > { %6233 = vmatprep.mubr.msk.bf16.mxu0 %vm7239_vm0, %v7238_v1  ;;  %v1110_v29 = vrot.slane %v7188_v28, 1 }
 0x159   : > { %v1111_v31 = vsel %vm1100_vm5, %v1108_v18, %v1110_v29  ;;  %v8028_v18 = vld [vmem:[%s7303_s28 + $0xb0] sm:$0xff]  }
 0x15c   : > { %5848 = vmatmul.mubr.msk.bf16.gmra.mrb[76].mxu1 %vm579_vm3, %v7621_v13 }
 0x15d   : > { %5851 = vmatprep.mubr.msk.bf16.mxu1 %vm7239_vm0, %v7238_v1 }
 0x15e   : > { %6234 = vmatmul.mubr.msk.bf16.gmra.mrb[32].mxu0 %vm579_vm3, %v3017_v30  ;;  %v3028_v30 = vrot.slane %v7963_v8, 2 }
 0x15f   : > { %6237 = vmatprep.mubr.msk.bf16.mxu0 %vm7239_vm0, %v7238_v1 }
 0x160   : > { %v3029_v21 = vsel %vm2489_vm4, %v3026_v23, %v3028_v30  ;;  %v3031_v39 = vsel %vm2489_vm4, %v3028_v30, %v3030_v38  ;;  %v3038_v23 = vrot.slane %v8028_v18, 2  ;;  %v3363_v30 = vshrl.u32 %v7777_v56, 16 }
 0x164   : > { %5852 = vmatmul.mubr.msk.bf16.gmra.mrb[80].mxu1 %vm579_vm3, %v7635_v46 }
 0x165   : > { %5857 = vmatprep.mubr.msk.bf16.mxu1 %vm7239_vm0, %v7238_v1 }
 0x166   : > { %6238 = vmatmul.mubr.msk.bf16.gmra.mrb[36].mxu0 %vm579_vm3, %v3019_v36  ;;  %v1112_v36 = vrot.slane %v7189_v35, 1  ;;  %v3374_v35 = vshll.u32 %v7780_v57, 16 }
 0x167   : > { %6241 = vmatprep.mubr.msk.bf16.mxu0 %vm7239_vm0, %v7238_v1 }
 0x168   : > { %v1113_v32 = vsel %vm1100_vm5, %v1110_v29, %v1112_v36  ;;  %v1122_v29 = vrot.slane %v7500_v48, 1  ;;  %v3365_v48 = vrot.slane %v3363_v30, 2 }
 0x16c   : > { %5858 = vmatmul.mubr.msk.bf16.vlgmr.msra.gmra.mrb[0].mxu1 %vm579_vm3, %v1103_v44  ;;  %v7190_v44 = vld [vmem:[%s7303_s28 + $0x38] sm:$0xff]  }
 0x16d   : > { %5861 = vmatprep.mubr.msk.bf16.mxu1 %vm7239_vm0, %v7238_v1  ;;  %5942 = vmatpush3.bf16.msra.mxu1 %v7168_v33  ;;  %v1114_v33 = vrot.slane %v7190_v44, 1  ;;  %v3376_v44 = vrot.slane %v3374_v35, 3 }
 0x16e   : > { %6457 = vmatprep.subr.bf16.mxu1 %v7238_v1  ;;  %6242 = vmatmul.mubr.msk.bf16.gmra.mrb[40].mxu0 %vm579_vm3, %v3021_v22  ;;  %v3032_v22 = vrot.slane %v7989_v43, 2 }
 0x16f   : > { %6245 = vmatprep.mubr.msk.bf16.mxu0 %vm7239_vm0, %v7238_v1  ;;  %v1115_v53 = vsel %vm1100_vm5, %v1112_v36, %v1114_v33 }
 0x170   : > { %v3033_v42 = vsel %vm2489_vm4, %v3030_v38, %v3032_v22 }
 0x174   : > { %5862 = vmatmul.mubr.msk.bf16.gmra.mrb[4].mxu1 %vm579_vm3, %v1105_v60  ;;  %v1116_v60 = vrot.slane %v7431_v40, 1  ;;  %v1118_v40 = vrot.slane %v7447_v51, 1  ;;  %v1120_v51 = vrot.slane %v7470_v20, 1 }
 0x175   : > { %5865 = vmatprep.mubr.msk.bf16.mxu1 %vm7239_vm0, %v7238_v1 }
 0x176   : > { %6246 = vmatmul.mubr.msk.bf16.gmra.mrb[44].mxu0 %vm579_vm3, %v3023_v61  ;;  %v3034_v61 = vrot.slane %v8002_v37, 2  ;;  %v1117_v4 = vsel %vm1100_vm5, %v1114_v33, %v1116_v60  ;;  %v1123_v36 = vsel %vm1100_vm5, %v1120_v51, %v1122_v29  ;;  %v1124_v33 = vrot.slane %v7515_v0, 1  ;;  %v7179_v0 = vld [vmem:[%s8769_s1 + $0x40] sm:$0xff]  }
 0x177   : > { %6249 = vmatprep.mubr.msk.bf16.mxu0 %vm7239_vm0, %v7238_v1 }
 0x178   : > { %v3035_v9 = vsel %vm2489_vm4, %v3032_v22, %v3034_v61 }
 0x17c   : > { %5866 = vmatmul.mubr.msk.bf16.gmra.mrb[8].mxu1 %vm579_vm3, %v1107_v24  ;;  %v3036_v24 = vrot.slane %v8015_v52, 2 }
 0x17d   : > { %5869 = vmatprep.mubr.msk.bf16.mxu1 %vm7239_vm0, %v7238_v1 }
 0x17e   : > { %6250 = vmatmul.mubr.msk.bf16.gmra.mrb[48].mxu0 %vm579_vm3, %v3025_v15  ;;  %v1119_v15 = vsel %vm1100_vm5, %v1116_v60, %v1118_v40  ;;  %v3037_v5 = vsel %vm2489_vm4, %v3034_v61, %v3036_v24  ;;  %v3039_v28 = vsel %vm2489_vm4, %v3036_v24, %v3038_v23  ;;  %v1125_v60 = vsel %vm1100_vm5, %v1122_v29, %v1124_v33 }
 0x17f   : > { %6253 = vmatprep.mubr.msk.bf16.mxu0 %vm7239_vm0, %v7238_v1  ;;  %v3398_v29 = vshrl.u32 %v7821_v11, 16 }
 0x184   : > { %5870 = vmatmul.mubr.msk.bf16.gmra.mrb[12].mxu1 %vm579_vm3, %v1109_v2  ;;  %v1121_v2 = vsel %vm1100_vm5, %v1118_v40, %v1120_v51  ;;  %v1126_v40 = vrot.slane %v7533_v19, 1  ;;  %v1128_v19 = vrot.slane %v7550_v34, 1  ;;  %v1130_v34 = vrot.slane %v7565_v47, 1 }
 0x185   : > { %5873 = vmatprep.mubr.msk.bf16.mxu1 %vm7239_vm0, %v7238_v1  ;;  %v1132_v47 = vrot.slane %v7579_v59, 1  ;;  %v1134_v59 = vrot.slane %v7593_v10, 1  ;;  %v1136_v10 = vrot.slane %v7607_v26, 1  ;;  %v1138_v26 = vrot.slane %v7621_v13, 1 }
 0x186   : > { %6254 = vmatmul.mubr.msk.bf16.gmra.mrb[52].mxu0 %vm579_vm3, %v3027_v27  ;;  %v7178_v27 = vld [vmem:[%s7303_s28 + $0xb8] ss:$0 sps:$4 sm:$0x33]   ;;  %v1127_v51 = vsel %vm1100_vm5, %v1124_v33, %v1126_v40  ;;  %v1129_v30 = vsel %vm1100_vm5, %v1126_v40, %v1128_v19  ;;  %v1140_v13 = vrot.slane %v7635_v46, 1  ;;  %v1142_v46 = vrot.slane %v7649_v58, 1 }
 0x187   : > { %6257 = vmatprep.mubr.msk.bf16.mxu0 %vm7239_vm0, %v7238_v1  ;;  %v3040_v20 = vrot.slane %v7178_v27, 2  ;;  %v1610_v58 = vrot.slane %v7320_v12, 1 }
 0x189   : > { %v3041_v38 = vsel %vm2489_vm4, %v3038_v23, %v3040_v20  ;;  %v3401_v20 = vshll.u32 %v7821_v11, 16  ;;  %v3407_v11 = vshrl.u32 %v7833_v16, 16 }
 0x18b   : > { %v3403_v35 = vrot.slane %v3401_v20, 3 }
 0x18c   : > { %5874 = vmatmul.mubr.msk.bf16.gmra.mrb[16].mxu1 %vm579_vm3, %v1111_v31  ;;  %v3366_v31 = vshll.u32 %v7777_v56, 16 }
 0x18d   : > { %5877 = vmatprep.mubr.msk.bf16.mxu1 %vm7239_vm0, %v7238_v1 }
 0x18e   : > { %6258 = vmatmul.mubr.msk.bf16.gmra.mrb[56].mxu0 %vm579_vm3, %v3029_v21  ;;  %v3371_v21 = vshrl.u32 %v7780_v57, 16 }
 0x18f   : > { %6261 = vmatprep.mubr.msk.bf16.mxu0 %vm7239_vm0, %v7238_v1 }
 0x194   : > { %5878 = vmatmul.mubr.msk.bf16.gmra.mrb[20].mxu1 %vm579_vm3, %v1113_v32  ;;  %v3368_v32 = vrot.slane %v3366_v31, 3 }
 0x195   : > { %5881 = vmatprep.mubr.msk.bf16.mxu1 %vm7239_vm0, %v7238_v1 }
 0x196   : > { %6262 = vmatmul.mubr.msk.bf16.gmra.mrb[60].mxu0 %vm579_vm3, %v3031_v39  ;;  %v3373_v39 = vrot.slane %v3371_v21, 2  ;;  %v3369_v56 = vor.u32 %v3368_v32, %v3365_v48  ;;  %v3400_v21 = vrot.slane %v3398_v29, 2  ;;  %v1131_v48 = vsel %vm1100_vm5, %v1128_v19, %v1130_v34 }
 0x197   : > { %6265 = vmatprep.mubr.msk.bf16.mxu0 %vm7239_vm0, %v7238_v1  ;;  %v1139_v29 = vsel %vm1100_vm5, %v1136_v10, %v1138_v26 }
 0x198   : > { %v3377_v22 = vor.u32 %v3376_v44, %v3373_v39  ;;  %v3409_v39 = vrot.slane %v3407_v11, 2 }
 0x19a   : > { %v3378_v61 = vsel %vm3361_vm6, %v3369_v56, %v3377_v22  ;;  %v3419_v56 = vshll.u32 %v7845_v17, 16 }
 0x19c   : > { %5882 = vmatmul.mubr.msk.bf16.gmra.mrb[24].mxu1 %vm579_vm3, %v1115_v53  ;;  %v3380_v53 = vshrl.u32 %v7796_v62, 16 }
 0x19d   : > { %5885 = vmatprep.mubr.msk.bf16.mxu1 %vm7239_vm0, %v7238_v1 }
 0x19e   : > { %6266 = vmatmul.mubr.msk.bf16.gmra.mrb[64].mxu0 %vm579_vm3, %v3033_v42  ;;  %v3383_v42 = vshll.u32 %v7796_v62, 16 }
 0x19f   : > { %6269 = vmatprep.mubr.msk.bf16.mxu0 %vm7239_vm0, %v7238_v1 }
 0x1a4   : > { %5886 = vmatmul.mubr.msk.bf16.gmra.mrb[28].mxu1 %vm579_vm3, %v1117_v4  ;;  %v3382_v4 = vrot.slane %v3380_v53, 2 }
 0x1a5   : > { %5889 = vmatprep.mubr.msk.bf16.mxu1 %vm7239_vm0, %v7238_v1 }
 0x1a6   : > { %6270 = vmatmul.mubr.msk.bf16.gmra.mrb[68].mxu0 %vm579_vm3, %v3035_v9  ;;  %v3385_v9 = vrot.slane %v3383_v42, 3 }
 0x1a7   : > { %6273 = vmatprep.mubr.msk.bf16.mxu0 %vm7239_vm0, %v7238_v1 }
 0x1a8   : > { %v3386_v24 = vor.u32 %v3385_v9, %v3382_v4  ;;  %v1135_v4 = vsel %vm1100_vm5, %v1132_v47, %v1134_v59 }
 0x1aa   : > { %v3387_v23 = vsel %vm3361_vm6, %v3377_v22, %v3386_v24  ;;  %v1133_v22 = vsel %vm1100_vm5, %v1130_v34, %v1132_v47  ;;  %v1141_v34 = vsel %vm1100_vm5, %v1138_v26, %v1140_v13 }
 0x1ac   : > { %5890 = vmatmul.mubr.msk.bf16.gmra.mrb[32].mxu1 %vm579_vm3, %v1119_v15  ;;  %v3389_v15 = vshrl.u32 %v7809_v54, 16 }
 0x1ad   : > { %5893 = vmatprep.mubr.msk.bf16.mxu1 %vm7239_vm0, %v7238_v1 }
 0x1ae   : > { %6274 = vmatmul.mubr.msk.bf16.gmra.mrb[72].mxu0 %vm579_vm3, %v3037_v5  ;;  %v3392_v5 = vshll.u32 %v7809_v54, 16 }
 0x1af   : > { %6277 = vmatprep.mubr.msk.bf16.mxu0 %vm7239_vm0, %v7238_v1 }
 0x1b0   : > { %v3394_v27 = vrot.slane %v3392_v5, 3  ;;  %v3437_v5 = vshll.u32 %v7869_v14, 16 }
 0x1b4   : > { %5894 = vmatmul.mubr.msk.bf16.gmra.mrb[36].mxu1 %vm579_vm3, %v1121_v2  ;;  %v3391_v2 = vrot.slane %v3389_v15, 2 }
 0x1b5   : > { %5897 = vmatprep.mubr.msk.bf16.mxu1 %vm7239_vm0, %v7238_v1 }
 0x1b6   : > { %6278 = vmatmul.mubr.msk.bf16.gmra.mrb[76].mxu0 %vm579_vm3, %v3039_v28  ;;  %v3395_v28 = vor.u32 %v3394_v27, %v3391_v2  ;;  %v3439_v27 = vrot.slane %v3437_v5, 3 }
 0x1b7   : > { %6281 = vmatprep.mubr.msk.bf16.mxu0 %vm7239_vm0, %v7238_v1 }
 0x1b8   : > { %v3396_v31 = vsel %vm3361_vm6, %v3386_v24, %v3395_v28 }
 0x1bc   : > { %5898 = vmatmul.mubr.msk.bf16.gmra.mrb[40].mxu1 %vm579_vm3, %v1123_v36  ;;  %v3404_v36 = vor.u32 %v3403_v35, %v3400_v21  ;;  %v3455_v35 = vshll.u32 %v7893_v55, 16 }
 0x1bd   : > { %5901 = vmatprep.mubr.msk.bf16.mxu1 %vm7239_vm0, %v7238_v1 }
 0x1be   : > { %6282 = vmatmul.mubr.msk.bf16.gmra.mrb[80].mxu0 %vm579_vm3, %v3041_v38  ;;  %v3410_v38 = vshll.u32 %v7833_v16, 16  ;;  %v3405_v32 = vsel %vm3361_vm6, %v3395_v28, %v3404_v36  ;;  %v3416_v16 = vshrl.u32 %v7845_v17, 16  ;;  %v3425_v17 = vshrl.u32 %v7857_v6, 16 }
 0x1bf   : > { %6287 = vmatprep.mubr.msk.bf16.mxu0 %vm7239_vm0, %v7238_v1  ;;  %v3446_v28 = vshll.u32 %v7881_v41, 16 }
 0x1c0   : > { %v3412_v44 = vrot.slane %v3410_v38, 3  ;;  %v3418_v42 = vrot.slane %v3416_v16, 2  ;;  %v3427_v40 = vrot.slane %v3425_v17, 2  ;;  %v3457_v38 = vrot.slane %v3455_v35, 3  ;;  %v7191_v16 = vld [vmem:[%s7303_s28 + $0x10] sm:$0xff]  }
 0x1c2   : > { %v3413_v33 = vor.u32 %v3412_v44, %v3409_v39  ;;  %v1143_v39 = vsel %vm1100_vm5, %v1140_v13, %v1142_v46 }
 0x1c4   : > { %5902 = vmatmul.mubr.msk.bf16.gmra.mrb[44].mxu1 %vm579_vm3, %v1125_v60  ;;  %v3414_v53 = vsel %vm3361_vm6, %v3404_v36, %v3413_v33  ;;  %v3421_v60 = vrot.slane %v3419_v56, 3  ;;  %v1611_v56 = vrot.slane %v7191_v16, 1 }
 0x1c5   : > { %5905 = vmatprep.mubr.msk.bf16.mxu1 %vm7239_vm0, %v7238_v1 }
 0x1c6   : > { %6288 = vmatmul.mubr.msk.bf16.vlgmr.msra.gmra.mrb[0].mxu0 %vm579_vm3, %v3378_v61  ;;  %v3422_v61 = vor.u32 %v3421_v60, %v3418_v42  ;;  %v1612_v42 = vsel %vm1100_vm5, %v1610_v58, %v1611_v56 }
 0x1c7   : > { %6372 = vmatpush3.bf16.msra.mxu0 %v7179_v0  ;;  %6291 = vmatprep.mubr.msk.bf16.mxu0 %vm7239_vm0, %v7238_v1  ;;  %v3428_v0 = vshll.u32 %v7857_v6, 16  ;;  %v3434_v6 = vshrl.u32 %v7869_v14, 16  ;;  %v3443_v14 = vshrl.u32 %v7881_v41, 16  ;;  %v3452_v41 = vshrl.u32 %v7893_v55, 16 }
 0x1c8   : > { %v3423_v9 = vsel %vm3361_vm6, %v3413_v33, %v3422_v61 }
 0x1c9   : > { %v3430_v24 = vrot.slane %v3428_v0, 3  ;;  %v3436_v2 = vrot.slane %v3434_v6, 2  ;;  %v3454_v11 = vrot.slane %v3452_v41, 2  ;;  %v7193_v0 = vld [vmem:[%s8769_s1 + $0x20] sm:$0xff]   ;;  %v7196_v41 = vld [vmem:[%s7303_s28 + $0x30] sm:$0xff]  }
 0x1ca   : > { %v7194_v6 = vld [vmem:[%s7303_s28 + $0x20] sm:$0xff]   ;;  %v1619_v35 = vrot.slane %v7196_v41, 1  ;;  %v8304_v41 = vld [vmem:[%s7303_s28 + $0xb8] ss:$0 sps:$4 sm:$0x77]  }
 0x1cb   : > { %v3431_v15 = vor.u32 %v3430_v24, %v3427_v40  ;;  %v3440_v19 = vor.u32 %v3439_v27, %v3436_v2  ;;  %v3458_v55 = vor.u32 %v3457_v38, %v3454_v11  ;;  %v1615_v5 = vrot.slane %v7194_v6, 1 }
 0x1cc   : > { %5906 = vmatmul.mubr.msk.bf16.gmra.mrb[48].mxu1 %vm579_vm3, %v1127_v51  ;;  %v1137_v51 = vsel %vm1100_vm5, %v1134_v59, %v1136_v10 }
 0x1cd   : > { %5909 = vmatprep.mubr.msk.bf16.mxu1 %vm7239_vm0, %v7238_v1  ;;  %v3441_v20 = vsel %vm3361_vm6, %v3431_v15, %v3440_v19 }
 0x1ce   : > { %6292 = vmatmul.mubr.msk.bf16.gmra.mrb[4].mxu0 %vm579_vm3, %v3387_v23  ;;  %v3432_v23 = vsel %vm3361_vm6, %v3422_v61, %v3431_v15  ;;  %v7192_v61 = vld [vmem:[%s7303_s28 + $0x18] sm:$0xff]  }
 0x1cf   : > { %6295 = vmatprep.mubr.msk.bf16.mxu0 %vm7239_vm0, %v7238_v1  ;;  %v1613_v17 = vrot.slane %v7192_v61, 1  ;;  %v4235_v61 = vld [vmem:[%s8770_s2 + $0x8] sm:$0xff] }
 0x1d1   : > { %v1614_v40 = vsel %vm1100_vm5, %v1611_v56, %v1613_v17  ;;  %v1616_v2 = vsel %vm1100_vm5, %v1613_v17, %v1615_v5  ;;  %v7198_v56 = vld [vmem:[%s7303_s28 + $0x40] sm:$0xff]  }
 0x1d4   : > { %5910 = vmatmul.mubr.msk.bf16.gmra.mrb[52].mxu1 %vm579_vm3, %v1129_v30  ;;  %v3445_v30 = vrot.slane %v3443_v14, 2  ;;  %v7195_v14 = vld [vmem:[%s7303_s28 + $0x28] sm:$0xff]  }
 0x1d5   : > { %5913 = vmatprep.mubr.msk.bf16.mxu1 %vm7239_vm0, %v7238_v1 }
 0x1d6   : > { %6296 = vmatmul.mubr.msk.bf16.gmra.mrb[8].mxu0 %vm579_vm3, %v3396_v31  ;;  %v3448_v31 = vrot.slane %v3446_v28, 3  ;;  %v1617_v28 = vrot.slane %v7195_v14, 1 }
 0x1d7   : > { %6299 = vmatprep.mubr.msk.bf16.mxu0 %vm7239_vm0, %v7238_v1 }
 0x1d8   : > { %v3449_v21 = vor.u32 %v3448_v31, %v3445_v30  ;;  %v1618_v30 = vsel %vm1100_vm5, %v1615_v5, %v1617_v28  ;;  %v1620_v11 = vsel %vm1100_vm5, %v1617_v28, %v1619_v35  ;;  %v4239_v5 = vld [vmem:[%s8770_s2 + $0x28] sm:$0xff]  ;;  %v3542_v28 = vshrl.u32 %v8028_v18, 16 }
 0x1da   : > { %v3450_v36 = vsel %vm3361_vm6, %v3440_v19, %v3449_v21  ;;  %v3459_v44 = vsel %vm3361_vm6, %v3449_v21, %v3458_v55 }
 0x1dc   : > { %5914 = vmatmul.mubr.msk.bf16.gmra.mrb[56].mxu1 %vm579_vm3, %v1131_v48  ;;  %v3461_v48 = vshrl.u32 %v7907_v25, 16 }
 0x1dd   : > { %5917 = vmatprep.mubr.msk.bf16.mxu1 %vm7239_vm0, %v7238_v1 }
 0x1de   : > { %6300 = vmatmul.mubr.msk.bf16.gmra.mrb[12].mxu0 %vm579_vm3, %v3405_v32  ;;  %v3464_v32 = vshll.u32 %v7907_v25, 16  ;;  %v3463_v47 = vrot.slane %v3461_v48, 2  ;;  %v7197_v48 = vld [vmem:[%s7303_s28 + $0x38] sm:$0xff]  }
 0x1df   : > { %6303 = vmatprep.mubr.msk.bf16.mxu0 %vm7239_vm0, %v7238_v1 }
 0x1e0   : > { %v3466_v33 = vrot.slane %v3464_v32, 3  ;;  %v1621_v32 = vrot.slane %v7197_v48, 1  ;;  %v4248_v48 = vld [vmem:[%s8770_s2 + $0x70] sm:$0xff] }
 0x1e2   : > { %v3467_v25 = vor.u32 %v3466_v33, %v3463_v47  ;;  %v1622_v47 = vsel %vm1100_vm5, %v1619_v35, %v1621_v32 }
 0x1e4   : > { %5918 = vmatmul.mubr.msk.bf16.gmra.mrb[60].mxu1 %vm579_vm3, %v1133_v22  ;;  %v3470_v22 = vshrl.u32 %v7923_v49, 16  ;;  %v3468_v60 = vsel %vm3361_vm6, %v3458_v55, %v3467_v25 }
 0x1e5   : > { %5921 = vmatprep.mubr.msk.bf16.mxu1 %vm7239_vm0, %v7238_v1 }
 0x1e6   : > { %6304 = vmatmul.mubr.msk.bf16.gmra.mrb[16].mxu0 %vm579_vm3, %v3414_v53  ;;  %v3473_v53 = vshll.u32 %v7923_v49, 16  ;;  %v3472_v59 = vrot.slane %v3470_v22, 2  ;;  %v4234_v22 = vld [vmem:[%s8770_s2] sm:$0xff] }
 0x1e7   : > { %6307 = vmatprep.mubr.msk.bf16.mxu0 %vm7239_vm0, %v7238_v1 }
 0x1e8   : > { %v3475_v12 = vrot.slane %v3473_v53, 3  ;;  %v3524_v53 = vshrl.u32 %v8002_v37, 16 }
 0x1ea   : > { %v3476_v49 = vor.u32 %v3475_v12, %v3472_v59  ;;  %v4236_v59 = vld [vmem:[%s8770_s2 + $0x10] sm:$0xff] }
 0x1ec   : > { %5922 = vmatmul.mubr.msk.bf16.gmra.mrb[64].mxu1 %vm579_vm3, %v1135_v4  ;;  %v3479_v4 = vshrl.u32 %v7937_v63, 16  ;;  %v3477_v24 = vsel %vm3361_vm6, %v3467_v25, %v3476_v49  ;;  %v1623_v25 = vrot.slane %v7198_v56, 1 }
 0x1ed   : > { %5925 = vmatprep.mubr.msk.bf16.mxu1 %vm7239_vm0, %v7238_v1 }
 0x1ee   : > { %6308 = vmatmul.mubr.msk.bf16.gmra.mrb[20].mxu0 %vm579_vm3, %v3423_v9  ;;  %v3482_v9 = vshll.u32 %v7937_v63, 16  ;;  %v3481_v10 = vrot.slane %v3479_v4, 2  ;;  %v1624_v12 = vsel %vm1100_vm5, %v1621_v32, %v1623_v25 }
 0x1ef   : > { %6311 = vmatprep.mubr.msk.bf16.mxu0 %vm7239_vm0, %v7238_v1 }
 0x1f0   : > { %v3484_v15 = vrot.slane %v3482_v9, 3  ;;  %v4237_v9 = vld [vmem:[%s8770_s2 + $0x18] sm:$0xff] }
 0x1f2   : > { %v3485_v63 = vor.u32 %v3484_v15, %v3481_v10  ;;  %v3533_v10 = vshrl.u32 %v8015_v52, 16  ;;  %v3536_v15 = vshll.u32 %v8015_v52, 16  ;;  %v7200_v52 = vld [vmem:[%s7303_s28 + $0x50] sm:$0xff]  }
 0x1f4   : > { %5926 = vmatmul.mubr.msk.bf16.gmra.mrb[68].mxu1 %vm579_vm3, %v1137_v51  ;;  %v3488_v51 = vshrl.u32 %v7950_v45, 16  ;;  %v3486_v27 = vsel %vm3361_vm6, %v3476_v49, %v3485_v63  ;;  %v7199_v49 = vld [vmem:[%s7303_s28 + $0x48] sm:$0xff]  }
 0x1f5   : > { %5929 = vmatprep.mubr.msk.bf16.mxu1 %vm7239_vm0, %v7238_v1  ;;  %v1625_v4 = vrot.slane %v7199_v49, 1  ;;  %v4256_v49 = vld [vmem:[%s8770_s2 + $0xb0] sm:$0xff] }
 0x1f6   : > { %6312 = vmatmul.mubr.msk.bf16.gmra.mrb[24].mxu0 %vm579_vm3, %v3432_v23  ;;  %v3491_v23 = vshll.u32 %v7950_v45, 16  ;;  %v3490_v26 = vrot.slane %v3488_v51, 2 }
 0x1f7   : > { %6315 = vmatprep.mubr.msk.bf16.mxu0 %vm7239_vm0, %v7238_v1  ;;  %v1626_v6 = vsel %vm1100_vm5, %v1623_v25, %v1625_v4  ;;  %v3871_v25 = vld [vmem:[%s7303_s28 + $0x10] sm:$0x8] }
 0x1f8   : > { %v3493_v19 = vrot.slane %v3491_v23, 3  ;;  %v3535_v23 = vrot.slane %v3533_v10, 2  ;;  %v3882_v10 = vrot.slane %v7796_v62, 3  ;;  %v8405_v62 = vld [vmem:[%s7303_s28 + $0x78] sm:$0xff]  }
 0x1fa   : > { %v3494_v45 = vor.u32 %v3493_v19, %v3490_v26  ;;  %v4241_v26 = vld [vmem:[%s8770_s2 + $0x38] sm:$0xff]  ;;  %v4242_v19 = vld [vmem:[%s8770_s2 + $0x40] sm:$0xff] }
 0x1fc   : > { %5930 = vmatmul.mubr.msk.bf16.gmra.mrb[72].mxu1 %vm579_vm3, %v1139_v29  ;;  %v3497_v29 = vshrl.u32 %v7963_v8, 16  ;;  %v3495_v31 = vsel %vm3361_vm6, %v3485_v63, %v3494_v45  ;;  %v4240_v63 = vld [vmem:[%s8770_s2 + $0x30] sm:$0xff] }
 0x1fd   : > { %5933 = vmatprep.mubr.msk.bf16.mxu1 %vm7239_vm0, %v7238_v1 }
 0x1fe   : > { %6316 = vmatmul.mubr.msk.bf16.gmra.mrb[28].mxu0 %vm579_vm3, %v3441_v20  ;;  %v3500_v20 = vshll.u32 %v7963_v8, 16  ;;  %v3499_v13 = vrot.slane %v3497_v29, 2 }
 0x1ff   : > { %6319 = vmatprep.mubr.msk.bf16.mxu0 %vm7239_vm0, %v7238_v1 }
 0x200   : > { %v3502_v21 = vrot.slane %v3500_v20, 3  ;;  %v4243_v20 = vld [vmem:[%s8770_s2 + $0x48] sm:$0xff] }
 0x202   : > { %v3503_v8 = vor.u32 %v3502_v21, %v3499_v13  ;;  %v3544_v13 = vrot.slane %v3542_v28, 2 }
 0x204   : > { %5934 = vmatmul.mubr.msk.bf16.gmra.mrb[76].mxu1 %vm579_vm3, %v1141_v34  ;;  %v3506_v34 = vshrl.u32 %v7976_v7, 16  ;;  %v3504_v38 = vsel %vm3361_vm6, %v3494_v45, %v3503_v8  ;;  %v3545_v45 = vshll.u32 %v8028_v18, 16  ;;  %v7201_v18 = vld [vmem:[%s7303_s28 + $0x58] sm:$0xff]  }
 0x205   : > { %5937 = vmatprep.mubr.msk.bf16.mxu1 %vm7239_vm0, %v7238_v1  ;;  %v1629_v35 = vrot.slane %v7201_v18, 1 }
 0x206   : > { %6320 = vmatmul.mubr.msk.bf16.gmra.mrb[32].mxu0 %vm579_vm3, %v3450_v36  ;;  %v3509_v36 = vshll.u32 %v7976_v7, 16  ;;  %v3508_v46 = vrot.slane %v3506_v34, 2  ;;  %v3547_v21 = vrot.slane %v3545_v45, 3  ;;  %v4246_v34 = vld [vmem:[%s8770_s2 + $0x60] sm:$0xff]  ;;  %v4265_v45 = vld [vmem:[%s8770_s2 + $0xf8] sm:$0xff] }
 0x207   : > { %6323 = vmatprep.mubr.msk.bf16.mxu0 %vm7239_vm0, %v7238_v1 }
 0x208   : > { %v3511_v55 = vrot.slane %v3509_v36, 3  ;;  %v3548_v36 = vor.u32 %v3547_v21, %v3544_v13  ;;  %v4267_v13 = vld [vmem:[%s8770_s2 + $0x108] sm:$0xff]  ;;  %v4268_v21 = vld [vmem:[%s8770_s2 + $0x110] sm:$0xff] }
 0x20a   : > { %v3512_v7 = vor.u32 %v3511_v55, %v3508_v46  ;;  %v4247_v55 = vld [vmem:[%s8770_s2 + $0x68] sm:$0xff] }
 0x20c   : > { %5938 = vmatmul.mubr.msk.bf16.gmra.mrb[80].mxu1 %vm579_vm3, %v1143_v39  ;;  %v3515_v39 = vshrl.u32 %v7989_v43, 16  ;;  %v3513_v33 = vsel %vm3361_vm6, %v3503_v8, %v3512_v7  ;;  %v4245_v8 = vld [vmem:[%s8770_s2 + $0x58] sm:$0xff] }
 0x20d   : > { %5943 = vmatprep.mubr.msk.bf16.mxu1 %vm7239_vm0, %v7238_v1 }
 0x20e   : > { %6324 = vmatmul.mubr.msk.bf16.gmra.mrb[36].mxu0 %vm579_vm3, %v3459_v44  ;;  %v3518_v44 = vshll.u32 %v7989_v43, 16  ;;  %v3517_v58 = vrot.slane %v3515_v39, 2 }
 0x20f   : > { %6327 = vmatprep.mubr.msk.bf16.mxu0 %vm7239_vm0, %v7238_v1 }
 0x210   : > { %v3520_v16 = vrot.slane %v3518_v44, 3  ;;  %v7202_v44 = vld [vmem:[%s7303_s28 + $0x60] sm:$0xff]  }
 0x212   : > { %v3521_v43 = vor.u32 %v3520_v16, %v3517_v58  ;;  %v4250_v58 = vld [vmem:[%s8770_s2 + $0x80] sm:$0xff] }
 0x214   : > { %5944 = vmatmul.mubr.msk.bf16.vlgmr.msra.gmra.mrb[0].mxu1 %vm579_vm3, %v1612_v42  ;;  %v3527_v42 = vshll.u32 %v8002_v37, 16  ;;  %v3522_v17 = vsel %vm3361_vm6, %v3512_v7, %v3521_v43  ;;  %v3526_v37 = vrot.slane %v3524_v53, 2 }
 0x215   : > { %5947 = vmatprep.mubr.msk.bf16.mxu1 %vm7239_vm0, %v7238_v1  ;;  %6458 = vmatpush3.bf16.msra.mxu1 %v7193_v0 }
 0x216   : > { %6328 = vmatmul.mubr.msk.bf16.gmra.mrb[40].mxu0 %vm579_vm3, %v3468_v60  ;;  %v7240_v60 = vmov 0   ;;  %v3529_v0 = vrot.slane %v3527_v42, 3  ;;  %v5251_v42 = vcombine.low %v3871_v25, %v7771_v50  ;;  %v4254_v50 = vld [vmem:[%s8770_s2 + $0xa0] sm:$0xff] }
 0x217   : > { %6331 = vmatprep.mubr.msk.bf16.mxu0 %vm7239_vm0, %v7238_v1  ;;  %7101 = vset.pattern.permute.xlu0 %v7240_v60 }
 0x218   : > { %4278 = vperm.xlu0 %7101, %v4234_v22   ;;  %7102 = vset.pattern.permute.xlu1 %v7240_v60  ;;  %v4251_v22 = vld [vmem:[%s8770_s2 + $0x88] sm:$0xff] }
 0x219   : > { %4288 = vperm.xlu1 %7102, %v4236_v59   ;;  %v8355_v60 = vld [vmem:[%s7303_s28 + $0x68] sm:$0xff]  }
 0x21a   : > { %v1633_v59 = vrot.slane %v8355_v60, 1 }
 0x21c   : > { %5948 = vmatmul.mubr.msk.bf16.gmra.mrb[4].mxu1 %vm579_vm3, %v1614_v40  ;;  %4283 = vperm.xlu0 %7101, %v4235_v61   ;;  %v4238_v40 = vld [vmem:[%s8770_s2 + $0x20] sm:$0xff]  ;;  %v3879_v61 = vrot.slane %v5251_v42, 3 }
 0x21d   : > { %5951 = vmatprep.mubr.msk.bf16.mxu1 %vm7239_vm0, %v7238_v1  ;;  %4293 = vperm.xlu1 %7102, %v4237_v9  }
 0x21e   : > { %6332 = vmatmul.mubr.msk.bf16.gmra.mrb[44].mxu0 %vm579_vm3, %v3477_v24  ;;  %v3530_v24 = vor.u32 %v3529_v0, %v3526_v37  ;;  %v4255_v0 = vld [vmem:[%s8770_s2 + $0xa8] sm:$0xff] }
 0x21f   : > { %6335 = vmatprep.mubr.msk.bf16.mxu0 %vm7239_vm0, %v7238_v1 }
 0x220   : > { %4298 = vperm.xlu0 %7101, %v4238_v40   ;;  %v3531_v51 = vsel %vm3361_vm6, %v3521_v43, %v3530_v24  ;;  %v4252_v43 = vld [vmem:[%s8770_s2 + $0x90] sm:$0xff]  ;;  %v4257_v40 = vld [vmem:[%s8770_s2 + $0xb8] sm:$0xff] }
 0x221   : > { %4303 = vperm.xlu1 %7102, %v4239_v5   ;;  %v4260_v5 = vld [vmem:[%s8770_s2 + $0xd0] sm:$0xff] }
 0x224   : > { %5952 = vmatmul.mubr.msk.bf16.gmra.mrb[8].mxu1 %vm579_vm3, %v1616_v2  ;;  %v3538_v2 = vrot.slane %v3536_v15, 3  ;;  %4308 = vperm.xlu0 %7101, %v4240_v63  }
 0x225   : > { %5955 = vmatprep.mubr.msk.bf16.mxu1 %vm7239_vm0, %v7238_v1  ;;  %4313 = vperm.xlu1 %7102, %v4241_v26   ;;  %v4263_v26 = vld [vmem:[%s8770_s2 + $0xe8] sm:$0xff] }
 0x226   : > { %6336 = vmatmul.mubr.msk.bf16.gmra.mrb[48].mxu0 %vm579_vm3, %v3486_v27  ;;  %v1627_v27 = vrot.slane %v7200_v52, 1  ;;  %v3539_v14 = vor.u32 %v3538_v2, %v3535_v23  ;;  %v4261_v23 = vld [vmem:[%s8770_s2 + $0xd8] sm:$0xff]  ;;  %v4262_v2 = vld [vmem:[%s8770_s2 + $0xe0] sm:$0xff]  ;;  %v3884_v52 = vrot.slane %v7809_v54, 3 }
 0x227   : > { %6339 = vmatprep.mubr.msk.bf16.mxu0 %vm7239_vm0, %v7238_v1  ;;  %v8430_v54 = vld [vmem:[%s7303_s28 + $0x80] sm:$0xff]  }
 0x228   : > { %v1628_v29 = vsel %vm1100_vm5, %v1625_v4, %v1627_v27  ;;  %4318 = vperm.xlu0 %7101, %v4242_v19   ;;  %v1630_v46 = vsel %vm1100_vm5, %v1627_v27, %v1629_v35  ;;  %v3549_v32 = vsel %vm3361_vm6, %v3539_v14, %v3548_v36  ;;  %v4264_v19 = vld [vmem:[%s8770_s2 + $0xf0] sm:$0xff]  ;;  %v1639_v28 = vrot.slane %v8430_v54, 1 }
 0x229   : > { %4323 = vperm.xlu1 %7102, %v4243_v20   ;;  %v7207_v20 = vld [vmem:[%s7303_s28 + $0x30] sm:$0xff]  }
 0x22c   : > { %5956 = vmatmul.mubr.msk.bf16.gmra.mrb[12].mxu1 %vm579_vm3, %v1618_v30  ;;  %v4244_v30 = vld [vmem:[%s8770_s2 + $0x50] sm:$0xff] }
 0x22d   : > { %5959 = vmatprep.mubr.msk.bf16.mxu1 %vm7239_vm0, %v7238_v1  ;;  %4328 = vperm.xlu0 %7101, %v4244_v30   ;;  %v3886_v30 = vrot.slane %v7207_v20, 3 }
 0x22e   : > { %6340 = vmatmul.mubr.msk.bf16.gmra.mrb[52].mxu0 %vm579_vm3, %v3495_v31  ;;  %v3540_v31 = vsel %vm3361_vm6, %v3530_v24, %v3539_v14  ;;  %4333 = vperm.xlu1 %7102, %v4245_v8   ;;  %v4258_v24 = vld [vmem:[%s8770_s2 + $0xc0] sm:$0xff]  ;;  %v3885_v14 = vsel %vm3878_vm7, %v3882_v10, %v3884_v52 }
 0x22f   : > { %6343 = vmatprep.mubr.msk.bf16.mxu0 %vm7239_vm0, %v7238_v1  ;;  %v3887_v18 = vsel %vm3878_vm7, %v3884_v52, %v3886_v30 }
 0x231   : > { %4338 = vperm.xlu0 %7101, %v4246_v34   ;;  %v4269_v34 = vld [vmem:[%s8770_s2 + $0x118] sm:$0xff] }
 0x232   : > { %4343 = vperm.xlu1 %7102, %v4247_v55   ;;  %v4271_v55 = vld [vmem:[%s8770_s2 + $0x128] sm:$0xff] }
 0x234   : > { %5960 = vmatmul.mubr.msk.bf16.gmra.mrb[16].mxu1 %vm579_vm3, %v1620_v11  ;;  %v3551_v11 = vshrl.u32 %v8304_v41, 16 }
 0x235   : > { %5963 = vmatprep.mubr.msk.bf16.mxu1 %vm7239_vm0, %v7238_v1  ;;  %4348 = vperm.xlu0 %7101, %v4248_v48   ;;  %v4272_v48 = vld [vmem:[%s8770_s2 + $0x130] sm:$0xff] }
 0x236   : > { %6344 = vmatmul.mubr.msk.bf16.gmra.mrb[56].mxu0 %vm579_vm3, %v3504_v38  ;;  %v3554_v38 = vshll.u32 %v8304_v41, 16  ;;  %v3553_v7 = vrot.slane %v3551_v11, 2  ;;  %v7209_v11 = vld [vmem:[%s7303_s28 + $0x38] sm:$0xff]  }
 0x237   : > { %6347 = vmatprep.mubr.msk.bf16.mxu0 %vm7239_vm0, %v7238_v1 }
 0x238   : > { %v3556_v39 = vrot.slane %v3554_v38, 3  ;;  %v3888_v38 = vrot.slane %v7209_v11, 3 }
 0x239   : > { %4358 = vperm.xlu0 %7101, %v4250_v58  }
 0x23a   : > { %v3557_v16 = vor.u32 %v3556_v39, %v3553_v7  ;;  %v8480_v7 = vld [vmem:[%s7303_s28 + $0x90] sm:$0xff]  }
 0x23b   : > { %v1643_v39 = vrot.slane %v8480_v7, 1 }
 0x23c   : > { %5964 = vmatmul.mubr.msk.bf16.gmra.mrb[20].mxu1 %vm579_vm3, %v1622_v47  ;;  %v1631_v47 = vrot.slane %v7202_v44, 1  ;;  %v3558_v53 = vsel %vm3361_vm6, %v3548_v36, %v3557_v16  ;;  %v4270_v36 = vld [vmem:[%s8770_s2 + $0x120] sm:$0xff]  ;;  %v4273_v44 = vld [vmem:[%s8770_s2 + $0x138] sm:$0xff] }
 0x23d   : > { %5967 = vmatprep.mubr.msk.bf16.mxu1 %vm7239_vm0, %v7238_v1  ;;  %4368 = vperm.xlu0 %7101, %v4252_v43  }
 0x23e   : > { %6348 = vmatmul.mubr.msk.bf16.gmra.mrb[60].mxu0 %vm579_vm3, %v3513_v33  ;;  %v4249_v33 = vld [vmem:[%s8770_s2 + $0x78] sm:$0xff]  ;;  %v1632_v56 = vsel %vm1100_vm5, %v1629_v35, %v1631_v47  ;;  %v1634_v37 = vsel %vm1100_vm5, %v1631_v47, %v1633_v59  ;;  %v8455_v35 = vld [vmem:[%s7303_s28 + $0x88] sm:$0xff]   ;;  %v4274_v47 = vld [vmem:[%s8770_s2 + $0x140] sm:$0xff] }
 0x23f   : > { %6351 = vmatprep.mubr.msk.bf16.mxu0 %vm7239_vm0, %v7238_v1  ;;  %4353 = vperm.xlu1 %7102, %v4249_v33   ;;  %v1641_v8 = vrot.slane %v8455_v35, 1  ;;  %v7211_v33 = vld [vmem:[%s7303_s28 + $0x40] sm:$0xff]  }
 0x240   : > { %v3890_v58 = vrot.slane %v7211_v33, 3 }
 0x241   : > { %4378 = vperm.xlu0 %7101, %v4254_v50   ;;  %v1644_v16 = vsel %vm1100_vm5, %v1641_v8, %v1643_v39  ;;  %v8515_v50 = vld [vmem:[%s7303_s28 + $0xa0] sm:$0xff]  }
 0x242   : > { %v3891_v25 = vsel %vm3878_vm7, %v3888_v38, %v3890_v58 }
 0x243   : > { %4363 = vperm.xlu1 %7102, %v4251_v22   ;;  %v8502_v22 = vld [vmem:[%s7303_s28 + $0x98] sm:$0xff]  }
 0x244   : > { %5968 = vmatmul.mubr.msk.bf16.gmra.mrb[24].mxu1 %vm579_vm3, %v1624_v12  ;;  %v4253_v12 = vld [vmem:[%s8770_s2 + $0x98] sm:$0xff]  ;;  %v1645_v43 = vrot.slane %v8502_v22, 1 }
 0x245   : > { %5971 = vmatprep.mubr.msk.bf16.mxu1 %vm7239_vm0, %v7238_v1  ;;  %4388 = vperm.xlu0 %7101, %v4256_v49  }
 0x246   : > { %6352 = vmatmul.mubr.msk.bf16.gmra.mrb[64].mxu0 %vm579_vm3, %v3522_v17  ;;  %v3880_v17 = vrot.slane %v7780_v57, 3  ;;  %v8380_v57 = vld [vmem:[%s7303_s28 + $0x70] sm:$0xff]  }
 0x247   : > { %6355 = vmatprep.mubr.msk.bf16.mxu0 %vm7239_vm0, %v7238_v1  ;;  %4373 = vperm.xlu1 %7102, %v4253_v12   ;;  %v1635_v9 = vrot.slane %v8380_v57, 1 }
 0x248   : > { %v3881_v4 = vsel %vm3878_vm7, %v3879_v61, %v3880_v17  ;;  %v3883_v63 = vsel %vm3878_vm7, %v3880_v17, %v3882_v10  ;;  %v1647_v61 = vrot.slane %v8515_v50, 1  ;;  %v7215_v17 = vld [vmem:[%s7303_s28 + $0x50] sm:$0xff]  }
 0x249   : > { %v1636_v15 = vsel %vm1100_vm5, %v1633_v59, %v1635_v9  ;;  %4398 = vperm.xlu0 %7101, %v4258_v24   ;;  %v1646_v59 = vsel %vm1100_vm5, %v1643_v39, %v1645_v43 }
 0x24b   : > { %4383 = vperm.xlu1 %7102, %v4255_v0   ;;  %v1648_v0 = vsel %vm1100_vm5, %v1645_v43, %v1647_v61 }
 0x24c   : > { %5972 = vmatmul.mubr.msk.bf16.gmra.mrb[28].mxu1 %vm579_vm3, %v1626_v6  ;;  %v4259_v6 = vld [vmem:[%s8770_s2 + $0xc8] sm:$0xff] }
 0x24d   : > { %5975 = vmatprep.mubr.msk.bf16.mxu1 %vm7239_vm0, %v7238_v1  ;;  %4408 = vperm.xlu0 %7101, %v4260_v5  }
 0x24e   : > { %6356 = vmatmul.mubr.msk.bf16.gmra.mrb[68].mxu0 %vm579_vm3, %v3531_v51  ;;  %v1637_v51 = vrot.slane %v8405_v62, 1 }
 0x24f   : > { %6359 = vmatprep.mubr.msk.bf16.mxu0 %vm7239_vm0, %v7238_v1  ;;  %4393 = vperm.xlu1 %7102, %v4257_v40   ;;  %v7217_v40 = vld [vmem:[%s7303_s28 + $0x58] sm:$0xff]  }
 0x250   : > { %v1638_v27 = vsel %vm1100_vm5, %v1635_v9, %v1637_v51  ;;  %v3896_v24 = vrot.slane %v7217_v40, 3 }
 0x251   : > { %4418 = vperm.xlu0 %7101, %v4262_v2  }
 0x253   : > { %4403 = vperm.xlu1 %7102, %v4259_v6  }
 0x254   : > { %5976 = vmatmul.mubr.msk.bf16.gmra.mrb[32].mxu1 %vm579_vm3, %v1628_v29  ;;  %v4266_v29 = vld [vmem:[%s8770_s2 + $0x100] sm:$0xff] }
 0x255   : > { %5979 = vmatprep.mubr.msk.bf16.mxu1 %vm7239_vm0, %v7238_v1  ;;  %4428 = vperm.xlu0 %7101, %v4264_v19  }
 0x256   : > { %6360 = vmatmul.mubr.msk.bf16.gmra.mrb[72].mxu0 %vm579_vm3, %v3540_v31  ;;  %v1640_v31 = vsel %vm1100_vm5, %v1637_v51, %v1639_v28  ;;  %v2084_v51 = vshll.u32 %v8355_v60, 16 }
 0x257   : > { %6363 = vmatprep.mubr.msk.bf16.mxu0 %vm7239_vm0, %v7238_v1  ;;  %4413 = vperm.xlu1 %7102, %v4261_v23   ;;  %v7218_v23 = vld [vmem:[%s7303_s28 + $0x60] sm:$0xff]  }
 0x258   : > { %v3898_v2 = vrot.slane %v7218_v23, 3 }
 0x259   : > { %4438 = vperm.xlu0 %7101, %v4266_v29  }
 0x25a   : > { %v3899_v19 = vsel %vm3878_vm7, %v3896_v24, %v3898_v2 }
 0x25b   : > { %4423 = vperm.xlu1 %7102, %v4263_v26   ;;  %v2086_v26 = vrot.slane %v2084_v51, 2 }
 0x25c   : > { %5980 = vmatmul.mubr.msk.bf16.gmra.mrb[36].mxu1 %vm579_vm3, %v1630_v46  ;;  %v1642_v46 = vsel %vm1100_vm5, %v1639_v28, %v1641_v8  ;;  %v2093_v28 = vshll.u32 %v8380_v57, 16 }
 0x25d   : > { %5983 = vmatprep.mubr.msk.bf16.mxu1 %vm7239_vm0, %v7238_v1  ;;  %4448 = vperm.xlu0 %7101, %v4268_v21   ;;  %v2099_v21 = vshrl.u32 %v8405_v62, 16 }
 0x25e   : > { %6364 = vmatmul.mubr.msk.bf16.gmra.mrb[76].mxu0 %vm579_vm3, %v3549_v32  ;;  %v3889_v32 = vsel %vm3878_vm7, %v3886_v30, %v3888_v38 }
 0x25f   : > { %6367 = vmatprep.mubr.msk.bf16.mxu0 %vm7239_vm0, %v7238_v1  ;;  %4433 = vperm.xlu1 %7102, %v4265_v45   ;;  %v7219_v45 = vld [vmem:[%s7303_s28 + $0x68] sm:$0xff]  }
 0x260   : > { %v3900_v29 = vrot.slane %v7219_v45, 3 }
 0x261   : > { %4458 = vperm.xlu0 %7101, %v4270_v36   ;;  %v2101_v36 = vrot.slane %v2099_v21, 1 }
 0x263   : > { %4443 = vperm.xlu1 %7102, %v4267_v13   ;;  %v3901_v13 = vsel %vm3878_vm7, %v3898_v2, %v3900_v29  ;;  %v2144_v2 = vshrl.u32 %v8515_v50, 16 }
 0x264   : > { %5984 = vmatmul.mubr.msk.bf16.gmra.mrb[40].mxu1 %vm579_vm3, %v1632_v56  ;;  %v4275_v56 = vld [vmem:[%s8770_s2 + $0x148] sm:$0xff] }
 0x265   : > { %5987 = vmatprep.mubr.msk.bf16.mxu1 %vm7239_vm0, %v7238_v1  ;;  %4468 = vperm.xlu0 %7101, %v4272_v48   ;;  %v7221_v48 = vld [vmem:[%s7303_s28 + $0x78] sm:$0xff]   ;;  %v2146_v45 = vrot.slane %v2144_v2, 1 }
 0x266   : > { %6368 = vmatmul.mubr.msk.bf16.gmra.mrb[80].mxu0 %vm579_vm3, %v3558_v53  ;;  %v7213_v53 = vld [vmem:[%s7303_s28 + $0x48] sm:$0xff]  }
 0x267   : > { %6373 = vmatprep.mubr.msk.bf16.mxu0 %vm7239_vm0, %v7238_v1  ;;  %4453 = vperm.xlu1 %7102, %v4269_v34   ;;  %v3892_v42 = vrot.slane %v7213_v53, 3 }
 0x269   : > { %4478 = vperm.xlu0 %7101, %v4274_v47   ;;  %v3893_v12 = vsel %vm3878_vm7, %v3890_v58, %v3892_v42  ;;  %v2117_v58 = vshrl.u32 %v8455_v35, 16 }
 0x26b   : > { %4463 = vperm.xlu1 %7102, %v4271_v55   ;;  %v2111_v55 = vshll.u32 %v8430_v54, 16  ;;  %v2119_v53 = vrot.slane %v2117_v58, 1 }
 0x26c   : > { %5988 = vmatmul.mubr.msk.bf16.gmra.mrb[44].mxu1 %vm579_vm3, %v1634_v37  ;;  %v3894_v37 = vrot.slane %v7215_v17, 3  ;;  %v7223_v17 = vld [vmem:[%s7303_s28 + $0x88] sm:$0xff]  }
 0x26d   : > { %5991 = vmatprep.mubr.msk.bf16.mxu1 %vm7239_vm0, %v7238_v1  ;;  %v2113_v47 = vrot.slane %v2111_v55, 2 }
 0x26e   : > { %6374 = vmatmul.mubr.msk.bf16.vlgmr.msra.gmra.mrb[0].mxu0 %vm579_vm3, %v3881_v4  ;;  %v3895_v49 = vsel %vm3878_vm7, %v3892_v42, %v3894_v37  ;;  %v8528_v4 = vld [vmem:[%s7303_s28 + $0xa8] sm:$0xff]   ;;  %v3897_v6 = vsel %vm3878_vm7, %v3894_v37, %v3896_v24  ;;  %v3908_v37 = vrot.slane %v7223_v17, 3  ;;  %v2135_v24 = vshrl.u32 %v8502_v22, 16 }
 0x26f   : > { %6377 = vmatprep.mubr.msk.bf16.mxu0 %vm7239_vm0, %v7238_v1  ;;  %4473 = vperm.xlu1 %7102, %v4273_v44   ;;  %v1649_v9 = vrot.slane %v8528_v4, 1 }
 0x271   : > { %v1650_v10 = vsel %vm1100_vm5, %v1647_v61, %v1649_v9  ;;  %v2129_v61 = vshll.u32 %v8480_v7, 16 }
 0x273   : > { %4483 = vperm.xlu1 %7102, %v4275_v56   ;;  %v7222_v56 = vld [vmem:[%s7303_s28 + $0x80] sm:$0xff]  }
 0x274   : > { %5992 = vmatmul.mubr.msk.bf16.gmra.mrb[48].mxu1 %vm579_vm3, %v1636_v15  ;;  %v7182_v15 = vld [vmem:[%s7303_s28 + $0xb0] ss:$0 sps:$4 sm:$0x11]  }
 0x275   : > { %5995 = vmatprep.mubr.msk.bf16.mxu1 %vm7239_vm0, %v7238_v1  ;;  %v1651_v5 = vrot.slane %v7182_v15, 1  ;;  %v7224_v15 = vld [vmem:[%s7303_s28 + $0x90] sm:$0xff]  }
 0x276   : > { %6378 = vmatmul.mubr.msk.bf16.gmra.mrb[4].mxu0 %vm579_vm3, %v3883_v63  ;;  %v2081_v63 = vshrl.u32 %v8355_v60, 16 }
 0x277   : > { %6381 = vmatprep.mubr.msk.bf16.mxu0 %vm7239_vm0, %v7238_v1  ;;  %v1652_v52 = vsel %vm1100_vm5, %v1649_v9, %v1651_v5  ;;  %v2131_v9 = vrot.slane %v2129_v61, 2 }
 0x27c   : > { %5996 = vmatmul.mubr.msk.bf16.gmra.mrb[52].mxu1 %vm579_vm3, %v1638_v27  ;;  %v2083_v27 = vrot.slane %v2081_v63, 1  ;;  %v2137_v63 = vrot.slane %v2135_v24, 1 }
 0x27d   : > { %5999 = vmatprep.mubr.msk.bf16.mxu1 %vm7239_vm0, %v7238_v1 }
 0x27e   : > { %6382 = vmatmul.mubr.msk.bf16.gmra.mrb[8].mxu0 %vm579_vm3, %v3885_v14  ;;  %v2087_v60 = vor.u32 %v2086_v26, %v2083_v27  ;;  %v2090_v14 = vshrl.u32 %v8380_v57, 16 }
 0x27f   : > { %6385 = vmatprep.mubr.msk.bf16.mxu0 %vm7239_vm0, %v7238_v1 }
 0x280   : > { %v2088_v20 = vsel %vm1972_vm2, %v7520_v3, %v2087_v60  ;;  %v2092_v30 = vrot.slane %v2090_v14, 1  ;;  %v7220_v3 = vld [vmem:[%s7303_s28 + $0x70] sm:$0xff]  }
 0x281   : > { %v3902_v8 = vrot.slane %v7220_v3, 3 }
 0x283   : > { %v3903_v38 = vsel %vm3878_vm7, %v3900_v29, %v3902_v8 }
 0x284   : > { %6000 = vmatmul.mubr.msk.bf16.gmra.mrb[56].mxu1 %vm579_vm3, %v1640_v31  ;;  %v2095_v31 = vrot.slane %v2093_v28, 2 }
 0x285   : > { %6003 = vmatprep.mubr.msk.bf16.mxu1 %vm7239_vm0, %v7238_v1 }
 0x286   : > { %6386 = vmatmul.mubr.msk.bf16.gmra.mrb[12].mxu0 %vm579_vm3, %v3887_v18  ;;  %v2096_v57 = vor.u32 %v2095_v31, %v2092_v30  ;;  %v2102_v18 = vshll.u32 %v8405_v62, 16  ;;  %v2153_v31 = vshrl.u32 %v8528_v4, 16 }
 0x287   : > { %6389 = vmatprep.mubr.msk.bf16.mxu0 %vm7239_vm0, %v7238_v1 }
 0x288   : > { %v2097_v34 = vsel %vm1972_vm2, %v2087_v60, %v2096_v57  ;;  %v2104_v11 = vrot.slane %v2102_v18, 2  ;;  %v7226_v18 = vld [vmem:[%s7303_s28 + $0xa0] sm:$0xff]  }
 0x289   : > { %v3914_v3 = vrot.slane %v7226_v18, 3 }
 0x28a   : > { %v2105_v62 = vor.u32 %v2104_v11, %v2101_v36  ;;  %v2155_v36 = vrot.slane %v2153_v31, 1 }
 0x28c   : > { %6004 = vmatmul.mubr.msk.bf16.gmra.mrb[60].mxu1 %vm579_vm3, %v1642_v46  ;;  %v2108_v46 = vshrl.u32 %v8430_v54, 16  ;;  %v2106_v39 = vsel %vm1972_vm2, %v2096_v57, %v2105_v62 }
 0x28d   : > { %6007 = vmatprep.mubr.msk.bf16.mxu1 %vm7239_vm0, %v7238_v1 }
 0x28e   : > { %6390 = vmatmul.mubr.msk.bf16.gmra.mrb[16].mxu0 %vm579_vm3, %v3889_v32  ;;  %v3904_v32 = vrot.slane %v7221_v48, 3  ;;  %v2110_v44 = vrot.slane %v2108_v46, 1  ;;  %v7227_v46 = vld [vmem:[%s7303_s28 + $0xb0] ss:$0 sps:$4 sm:$0x33]  }
 0x28f   : > { %6393 = vmatprep.mubr.msk.bf16.mxu0 %vm7239_vm0, %v7238_v1  ;;  %v2162_v55 = vshrl.u32 %v7227_v46, 16  ;;  %v2165_v48 = vshll.u32 %v7227_v46, 16 }
 0x290   : > { %v3905_v33 = vsel %vm3878_vm7, %v3902_v8, %v3904_v32  ;;  %v2114_v54 = vor.u32 %v2113_v47, %v2110_v44  ;;  %v7228_v44 = vld [vmem:[%s7303_s28 + $0xa8] sm:$0xff]  }
 0x291   : > { %v3916_v47 = vrot.slane %v7228_v44, 3  ;;  %v2164_v58 = vrot.slane %v2162_v55, 1 }
 0x292   : > { %v2115_v43 = vsel %vm1972_vm2, %v2105_v62, %v2114_v54 }
 0x294   : > { %6008 = vmatmul.mubr.msk.bf16.gmra.mrb[64].mxu1 %vm579_vm3, %v1644_v16  ;;  %v2120_v16 = vshll.u32 %v8455_v35, 16 }
 0x295   : > { %6011 = vmatprep.mubr.msk.bf16.mxu1 %vm7239_vm0, %v7238_v1 }
 0x296   : > { %6394 = vmatmul.mubr.msk.bf16.gmra.mrb[20].mxu0 %vm579_vm3, %v3891_v25  ;;  %v3906_v25 = vrot.slane %v7222_v56, 3  ;;  %v2122_v42 = vrot.slane %v2120_v16, 2  ;;  %v2167_v16 = vrot.slane %v2165_v48, 2 }
 0x297   : > { %6397 = vmatprep.mubr.msk.bf16.mxu0 %vm7239_vm0, %v7238_v1  ;;  %v4279_v18 = vpop.permute.xlu0 %4278 }
 0x298   : > { %v2123_v35 = vor.u32 %v2122_v42, %v2119_v53  ;;  %v3909_v40 = vsel %vm3878_vm7, %v3906_v25, %v3908_v37 }
 0x29c   : > { %6012 = vmatmul.mubr.msk.bf16.gmra.mrb[68].mxu1 %vm579_vm3, %v1646_v59  ;;  %v3907_v59 = vsel %vm3878_vm7, %v3904_v32, %v3906_v25  ;;  %v3917_v25 = vsel %vm3878_vm7, %v3914_v3, %v3916_v47 }
 0x29d   : > { %6015 = vmatprep.mubr.msk.bf16.mxu1 %vm7239_vm0, %v7238_v1 }
 0x29e   : > { %6398 = vmatmul.mubr.msk.bf16.gmra.mrb[24].mxu0 %vm579_vm3, %v3893_v12  ;;  %v2126_v12 = vshrl.u32 %v8480_v7, 16 }
 0x29f   : > { %6401 = vmatprep.mubr.msk.bf16.mxu0 %vm7239_vm0, %v7238_v1 }
 0x2a4   : > { %6016 = vmatmul.mubr.msk.bf16.gmra.mrb[72].mxu1 %vm579_vm3, %v1648_v0  ;;  %v2124_v0 = vsel %vm1972_vm2, %v2114_v54, %v2123_v35 }
 0x2a5   : > { %6019 = vmatprep.mubr.msk.bf16.mxu1 %vm7239_vm0, %v7238_v1 }
 0x2a6   : > { %6402 = vmatmul.mubr.msk.bf16.gmra.mrb[28].mxu0 %vm579_vm3, %v3895_v49  ;;  %v2128_v49 = vrot.slane %v2126_v12, 1 }
 0x2a7   : > { %6405 = vmatprep.mubr.msk.bf16.mxu0 %vm7239_vm0, %v7238_v1 }
 0x2a8   : > { %v2132_v7 = vor.u32 %v2131_v9, %v2128_v49  ;;  %v3920_v9 = vrot.slane %v8304_v41, 3 }
 0x2aa   : > { %v2133_v5 = vsel %vm1972_vm2, %v2123_v35, %v2132_v7 }
 0x2ac   : > { %6020 = vmatmul.mubr.msk.bf16.gmra.mrb[76].mxu1 %vm579_vm3, %v1650_v10  ;;  %v2138_v10 = vshll.u32 %v8502_v22, 16 }
 0x2ad   : > { %6023 = vmatprep.mubr.msk.bf16.mxu1 %vm7239_vm0, %v7238_v1 }
 0x2ae   : > { %6406 = vmatmul.mubr.msk.bf16.gmra.mrb[32].mxu0 %vm579_vm3, %v3897_v6  ;;  %v3910_v6 = vrot.slane %v7224_v15, 3  ;;  %v2140_v51 = vrot.slane %v2138_v10, 2 }
 0x2af   : > { %6409 = vmatprep.mubr.msk.bf16.mxu0 %vm7239_vm0, %v7238_v1 }
 0x2b0   : > { %v3911_v23 = vsel %vm3878_vm7, %v3908_v37, %v3910_v6  ;;  %v2141_v22 = vor.u32 %v2140_v51, %v2137_v63 }
 0x2b2   : > { %v2142_v28 = vsel %vm1972_vm2, %v2132_v7, %v2141_v22 }
 0x2b4   : > { %6024 = vmatmul.mubr.msk.bf16.gmra.mrb[80].mxu1 %vm579_vm3, %v1652_v52  ;;  %v2147_v52 = vshll.u32 %v8515_v50, 16 }
 0x2b5   : > { %6073 = vmatprep.mubr.msk.bf16.mxu1 %vm7239_vm0, %v7238_v1 }
 0x2b6   : > { %6410 = vmatmul.mubr.msk.bf16.gmra.mrb[36].mxu0 %vm579_vm3, %v3899_v19  ;;  %v7225_v19 = vld [vmem:[%s7303_s28 + $0x98] sm:$0xff]   ;;  %v2149_v29 = vrot.slane %v2147_v52, 2 }
 0x2b7   : > { %6413 = vmatprep.mubr.msk.bf16.mxu0 %vm7239_vm0, %v7238_v1  ;;  %v3912_v60 = vrot.slane %v7225_v19, 3 }
 0x2b8   : > { %v2150_v30 = vor.u32 %v2149_v29, %v2146_v45 }
 0x2b9   : > { %v3913_v50 = vsel %vm3878_vm7, %v3910_v6, %v3912_v60 }
 0x2bc   : > { %6074 = vmatmul.mubr.msk.bf16.vlgmr.msra.gmra.mrb[44].mxu1 %vm579_vm3, %v2088_v20 }
 0x2bd   : > { %6077 = vmatprep.mubr.msk.bf16.mxu1 %vm7239_vm0, %v7238_v1 }
 0x2be   : > { %6414 = vmatmul.mubr.msk.bf16.gmra.mrb[40].mxu0 %vm579_vm3, %v3901_v13  ;;  %v2156_v13 = vshll.u32 %v8528_v4, 16  ;;  %v3915_v4 = vsel %vm3878_vm7, %v3912_v60, %v3914_v3 }
 0x2bf   : > { %6417 = vmatprep.mubr.msk.bf16.mxu0 %vm7239_vm0, %v7238_v1 }
 0x2c0   : > { %v2158_v11 = vrot.slane %v2156_v13, 2 }
 0x2c2   : > { %v2159_v62 = vor.u32 %v2158_v11, %v2155_v36 }
 0x2c4   : > { %6078 = vmatmul.mubr.msk.bf16.gmra.mrb[48].mxu1 %vm579_vm3, %v2097_v34  ;;  %v2151_v34 = vsel %vm1972_vm2, %v2141_v22, %v2150_v30  ;;  %v2160_v54 = vsel %vm1972_vm2, %v2150_v30, %v2159_v62 }
 0x2c5   : > { %6081 = vmatprep.mubr.msk.bf16.mxu1 %vm7239_vm0, %v7238_v1 }
 0x2c6   : > { %6418 = vmatmul.mubr.msk.bf16.gmra.mrb[44].mxu0 %vm579_vm3, %v3903_v38 }
 0x2c7   : > { %6421 = vmatprep.mubr.msk.bf16.mxu0 %vm7239_vm0, %v7238_v1 }
 0x2cc   : > { %6082 = vmatmul.mubr.msk.bf16.gmra.mrb[52].mxu1 %vm579_vm3, %v2106_v39 }
 0x2cd   : > { %6085 = vmatprep.mubr.msk.bf16.mxu1 %vm7239_vm0, %v7238_v1 }
 0x2ce   : > { %6422 = vmatmul.mubr.msk.bf16.gmra.mrb[48].mxu0 %vm579_vm3, %v3905_v33 }
 0x2cf   : > { %6425 = vmatprep.mubr.msk.bf16.mxu0 %vm7239_vm0, %v7238_v1 }
 0x2d4   : > { %6086 = vmatmul.mubr.msk.bf16.gmra.mrb[56].mxu1 %vm579_vm3, %v2115_v43  ;;  %v2168_v43 = vor.u32 %v2167_v16, %v2164_v58 }
 0x2d5   : > { %6089 = vmatprep.mubr.msk.bf16.mxu1 %vm7239_vm0, %v7238_v1 }
 0x2d6   : > { %6426 = vmatmul.mubr.msk.bf16.gmra.mrb[52].mxu0 %vm579_vm3, %v3907_v59  ;;  %v7229_v59 = vld [vmem:[%s7303_s28 + $0xb0] sm:$0xff]   ;;  %v2169_v61 = vsel %vm1972_vm2, %v2159_v62, %v2168_v43  ;;  %s231_s28 = smul.u32 42, %s7277_s19 }
 0x2d7   : > { %6429 = vmatprep.mubr.msk.bf16.mxu0 %vm7239_vm0, %v7238_v1  ;;  %v3918_v35 = vrot.slane %v7229_v59, 3 }
 0x2d8   : > { %p232_p4 = scmp.lt.s32.totalorder %s231_s28, 83 }
 0x2d9   : > { %v3919_v37 = vsel %vm3878_vm7, %v3916_v47, %v3918_v35  ;;  %v3921_v24 = vsel %vm3878_vm7, %v3918_v35, %v3920_v9 }
 0x2da   : > { %s8775_s28 = smov (!%p232_p4, %s231_s28), 83 }
 0x2db   : > { %s4988_s22 = sshll.u32 %s8775_s28, 2 }
 0x2dc   : > { %6090 = vmatmul.mubr.msk.bf16.gmra.mrb[60].mxu1 %vm579_vm3, %v2124_v0  ;;  %s8714_s25 = scalar_lea.vmem %s8771_s3, %s4988_s22 }
 0x2dd   : > { %6093 = vmatprep.mubr.msk.bf16.mxu1 %vm7239_vm0, %v7238_v1 }
 0x2de   : > { %6430 = vmatmul.mubr.msk.bf16.gmra.mrb[56].mxu0 %vm579_vm3, %v3909_v40 }
 0x2df   : > { %6433 = vmatprep.mubr.msk.bf16.mxu0 %vm7239_vm0, %v7238_v1 }
 0x2e4   : > { %6094 = vmatmul.mubr.msk.bf16.gmra.mrb[64].mxu1 %vm579_vm3, %v2133_v5 }
 0x2e5   : > { %6097 = vmatprep.mubr.msk.bf16.mxu1 %vm7239_vm0, %v7238_v1 }
 0x2e6   : > { %6434 = vmatmul.mubr.msk.bf16.gmra.mrb[60].mxu0 %vm579_vm3, %v3911_v23 }
 0x2e7   : > { %v8622_v27 = vpop.f32.mrb[0].mxu1  ;;  %6437 = vmatprep.mubr.msk.bf16.mxu0 %vm7239_vm0, %v7238_v1 }
 0x2e8   : > { %v5945_v26 = vpop.f32.mrb[1].mxu1 }
 0x2e9   : > { %v8627_v14 = vpop.f32.mrb[2].mxu1 }
 0x2ea   : > { %v5946_v20 = vpop.f32.mrb[3].mxu1 }
 0x2ec   : > { %6098 = vmatmul.mubr.msk.bf16.gmra.mrb[68].mxu1 %vm579_vm3, %v2142_v28 }
 0x2ed   : > { %6101 = vmatprep.mubr.msk.bf16.mxu1 %vm7239_vm0, %v7238_v1 }
 0x2ee   : > { %6438 = vmatmul.mubr.msk.bf16.gmra.mrb[64].mxu0 %vm579_vm3, %v3913_v50 }
 0x2ef   : > { %v8637_v57 = vpop.f32.mrb[4].mxu1  ;;  %6441 = vmatprep.mubr.msk.bf16.mxu0 %vm7239_vm0, %v7238_v1 }
 0x2f0   : > { %v5949_v21 = vpop.f32.mrb[5].mxu1 }
 0x2f1   : > { %v8642_v8 = vpop.f32.mrb[6].mxu1 }
 0x2f2   : > { %v5950_v38 = vpop.f32.mrb[7].mxu1 }
 0x2f3   : > { %v4284_v38 = vpop.permute.xlu0 %4283 }
 0x2f4   : > { %6102 = vmatmul.mubr.msk.bf16.gmra.mrb[72].mxu1 %vm579_vm3, %v2151_v34 }
 0x2f5   : > { %6105 = vmatprep.mubr.msk.bf16.mxu1 %vm7239_vm0, %v7238_v1 }
 0x2f6   : > { %6442 = vmatmul.mubr.msk.bf16.gmra.mrb[68].mxu0 %vm579_vm3, %v3915_v4 }
 0x2f7   : > { %v8651_v32 = vpop.f32.mrb[8].mxu1  ;;  %6445 = vmatprep.mubr.msk.bf16.mxu0 %vm7239_vm0, %v7238_v1 }
 0x2f8   : > { %v5953_v39 = vpop.f32.mrb[9].mxu1 }
 0x2f9   : > { %v8656_v33 = vpop.f32.mrb[10].mxu1  ;;  %v4289_v39 = vpop.permute.xlu1 %4288 }
 0x2fa   : > { %v5954_v56 = vpop.f32.mrb[11].mxu1 }
 0x2fc   : > { %6106 = vmatmul.mubr.msk.bf16.gmra.mrb[76].mxu1 %vm579_vm3, %v2160_v54 }
 0x2fd   : > { %6109 = vmatprep.mubr.msk.bf16.mxu1 %vm7239_vm0, %v7238_v1  ;;  %v4294_v59 = vpop.permute.xlu1 %4293 }
 0x2fe   : > { %6446 = vmatmul.mubr.msk.bf16.gmra.mrb[72].mxu0 %vm579_vm3, %v3917_v25 }
 0x2ff   : > { %v8664_v53 = vpop.f32.mrb[12].mxu1  ;;  %6449 = vmatprep.mubr.msk.bf16.mxu0 %vm7239_vm0, %v7238_v1 }
 0x300   : > { %v5957_v42 = vpop.f32.mrb[13].mxu1 }
 0x301   : > { %v8669_v12 = vpop.f32.mrb[14].mxu1 }
 0x302   : > { %v5958_v17 = vpop.f32.mrb[15].mxu1 }
 0x304   : > { %6110 = vmatmul.mubr.msk.bf16.gmra.mrb[80].mxu1 %vm579_vm3, %v2169_v61 }
 0x306   : > { %6450 = vmatmul.mubr.msk.bf16.gmra.mrb[76].mxu0 %vm579_vm3, %v3919_v37 }
 0x307   : > { %v8675_v0 = vpop.f32.mrb[16].mxu1  ;;  %6453 = vmatprep.mubr.msk.bf16.mxu0 %vm7239_vm0, %v7238_v1 }
 0x308   : > { %v5961_v49 = vpop.f32.mrb[17].mxu1 }
 0x309   : > { %v8680_v40 = vpop.f32.mrb[18].mxu1 }
 0x30a   : > { %v5962_v7 = vpop.f32.mrb[19].mxu1 }
 0x30e   : > { %6454 = vmatmul.mubr.msk.bf16.gmra.mrb[80].mxu0 %vm579_vm3, %v3921_v24 }
 0x30f   : > { %v8684_v10 = vpop.f32.mrb[20].mxu1 }
 0x310   : > { %v5965_v15 = vpop.f32.mrb[21].mxu1 }
 0x311   : > { %v8686_v6 = vpop.f32.mrb[22].mxu1 }
 0x312   : > { %v5966_v5 = vpop.f32.mrb[23].mxu1 }
 0x317   : > { %v8688_v63 = vpop.f32.mrb[24].mxu1 }
 0x318   : > { %v5969_v51 = vpop.f32.mrb[25].mxu1 }
 0x319   : > { %v8690_v1 = vpop.f32.mrb[26].mxu1  ;;  %v4299_v51 = vpop.permute.xlu0 %4298 }
 0x31a   : > { %v5970_v41 = vpop.f32.mrb[27].mxu1 }
 0x31f   : > { %v8692_v23 = vpop.f32.mrb[28].mxu1 }
 0x320   : > { %v5973_v22 = vpop.f32.mrb[29].mxu1 }
 0x321   : > { %v8694_v2 = vpop.f32.mrb[30].mxu1 }
 0x322   : > { %v5974_v52 = vpop.f32.mrb[31].mxu1 }
 0x327   : > { %v8696_v26 = vpop.f32.mrb[32].mxu1 }
 0x328   : > { %v5977_v19 = vpop.f32.mrb[33].mxu1 }
 0x329   : > { %v8698_v60 = vpop.f32.mrb[34].mxu1  ;;  %v4304_v19 = vpop.permute.xlu1 %4303 }
 0x32a   : > { %v5978_v28 = vpop.f32.mrb[35].mxu1 }
 0x32f   : > { %v8700_v45 = vpop.f32.mrb[36].mxu1 }
 0x330   : > { %v5981_v29 = vpop.f32.mrb[37].mxu1 }
 0x331   : > { %v8702_v20 = vpop.f32.mrb[38].mxu1 }
 0x332   : > { %v5982_v50 = vpop.f32.mrb[39].mxu1 }
 0x337   : > { %v8704_v30 = vpop.f32.mrb[40].mxu1 }
 0x338   : > { %v5985_v31 = vpop.f32.mrb[41].mxu1 }
 0x339   : > { %v8707_v13 = vpop.f32.mrb[42].mxu1 }
 0x33a   : > { %v5986_v21 = vpop.f32.mrb[43].mxu1 }
 0x341   : > { %v4025_v3 = vpop.f32.mrb[0].mxu0 }
 0x342   : > { %v6459_v34 = vadd.f32 %v4025_v3, %v8622_v27  ;;  %v6375_v36 = vpop.f32.mrb[1].mxu0 }
 0x343   : > { %v4028_v11 = vpop.f32.mrb[2].mxu0 }
 0x344   : > { %v6460_v4 = vadd.f32 %v4028_v11, %v8627_v14  ;;  %v6376_v62 = vpop.f32.mrb[3].mxu0  ;;  %v4486_v46 = vmul.f32 %v6459_v34, %v4279_v18 }
 0x346   : > { %v5363_v55 = vpack.c.bf16 %v6460_v4, %v6459_v34  ;;  %v4487_v48 = vmul.f32 %v6460_v4, %v4284_v38  ;;  %v4576_v27 = vmul.f32 %v6459_v34, %v4486_v46  ;;  %v4309_v38 = vpop.permute.xlu0 %4308 }
 0x348   : > { %5364 = vst [vmem:[%s8714_s25] sm:$0xff] %v5363_v55   ;;  %v4528_v44 = vadd.f32 %v4487_v48, %v4486_v46  ;;  %v4577_v47 = vmul.f32 %v6460_v4, %v4487_v48  ;;  %v4314_v55 = vpop.permute.xlu1 %4313 }
 0x349   : > { %v4033_v54 = vpop.f32.mrb[4].mxu0 }
 0x34a   : > { %v4618_v58 = vadd.f32 %v4577_v47, %v4576_v27  ;;  %v6461_v14 = vadd.f32 %v4033_v54, %v8637_v57  ;;  %v6379_v16 = vpop.f32.mrb[5].mxu0 }
 0x34b   : > { %v4036_v56 = vpop.f32.mrb[6].mxu0 }
 0x34c   : > { %v4488_v25 = vmul.f32 %v6461_v14, %v4289_v39  ;;  %v6462_v43 = vadd.f32 %v4036_v56, %v8642_v8  ;;  %v6380_v42 = vpop.f32.mrb[7].mxu0 }
 0x34e   : > { %v4529_v35 = vadd.f32 %v4528_v44, %v4488_v25  ;;  %v4578_v61 = vmul.f32 %v6461_v14, %v4488_v25  ;;  %v4489_v17 = vmul.f32 %v6462_v43, %v4294_v59  ;;  %v5368_v37 = vpack.c.bf16 %v6462_v43, %v6461_v14  ;;  %v4319_v25 = vpop.permute.xlu0 %4318 }
 0x350   : > { %v4619_v49 = vadd.f32 %v4618_v58, %v4578_v61  ;;  %v4530_v9 = vadd.f32 %v4529_v35, %v4489_v17  ;;  %v4579_v7 = vmul.f32 %v6462_v43, %v4489_v17  ;;  %5465 = vst [vmem:[%s8714_s25 + $0x8] sm:$0xff] %v5368_v37   ;;  %v4324_v35 = vpop.permute.xlu1 %4323 }
 0x351   : > { %v4041_v24 = vpop.f32.mrb[8].mxu0 }
 0x352   : > { %v4620_v15 = vadd.f32 %v4619_v49, %v4579_v7  ;;  %v6463_v57 = vadd.f32 %v4041_v24, %v8651_v32  ;;  %v6383_v5 = vpop.f32.mrb[9].mxu0 }
 0x353   : > { %v4044_v41 = vpop.f32.mrb[10].mxu0 }
 0x354   : > { %v4490_v22 = vmul.f32 %v6463_v57, %v4299_v51  ;;  %v6464_v8 = vadd.f32 %v4044_v41, %v8656_v33  ;;  %v6384_v52 = vpop.f32.mrb[11].mxu0  ;;  %v4329_v51 = vpop.permute.xlu0 %4328 }
 0x355   : > { %v4334_v52 = vpop.permute.xlu1 %4333 }
 0x356   : > { %v4531_v28 = vadd.f32 %v4530_v9, %v4490_v22  ;;  %v4580_v29 = vmul.f32 %v6463_v57, %v4490_v22  ;;  %v4491_v50 = vmul.f32 %v6464_v8, %v4304_v19  ;;  %v5373_v31 = vpack.c.bf16 %v6464_v8, %v6463_v57 }
 0x358   : > { %v4621_v21 = vadd.f32 %v4620_v15, %v4580_v29  ;;  %v4532_v18 = vadd.f32 %v4531_v28, %v4491_v50  ;;  %v4581_v3 = vmul.f32 %v6464_v8, %v4491_v50  ;;  %5466 = vst [vmem:[%s8714_s25 + $0x10] sm:$0xff] %v5373_v31  }
 0x359   : > { %v4049_v34 = vpop.f32.mrb[12].mxu0 }
 0x35a   : > { %v4622_v36 = vadd.f32 %v4621_v21, %v4581_v3  ;;  %v6465_v32 = vadd.f32 %v4049_v34, %v8664_v53  ;;  %v6387_v11 = vpop.f32.mrb[13].mxu0 }
 0x35b   : > { %v4052_v4 = vpop.f32.mrb[14].mxu0 }
 0x35c   : > { %v4492_v62 = vmul.f32 %v6465_v32, %v4309_v38  ;;  %v6466_v33 = vadd.f32 %v4052_v4, %v8669_v12  ;;  %v6388_v46 = vpop.f32.mrb[15].mxu0 }
 0x35e   : > { %v4533_v48 = vadd.f32 %v4532_v18, %v4492_v62  ;;  %v4582_v39 = vmul.f32 %v6465_v32, %v4492_v62  ;;  %v4493_v44 = vmul.f32 %v6466_v33, %v4314_v55  ;;  %v5378_v27 = vpack.c.bf16 %v6466_v33, %v6465_v32  ;;  %v4339_v32 = vpop.permute.xlu0 %4338  ;;  %v4344_v62 = vpop.permute.xlu1 %4343 }
 0x360   : > { %v4623_v47 = vadd.f32 %v4622_v36, %v4582_v39  ;;  %v4534_v54 = vadd.f32 %v4533_v48, %v4493_v44  ;;  %v4583_v58 = vmul.f32 %v6466_v33, %v4493_v44  ;;  %5467 = vst [vmem:[%s8714_s25 + $0x18] sm:$0xff] %v5378_v27  }
 0x361   : > { %v4057_v14 = vpop.f32.mrb[16].mxu0 }
 0x362   : > { %v4624_v16 = vadd.f32 %v4623_v47, %v4583_v58  ;;  %v6467_v53 = vadd.f32 %v4057_v14, %v8675_v0  ;;  %v6391_v56 = vpop.f32.mrb[17].mxu0  ;;  %v4349_v14 = vpop.permute.xlu0 %4348 }
 0x363   : > { %v4060_v43 = vpop.f32.mrb[18].mxu0 }
 0x364   : > { %v4494_v42 = vmul.f32 %v6467_v53, %v4319_v25  ;;  %v6468_v12 = vadd.f32 %v4060_v43, %v8680_v40  ;;  %v6392_v59 = vpop.f32.mrb[19].mxu0  ;;  %v4354_v25 = vpop.permute.xlu1 %4353 }
 0x366   : > { %v4535_v61 = vadd.f32 %v4534_v54, %v4494_v42  ;;  %v4584_v17 = vmul.f32 %v6467_v53, %v4494_v42  ;;  %v4495_v37 = vmul.f32 %v6468_v12, %v4324_v35  ;;  %v5383_v49 = vpack.c.bf16 %v6468_v12, %v6467_v53 }
 0x368   : > { %v4625_v9 = vadd.f32 %v4624_v16, %v4584_v17  ;;  %v4536_v7 = vadd.f32 %v4535_v61, %v4495_v37  ;;  %v4585_v24 = vmul.f32 %v6468_v12, %v4495_v37  ;;  %5468 = vst [vmem:[%s8714_s25 + $0x20] sm:$0xff] %v5383_v49  }
 0x369   : > { %v4065_v15 = vpop.f32.mrb[20].mxu0 }
 0x36a   : > { %v4626_v57 = vadd.f32 %v4625_v9, %v4585_v24  ;;  %v6469_v0 = vadd.f32 %v4065_v15, %v8684_v10  ;;  %v6395_v5 = vpop.f32.mrb[21].mxu0 }
 0x36b   : > { %v4068_v41 = vpop.f32.mrb[22].mxu0 }
 0x36c   : > { %v4496_v22 = vmul.f32 %v6469_v0, %v4329_v51  ;;  %v6470_v40 = vadd.f32 %v4068_v41, %v8686_v6  ;;  %v6396_v8 = vpop.f32.mrb[23].mxu0 }
 0x36e   : > { %v4537_v19 = vadd.f32 %v4536_v7, %v4496_v22  ;;  %v4586_v28 = vmul.f32 %v6469_v0, %v4496_v22  ;;  %v4497_v29 = vmul.f32 %v6470_v40, %v4334_v52  ;;  %v5388_v50 = vpack.c.bf16 %v6470_v40, %v6469_v0  ;;  %v4359_v7 = vpop.permute.xlu0 %4358  ;;  %v4364_v0 = vpop.permute.xlu1 %4363 }
 0x370   : > { %v4627_v31 = vadd.f32 %v4626_v57, %v4586_v28  ;;  %v4538_v21 = vadd.f32 %v4537_v19, %v4497_v29  ;;  %v4587_v18 = vmul.f32 %v6470_v40, %v4497_v29  ;;  %5469 = vst [vmem:[%s8714_s25 + $0x28] sm:$0xff] %v5388_v50  }
 0x371   : > { %v4073_v3 = vpop.f32.mrb[24].mxu0 }
 0x372   : > { %v4628_v34 = vadd.f32 %v4627_v31, %v4587_v18  ;;  %v6471_v10 = vadd.f32 %v4073_v3, %v8688_v63  ;;  %v6399_v36 = vpop.f32.mrb[25].mxu0  ;;  %v4369_v50 = vpop.permute.xlu0 %4368 }
 0x373   : > { %v4076_v11 = vpop.f32.mrb[26].mxu0  ;;  %v4374_v3 = vpop.permute.xlu1 %4373 }
 0x374   : > { %v4498_v38 = vmul.f32 %v6471_v10, %v4339_v32  ;;  %v6472_v6 = vadd.f32 %v4076_v11, %v8690_v1  ;;  %v6400_v4 = vpop.f32.mrb[27].mxu0 }
 0x376   : > { %v4539_v33 = vadd.f32 %v4538_v21, %v4498_v38  ;;  %v4588_v46 = vmul.f32 %v6471_v10, %v4498_v38  ;;  %v4499_v55 = vmul.f32 %v6472_v6, %v4344_v62  ;;  %v5393_v48 = vpack.c.bf16 %v6472_v6, %v6471_v10 }
 0x378   : > { %v4629_v39 = vadd.f32 %v4628_v34, %v4588_v46  ;;  %v4540_v44 = vadd.f32 %v4539_v33, %v4499_v55  ;;  %v4589_v27 = vmul.f32 %v6472_v6, %v4499_v55  ;;  %5470 = vst [vmem:[%s8714_s25 + $0x30] sm:$0xff] %v5393_v48  }
 0x379   : > { %v4081_v47 = vpop.f32.mrb[28].mxu0 }
 0x37a   : > { %v4630_v54 = vadd.f32 %v4629_v39, %v4589_v27  ;;  %v6473_v63 = vadd.f32 %v4081_v47, %v8692_v23  ;;  %v6403_v58 = vpop.f32.mrb[29].mxu0 }
 0x37b   : > { %v4084_v16 = vpop.f32.mrb[30].mxu0 }
 0x37c   : > { %v4500_v53 = vmul.f32 %v6473_v63, %v4349_v14  ;;  %v6474_v1 = vadd.f32 %v4084_v16, %v8694_v2  ;;  %v6404_v56 = vpop.f32.mrb[31].mxu0 }
 0x37e   : > { %v4541_v43 = vadd.f32 %v4540_v44, %v4500_v53  ;;  %v4590_v42 = vmul.f32 %v6473_v63, %v4500_v53  ;;  %v4501_v12 = vmul.f32 %v6474_v1, %v4354_v25  ;;  %v5398_v59 = vpack.c.bf16 %v6474_v1, %v6473_v63  ;;  %v4384_v63 = vpop.permute.xlu1 %4383 }
 0x380   : > { %v4631_v35 = vadd.f32 %v4630_v54, %v4590_v42  ;;  %v4542_v61 = vadd.f32 %v4541_v43, %v4501_v12  ;;  %v4591_v17 = vmul.f32 %v6474_v1, %v4501_v12  ;;  %5471 = vst [vmem:[%s8714_s25 + $0x38] sm:$0xff] %v5398_v59  }
 0x381   : > { %v4089_v37 = vpop.f32.mrb[32].mxu0 }
 0x382   : > { %v4632_v49 = vadd.f32 %v4631_v35, %v4591_v17  ;;  %v6475_v23 = vadd.f32 %v4089_v37, %v8696_v26  ;;  %v6407_v9 = vpop.f32.mrb[33].mxu0 }
 0x383   : > { %v4092_v24 = vpop.f32.mrb[34].mxu0 }
 0x384   : > { %v4502_v15 = vmul.f32 %v6475_v23, %v4359_v7  ;;  %v6476_v2 = vadd.f32 %v4092_v24, %v8698_v60  ;;  %v6408_v57 = vpop.f32.mrb[35].mxu0  ;;  %v4394_v7 = vpop.permute.xlu1 %4393 }
 0x386   : > { %v4543_v5 = vadd.f32 %v4542_v61, %v4502_v15  ;;  %v4592_v51 = vmul.f32 %v6475_v23, %v4502_v15  ;;  %v4503_v41 = vmul.f32 %v6476_v2, %v4364_v0  ;;  %v5403_v22 = vpack.c.bf16 %v6476_v2, %v6475_v23 }
 0x388   : > { %v4633_v40 = vadd.f32 %v4632_v49, %v4592_v51  ;;  %v4544_v8 = vadd.f32 %v4543_v5, %v4503_v41  ;;  %v4593_v52 = vmul.f32 %v6476_v2, %v4503_v41  ;;  %5472 = vst [vmem:[%s8714_s25 + $0x40] sm:$0xff] %v5403_v22  }
 0x389   : > { %v4097_v19 = vpop.f32.mrb[36].mxu0 }
 0x38a   : > { %v4634_v28 = vadd.f32 %v4633_v40, %v4593_v52  ;;  %v6477_v26 = vadd.f32 %v4097_v19, %v8700_v45  ;;  %v6411_v29 = vpop.f32.mrb[37].mxu0 }
 0x38b   : > { %v4100_v31 = vpop.f32.mrb[38].mxu0 }
 0x38c   : > { %v4504_v21 = vmul.f32 %v6477_v26, %v4369_v50  ;;  %v6478_v60 = vadd.f32 %v4100_v31, %v8702_v20  ;;  %v6412_v18 = vpop.f32.mrb[39].mxu0  ;;  %v4379_v20 = vpop.permute.xlu0 %4378 }
 0x38d   : > { %v4404_v18 = vpop.permute.xlu1 %4403 }
 0x38e   : > { %v4545_v34 = vadd.f32 %v4544_v8, %v4504_v21  ;;  %v4594_v10 = vmul.f32 %v6477_v26, %v4504_v21  ;;  %v4505_v36 = vmul.f32 %v6478_v60, %v4374_v3  ;;  %v5408_v32 = vpack.c.bf16 %v6478_v60, %v6477_v26 }
 0x38f   : > { %v2361_v11 = vpop.f32.mrb[44].mxu1 }
 0x390   : > { %v6075_v38 = vpop.f32.mrb[45].mxu1  ;;  %v4635_v6 = vadd.f32 %v4634_v28, %v4594_v10  ;;  %v4546_v4 = vadd.f32 %v4545_v34, %v4505_v36  ;;  %v4595_v62 = vmul.f32 %v6478_v60, %v4505_v36  ;;  %5473 = vst [vmem:[%s8714_s25 + $0x48] sm:$0xff] %v5408_v32  }
 0x391   : > { %v2364_v45 = vpop.f32.mrb[46].mxu1  ;;  %v4105_v33 = vpop.f32.mrb[40].mxu0 }
 0x392   : > { %v6076_v46 = vpop.f32.mrb[47].mxu1  ;;  %v4636_v55 = vadd.f32 %v4635_v6, %v4595_v62  ;;  %v6479_v48 = vadd.f32 %v4105_v33, %v8704_v30  ;;  %v6415_v39 = vpop.f32.mrb[41].mxu0 }
 0x393   : > { %v4108_v44 = vpop.f32.mrb[42].mxu0 }
 0x394   : > { %v4506_v27 = vmul.f32 %v6479_v48, %v4379_v20  ;;  %v6480_v47 = vadd.f32 %v4108_v44, %v8707_v13  ;;  %v6416_v54 = vpop.f32.mrb[43].mxu0  ;;  %v4389_v13 = vpop.permute.xlu0 %4388 }
 0x395   : > { %v4414_v54 = vpop.permute.xlu1 %4413 }
 0x396   : > { %v4547_v58 = vadd.f32 %v4546_v4, %v4506_v27  ;;  %v4596_v14 = vmul.f32 %v6479_v48, %v4506_v27  ;;  %v4507_v16 = vmul.f32 %v6480_v47, %v4384_v63  ;;  %v5413_v53 = vpack.c.bf16 %v6480_v47, %v6479_v48 }
 0x397   : > { %v2369_v1 = vpop.f32.mrb[48].mxu1 }
 0x398   : > { %v6079_v56 = vpop.f32.mrb[49].mxu1  ;;  %v4637_v25 = vadd.f32 %v4636_v55, %v4596_v14  ;;  %v4548_v43 = vadd.f32 %v4547_v58, %v4507_v16  ;;  %v4597_v42 = vmul.f32 %v6480_v47, %v4507_v16  ;;  %5474 = vst [vmem:[%s8714_s25 + $0x50] sm:$0xff] %v5413_v53   ;;  %v4399_v29 = vpop.permute.xlu0 %4398 }
 0x399   : > { %v2372_v30 = vpop.f32.mrb[50].mxu1  ;;  %v4113_v12 = vpop.f32.mrb[44].mxu0 }
 0x39a   : > { %v6080_v59 = vpop.f32.mrb[51].mxu1  ;;  %v4638_v35 = vadd.f32 %v4637_v25, %v4597_v42  ;;  %v6481_v61 = vadd.f32 %v4113_v12, %v2361_v11  ;;  %v6419_v17 = vpop.f32.mrb[45].mxu0 }
 0x39b   : > { %v4116_v37 = vpop.f32.mrb[46].mxu0 }
 0x39c   : > { %v4508_v49 = vmul.f32 %v6481_v61, %v4389_v13  ;;  %v6482_v23 = vadd.f32 %v4116_v37, %v2364_v45  ;;  %v6420_v9 = vpop.f32.mrb[47].mxu0  ;;  %v4409_v39 = vpop.permute.xlu0 %4408 }
 0x39d   : > { %v4424_v9 = vpop.permute.xlu1 %4423 }
 0x39e   : > { %v4549_v24 = vadd.f32 %v4548_v43, %v4508_v49  ;;  %v4598_v15 = vmul.f32 %v6481_v61, %v4508_v49  ;;  %v4509_v2 = vmul.f32 %v6482_v23, %v4394_v7  ;;  %v5418_v57 = vpack.c.bf16 %v6482_v23, %v6481_v61 }
 0x39f   : > { %v2377_v0 = vpop.f32.mrb[52].mxu1 }
 0x3a0   : > { %v6083_v5 = vpop.f32.mrb[53].mxu1  ;;  %v4639_v51 = vadd.f32 %v4638_v35, %v4598_v15  ;;  %v4550_v41 = vadd.f32 %v4549_v24, %v4509_v2  ;;  %v4599_v22 = vmul.f32 %v6482_v23, %v4509_v2  ;;  %5475 = vst [vmem:[%s8714_s25 + $0x58] sm:$0xff] %v5418_v57   ;;  %v4419_v17 = vpop.permute.xlu0 %4418 }
 0x3a1   : > { %v2380_v40 = vpop.f32.mrb[54].mxu1  ;;  %v4121_v8 = vpop.f32.mrb[48].mxu0 }
 0x3a2   : > { %v6084_v52 = vpop.f32.mrb[55].mxu1  ;;  %v4640_v19 = vadd.f32 %v4639_v51, %v4599_v22  ;;  %v6483_v28 = vadd.f32 %v4121_v8, %v2369_v1  ;;  %v6423_v26 = vpop.f32.mrb[49].mxu0 }
 0x3a3   : > { %v4124_v50 = vpop.f32.mrb[50].mxu0 }
 0x3a4   : > { %v4510_v31 = vmul.f32 %v6483_v28, %v4399_v29  ;;  %v6484_v21 = vadd.f32 %v4124_v50, %v2372_v30  ;;  %v6424_v60 = vpop.f32.mrb[51].mxu0  ;;  %v4429_v26 = vpop.permute.xlu0 %4428 }
 0x3a5   : > { %v4434_v60 = vpop.permute.xlu1 %4433 }
 0x3a6   : > { %v4551_v3 = vadd.f32 %v4550_v41, %v4510_v31  ;;  %v4600_v34 = vmul.f32 %v6483_v28, %v4510_v31  ;;  %v4511_v10 = vmul.f32 %v6484_v21, %v4404_v18  ;;  %v5423_v36 = vpack.c.bf16 %v6484_v21, %v6483_v28 }
 0x3a7   : > { %v2385_v32 = vpop.f32.mrb[56].mxu1 }
 0x3a8   : > { %v6087_v11 = vpop.f32.mrb[57].mxu1  ;;  %v4641_v38 = vadd.f32 %v4640_v19, %v4600_v34  ;;  %v4552_v6 = vadd.f32 %v4551_v3, %v4511_v10  ;;  %v4601_v4 = vmul.f32 %v6484_v21, %v4511_v10  ;;  %5476 = vst [vmem:[%s8714_s25 + $0x60] sm:$0xff] %v5423_v36  }
 0x3a9   : > { %v2388_v62 = vpop.f32.mrb[58].mxu1  ;;  %v4129_v45 = vpop.f32.mrb[52].mxu0 }
 0x3aa   : > { %v6088_v33 = vpop.f32.mrb[59].mxu1  ;;  %v4642_v46 = vadd.f32 %v4641_v38, %v4601_v4  ;;  %v6485_v55 = vadd.f32 %v4129_v45, %v2377_v0  ;;  %v6427_v48 = vpop.f32.mrb[53].mxu0 }
 0x3ab   : > { %v4132_v20 = vpop.f32.mrb[54].mxu0  ;;  %v4439_v48 = vpop.permute.xlu0 %4438 }
 0x3ac   : > { %v4512_v44 = vmul.f32 %v6485_v55, %v4409_v39  ;;  %v6486_v27 = vadd.f32 %v4132_v20, %v2380_v40  ;;  %v6428_v47 = vpop.f32.mrb[55].mxu0 }
 0x3ad   : > { %v4444_v47 = vpop.permute.xlu1 %4443 }
 0x3ae   : > { %v4553_v63 = vadd.f32 %v4552_v6, %v4512_v44  ;;  %v4602_v58 = vmul.f32 %v6485_v55, %v4512_v44  ;;  %v4513_v14 = vmul.f32 %v6486_v27, %v4414_v54  ;;  %v5428_v16 = vpack.c.bf16 %v6486_v27, %v6485_v55 }
 0x3af   : > { %v2393_v53 = vpop.f32.mrb[60].mxu1 }
 0x3b0   : > { %v6091_v1 = vpop.f32.mrb[61].mxu1  ;;  %v4643_v56 = vadd.f32 %v4642_v46, %v4602_v58  ;;  %v4554_v25 = vadd.f32 %v4553_v63, %v4513_v14  ;;  %v4603_v43 = vmul.f32 %v6486_v27, %v4513_v14  ;;  %5477 = vst [vmem:[%s8714_s25 + $0x68] sm:$0xff] %v5428_v16  }
 0x3b1   : > { %v2396_v42 = vpop.f32.mrb[62].mxu1  ;;  %v4137_v30 = vpop.f32.mrb[56].mxu0 }
 0x3b2   : > { %v6092_v12 = vpop.f32.mrb[63].mxu1  ;;  %v4644_v59 = vadd.f32 %v4643_v56, %v4603_v43  ;;  %v6487_v35 = vadd.f32 %v4137_v30, %v2385_v32  ;;  %v6431_v61 = vpop.f32.mrb[57].mxu0 }
 0x3b3   : > { %v4140_v13 = vpop.f32.mrb[58].mxu0  ;;  %v4449_v61 = vpop.permute.xlu0 %4448 }
 0x3b4   : > { %v4514_v37 = vmul.f32 %v6487_v35, %v4419_v17  ;;  %v6488_v49 = vadd.f32 %v4140_v13, %v2388_v62  ;;  %v6432_v23 = vpop.f32.mrb[59].mxu0 }
 0x3b5   : > { %v4454_v23 = vpop.permute.xlu1 %4453 }
 0x3b6   : > { %v4555_v7 = vadd.f32 %v4554_v25, %v4514_v37  ;;  %v4604_v24 = vmul.f32 %v6487_v35, %v4514_v37  ;;  %v4515_v15 = vmul.f32 %v6488_v49, %v4424_v9  ;;  %v5433_v2 = vpack.c.bf16 %v6488_v49, %v6487_v35 }
 0x3b7   : > { %v2401_v57 = vpop.f32.mrb[64].mxu1 }
 0x3b8   : > { %v6095_v0 = vpop.f32.mrb[65].mxu1  ;;  %v4645_v5 = vadd.f32 %v4644_v59, %v4604_v24  ;;  %v4556_v51 = vadd.f32 %v4555_v7, %v4515_v15  ;;  %v4605_v41 = vmul.f32 %v6488_v49, %v4515_v15  ;;  %5478 = vst [vmem:[%s8714_s25 + $0x70] sm:$0xff] %v5433_v2  }
 0x3b9   : > { %v2404_v22 = vpop.f32.mrb[66].mxu1  ;;  %v4145_v40 = vpop.f32.mrb[60].mxu0 }
 0x3ba   : > { %v6096_v8 = vpop.f32.mrb[67].mxu1  ;;  %v4646_v52 = vadd.f32 %v4645_v5, %v4605_v41  ;;  %v6489_v19 = vadd.f32 %v4145_v40, %v2393_v53  ;;  %v6435_v28 = vpop.f32.mrb[61].mxu0 }
 0x3bb   : > { %v4148_v29 = vpop.f32.mrb[62].mxu0  ;;  %v4459_v28 = vpop.permute.xlu0 %4458 }
 0x3bc   : > { %v4516_v50 = vmul.f32 %v6489_v19, %v4429_v26  ;;  %v6490_v31 = vadd.f32 %v4148_v29, %v2396_v42  ;;  %v6436_v21 = vpop.f32.mrb[63].mxu0 }
 0x3bd   : > { %v4464_v21 = vpop.permute.xlu1 %4463 }
 0x3be   : > { %v4557_v18 = vadd.f32 %v4556_v51, %v4516_v50  ;;  %v4606_v3 = vmul.f32 %v6489_v19, %v4516_v50  ;;  %v4517_v34 = vmul.f32 %v6490_v31, %v4434_v60  ;;  %v5438_v10 = vpack.c.bf16 %v6490_v31, %v6489_v19 }
 0x3bf   : > { %v2409_v36 = vpop.f32.mrb[68].mxu1 }
 0x3c0   : > { %v6099_v32 = vpop.f32.mrb[69].mxu1  ;;  %v4647_v11 = vadd.f32 %v4646_v52, %v4606_v3  ;;  %v4558_v38 = vadd.f32 %v4557_v18, %v4517_v34  ;;  %v4607_v6 = vmul.f32 %v6490_v31, %v4517_v34  ;;  %5479 = vst [vmem:[%s8714_s25 + $0x78] sm:$0xff] %v5438_v10  }
 0x3c1   : > { %v2412_v4 = vpop.f32.mrb[70].mxu1  ;;  %v4153_v62 = vpop.f32.mrb[64].mxu0 }
 0x3c2   : > { %v6100_v45 = vpop.f32.mrb[71].mxu1  ;;  %v4648_v33 = vadd.f32 %v4647_v11, %v4607_v6  ;;  %v6491_v46 = vadd.f32 %v4153_v62, %v2401_v57  ;;  %v6439_v55 = vpop.f32.mrb[65].mxu0 }
 0x3c3   : > { %v4156_v39 = vpop.f32.mrb[66].mxu0  ;;  %v4469_v55 = vpop.permute.xlu0 %4468 }
 0x3c4   : > { %v4518_v20 = vmul.f32 %v6491_v46, %v4439_v48  ;;  %v6492_v44 = vadd.f32 %v4156_v39, %v2404_v22  ;;  %v6440_v27 = vpop.f32.mrb[67].mxu0 }
 0x3c5   : > { %v4474_v27 = vpop.permute.xlu1 %4473 }
 0x3c6   : > { %v4559_v54 = vadd.f32 %v4558_v38, %v4518_v20  ;;  %v4608_v63 = vmul.f32 %v6491_v46, %v4518_v20  ;;  %v4519_v58 = vmul.f32 %v6492_v44, %v4444_v47  ;;  %v5443_v14 = vpack.c.bf16 %v6492_v44, %v6491_v46 }
 0x3c7   : > { %v2417_v16 = vpop.f32.mrb[72].mxu1 }
 0x3c8   : > { %v6103_v53 = vpop.f32.mrb[73].mxu1  ;;  %v4649_v1 = vadd.f32 %v4648_v33, %v4608_v63  ;;  %v4560_v56 = vadd.f32 %v4559_v54, %v4519_v58  ;;  %v4609_v25 = vmul.f32 %v6492_v44, %v4519_v58  ;;  %5480 = vst [vmem:[%s8714_s25 + $0x80] sm:$0xff] %v5443_v14  }
 0x3c9   : > { %v2420_v43 = vpop.f32.mrb[74].mxu1  ;;  %v4161_v42 = vpop.f32.mrb[68].mxu0 }
 0x3ca   : > { %v6104_v30 = vpop.f32.mrb[75].mxu1  ;;  %v4650_v12 = vadd.f32 %v4649_v1, %v4609_v25  ;;  %v6493_v59 = vadd.f32 %v4161_v42, %v2409_v36  ;;  %v6443_v35 = vpop.f32.mrb[69].mxu0 }
 0x3cb   : > { %v4164_v17 = vpop.f32.mrb[70].mxu0  ;;  %v4479_v42 = vpop.permute.xlu0 %4478 }
 0x3cc   : > { %v4520_v13 = vmul.f32 %v6493_v59, %v4449_v61  ;;  %v6494_v37 = vadd.f32 %v4164_v17, %v2412_v4  ;;  %v6444_v49 = vpop.f32.mrb[71].mxu0  ;;  %v4484_v61 = vpop.permute.xlu1 %4483 }
 0x3ce   : > { %v4561_v9 = vadd.f32 %v4560_v56, %v4520_v13  ;;  %v4610_v7 = vmul.f32 %v6493_v59, %v4520_v13  ;;  %v4521_v24 = vmul.f32 %v6494_v37, %v4454_v23  ;;  %v5448_v15 = vpack.c.bf16 %v6494_v37, %v6493_v59 }
 0x3cf   : > { %v2425_v2 = vpop.f32.mrb[76].mxu1 }
 0x3d0   : > { %v6107_v57 = vpop.f32.mrb[77].mxu1  ;;  %v4651_v0 = vadd.f32 %v4650_v12, %v4610_v7  ;;  %v4562_v5 = vadd.f32 %v4561_v9, %v4521_v24  ;;  %v4611_v51 = vmul.f32 %v6494_v37, %v4521_v24  ;;  %5481 = vst [vmem:[%s8714_s25 + $0x88] sm:$0xff] %v5448_v15  }
 0x3d1   : > { %v2428_v41 = vpop.f32.mrb[78].mxu1  ;;  %v4169_v22 = vpop.f32.mrb[72].mxu0 }
 0x3d2   : > { %v6108_v40 = vpop.f32.mrb[79].mxu1  ;;  %v4652_v8 = vadd.f32 %v4651_v0, %v4611_v51  ;;  %v6495_v52 = vadd.f32 %v4169_v22, %v2417_v16  ;;  %v6447_v19 = vpop.f32.mrb[73].mxu0 }
 0x3d3   : > { %v4172_v26 = vpop.f32.mrb[74].mxu0 }
 0x3d4   : > { %v4522_v29 = vmul.f32 %v6495_v52, %v4459_v28  ;;  %v6496_v50 = vadd.f32 %v4172_v26, %v2420_v43  ;;  %v6448_v31 = vpop.f32.mrb[75].mxu0 }
 0x3d6   : > { %v4563_v60 = vadd.f32 %v4562_v5, %v4522_v29  ;;  %v4612_v18 = vmul.f32 %v6495_v52, %v4522_v29  ;;  %v4523_v3 = vmul.f32 %v6496_v50, %v4464_v21  ;;  %v5453_v34 = vpack.c.bf16 %v6496_v50, %v6495_v52 }
 0x3d7   : > { %v2433_v10 = vpop.f32.mrb[80].mxu1 }
 0x3d8   : > { %v6111_v36 = vpop.f32.mrb[81].mxu1  ;;  %v4653_v32 = vadd.f32 %v4652_v8, %v4612_v18  ;;  %v4564_v11 = vadd.f32 %v4563_v60, %v4523_v3  ;;  %v4613_v38 = vmul.f32 %v6496_v50, %v4523_v3  ;;  %5482 = vst [vmem:[%s8714_s25 + $0x90] sm:$0xff] %v5453_v34  }
 0x3d9   : > { %v2436_v6 = vpop.f32.mrb[82].mxu1  ;;  %v4177_v4 = vpop.f32.mrb[76].mxu0 }
 0x3da   : > { %v6112_v62 = vpop.f32.mrb[83].mxu1  ;;  %v4654_v45 = vadd.f32 %v4653_v32, %v4613_v38  ;;  %v6497_v33 = vadd.f32 %v4177_v4, %v2425_v2  ;;  %v6451_v46 = vpop.f32.mrb[77].mxu0 }
 0x3db   : > { %v4180_v48 = vpop.f32.mrb[78].mxu0 }
 0x3dc   : > { %v4524_v39 = vmul.f32 %v6497_v33, %v4469_v55  ;;  %v6498_v20 = vadd.f32 %v4180_v48, %v2428_v41  ;;  %v6452_v44 = vpop.f32.mrb[79].mxu0 }
 0x3de   : > { %v4565_v47 = vadd.f32 %v4564_v11, %v4524_v39  ;;  %v4614_v54 = vmul.f32 %v6497_v33, %v4524_v39  ;;  %v4525_v63 = vmul.f32 %v6498_v20, %v4474_v27  ;;  %v5458_v58 = vpack.c.bf16 %v6498_v20, %v6497_v33 }
 0x3e0   : > { %v4655_v14 = vadd.f32 %v4654_v45, %v4614_v54  ;;  %v4566_v16 = vadd.f32 %v4565_v47, %v4525_v63  ;;  %v4615_v53 = vmul.f32 %v6498_v20, %v4525_v63  ;;  %5483 = vst [vmem:[%s8714_s25 + $0x98] sm:$0xff] %v5458_v58  }
 0x3e1   : > { %v4185_v1 = vpop.f32.mrb[80].mxu0 }
 0x3e2   : > { %v4656_v56 = vadd.f32 %v4655_v14, %v4615_v53  ;;  %v6499_v25 = vadd.f32 %v4185_v1, %v2433_v10  ;;  %v6455_v43 = vpop.f32.mrb[81].mxu0 }
 0x3e3   : > { %v4188_v30 = vpop.f32.mrb[82].mxu0 }
 0x3e4   : > { %v4526_v12 = vmul.f32 %v6499_v25, %v4479_v42  ;;  %v6500_v59 = vadd.f32 %v4188_v30, %v2436_v6  ;;  %v6456_v35 = vpop.f32.mrb[83].mxu0 }
 0x3e6   : > { %v4567_v17 = vadd.f32 %v4566_v16, %v4526_v12  ;;  %v4616_v13 = vmul.f32 %v6499_v25, %v4526_v12  ;;  %v4527_v37 = vmul.f32 %v6500_v59, %v4484_v61  ;;  %v5463_v49 = vpack.c.bf16 %v6500_v59, %v6499_v25 }
 0x3e8   : > { %v4657_v23 = vadd.f32 %v4656_v56, %v4616_v13  ;;  %v4568_v9 = vadd.f32 %v4567_v17, %v4527_v37  ;;  %v4617_v7 = vmul.f32 %v6500_v59, %v4527_v37  ;;  %5484 = vst [vmem:[%s8714_s25 + $0xa0] sm:$0xff] %v5463_v49  }
 0x3ea   : > { %v4569_v24 = vrot.slane %v4568_v9, 4  ;;  %v4658_v15 = vadd.f32 %v4657_v23, %v4617_v7 }
 0x3ec   : > { %v4570_v2 = vadd.f32 %v4569_v24, %v4568_v9  ;;  %v4659_v57 = vrot.slane %v4658_v15, 4 }
 0x3ee   : > { %v4571_v0 = vrot.slane %v4570_v2, 2  ;;  %v4660_v5 = vadd.f32 %v4659_v57, %v4658_v15 }
 0x3f0   : > { %v4572_v51 = vadd.f32 %v4571_v0, %v4570_v2  ;;  %v4661_v41 = vrot.slane %v4660_v5, 2 }
 0x3f2   : > { %v4573_v22 = vrot.slane %v4572_v51, 1  ;;  %v4662_v40 = vadd.f32 %v4661_v41, %v4660_v5 }
 0x3f4   : > { %v4574_v8 = vadd.f32 %v4573_v22, %v4572_v51  ;;  %v4663_v52 = vrot.slane %v4662_v40, 1 }
 0x3f6   : > { %4575 = vst [vmem:[%s239_s29] sm:$0x1] %v4574_v8  ;;  %v4664_v19 = vadd.f32 %v4663_v52, %v4662_v40 }
 0x3f8   : > { %4665 = vst [vmem:[%s242_s7] sm:$0x1] %v4664_v19 }
 0x3f9 PF: > { %s16_s18 = sadd.s32 1, %s7236_s18  }
 0x3fa   : > { %p13_p5 = scmp.ge.s32.totalorder %s16_s18, 4  }
 0x3fc   :  { %15 = sbr.rel (!%p13_p5) target bundleno = 1 (0x1), region = 94 }

</bundles_post_ra>
